<compile_context>
chip_gen: v6e
topology: v6e:2x2x1
jax: 0.10.0
libtpu: 0.0.40
codegen_flags: <defaults>
</compile_context>

<pallas_src>
import jax
import jax.numpy as jnp
from jax.experimental import pallas as pl
from jax.experimental.pallas import tpu as pltpu

BN_EPS = 1e-5


# ---------------------------------------------------------------------------
# Fused kernel
# ---------------------------------------------------------------------------
def _make_fused_kernel(n_bn1, n_pad1, n_bn3, n_z, n_e):
    """Build the fused kernel body with the static pixel counts baked in.

    n_bn1  : number of BN1/BN2 pixels         ((H+2)*(W+2))
    n_pad1 : conv1/conv2 pad pixels in that map (value == bias)
    n_bn3  : number of BN3 pixels             (Ho*Wo)
    n_z    : stride-2 samples landing on conv3/conv4 zero padding
    n_e    : stride-2 samples landing on conv1/conv2 pad rows/cols
    """

    def _mix(w, x):
        # (Cout, Cin) @ (Cin, P) as unrolled broadcast FMAs on the VPU
        # (K=3/8, M=8 matmuls would leave the MXU >99% padding).
        acc = w[:, 0:1] * x[0:1, :]
        for k in range(1, x.shape[0]):
            acc = acc + w[:, k:k + 1] * x[k:k + 1, :]
        return acc

    def _branch(xf, xe, w, b):
        # conv(1x1, pad=1) + training-mode BN over the (H+2)x(W+2) map.
        # Padded pixels of the 1x1 conv equal the bias, handled analytically.
        y = _mix(w, xf) + b                                             # (8, H*W)
        mean = (jnp.sum(y, axis=1, keepdims=True) + n_pad1 * b) / n_bn1
        d = y - mean
        db = b - mean                                                   # value at pad pixels
        var = (jnp.sum(d * d, axis=1, keepdims=True) + n_pad1 * db * db) / n_bn1
        inv = jax.lax.rsqrt(var + BN_EPS)
        ve = (_mix(w, xe) + b - mean) * inv        # normalized values at stride-2 samples
        vborder = db * inv                         # normalized value on the pad border
        return ve, vborder

    def kernel(x1f_ref, x2f_ref, x1e_ref, x2e_ref,
               w1_ref, b1_ref, w2_ref, b2_ref,
               w3_ref, b3_ref, w4_ref, b4_ref,
               oint_ref, oconst_ref):
        v3e, bd3 = _branch(x1f_ref[...], x1e_ref[...], w1_ref[...], b1_ref[...])
        v4e, bd4 = _branch(x2f_ref[...], x2e_ref[...], w2_ref[...], b2_ref[...])

        bsum = b3_ref[...] + b4_ref[...]
        # interior of v10 = conv3(v3) + conv4(v4): stride-2 samples that hit real pixels
        v10 = _mix(w3_ref[...], v3e) + _mix(w4_ref[...], v4e) + bsum    # (8, he*we)
        # samples that hit the conv3/conv4 zero padding
        zc = bsum                                                       # (8, 1)
        # samples that hit the conv1/conv2 pad rows/cols of v3/v4
        ec = _mix(w3_ref[...], bd3) + _mix(w4_ref[...], bd4) + bsum     # (8, 1)

        # BN3 over the full (Ho x Wo) map; border contributions analytic.
        mean = (jnp.sum(v10, axis=1, keepdims=True) + n_z * zc + n_e * ec) / n_bn3
        d = v10 - mean
        dz = zc - mean
        de = ec - mean
        var = (jnp.sum(d * d, axis=1, keepdims=True)
               + n_z * dz * dz + n_e * de * de) / n_bn3
        inv = jax.lax.rsqrt(var + BN_EPS)

        # v11*v12 + (v11 - v11*v12) == v11 (v12 == v11): epilogue is just bn3(v10).
        oint_ref[...] = d * inv
        oconst_ref[:, 0:1] = dz * inv
        oconst_ref[:, 1:2] = de * inv

    return kernel


# ---------------------------------------------------------------------------
# Model forward (single pallas_call + cheap output assembly)
# ---------------------------------------------------------------------------
@jax.jit
def model_forward(x1, x2, params):
    n, cin, h, w = x1.shape
    assert n == 1 and h % 2 == 0 and w % 2 == 0
    cout = params["w1"].shape[0]

    hp, wp = h + 2, w + 2                 # conv1/conv2 output spatial (1x1, pad=1)
    ho, wo = hp // 2 + 1, wp // 2 + 1     # conv3/conv4 output spatial (stride=2, pad=1)
    he, we = h // 2, w // 2               # interior stride-2 samples (even pixels of x)

    n_real = h * w
    n_bn1 = hp * wp
    n_pad1 = n_bn1 - n_real
    n_int = he * we
    n_bn3 = ho * wo
    n_z = ho + wo - 1                     # samples on conv3/conv4 zero padding
    n_e = ho + wo - 3                     # samples on conv1/conv2 pad rows/cols

    # Input plumbing only: flatten, plus the even-pixel sub-sample the stride-2 convs need.
    x1f = x1[0].reshape(cin, n_real)
    x2f = x2[0].reshape(cin, n_real)
    x1e = x1[0, :, ::2, ::2].reshape(cin, n_int)
    x2e = x2[0, :, ::2, ::2].reshape(cin, n_int)

    kernel = _make_fused_kernel(n_bn1, n_pad1, n_bn3, n_z, n_e)
    vmem = pl.BlockSpec(memory_space=pltpu.MemorySpace.VMEM)

    o_int, o_const = pl.pallas_call(
        kernel,
        out_shape=(jax.ShapeDtypeStruct((cout, n_int), jnp.float32),
                   jax.ShapeDtypeStruct((cout, 2), jnp.float32)),
        in_specs=[vmem] * 12,
        out_specs=(vmem, vmem),
    )(x1f, x2f, x1e, x2e,
      params["w1"], params["b1"], params["w2"], params["b2"],
      params["w3"], params["b3"], params["w4"], params["b4"])

    # Assemble the (Ho, Wo) map: first row/col = zero-pad samples, last row/col = conv1-pad
    # samples, interior = kernel's lane-dense tile.
    interior = o_int.reshape(cout, he, we)
    vz = o_const[:, 0][:, None, None]
    ve = o_const[:, 1][:, None, None]
    blk = jnp.concatenate([interior, jnp.broadcast_to(ve, (cout, 1, we))], axis=1)
    blk = jnp.concatenate([blk, jnp.broadcast_to(ve, (cout, he + 1, 1))], axis=2)
    blk = jnp.concatenate([jnp.broadcast_to(vz, (cout, he + 1, 1)), blk], axis=2)
    out = jnp.concatenate([jnp.broadcast_to(vz, (cout, 1, wo)), blk], axis=1)
    return out[None]                      # (1, 8, Ho, Wo)


# ---------------------------------------------------------------------------
# Pure-JAX reference (faithful translation, for correctness check)
# ---------------------------------------------------------------------------
def ref_forward(x1, x2, p):
    def conv_pad1(x, w, b):
        xp = jnp.pad(x, ((0, 0), (0, 0), (1, 1), (1, 1)))
        return jnp.einsum("nchw,oc->nohw", xp, w) + b.reshape(1, -1, 1, 1)

    def bn(y):
        m = y.mean(axis=(0, 2, 3), keepdims=True)
        v = y.var(axis=(0, 2, 3), keepdims=True)
        return (y - m) * jax.lax.rsqrt(v + BN_EPS)

    v3 = bn(conv_pad1(x1, p["w1"], p["b1"]))
    v4 = bn(conv_pad1(x2, p["w2"], p["b2"]))

    def conv_s2(x, w, b):
        return conv_pad1(x, w, b)[:, :, ::2, ::2]

    v10 = conv_s2(v3, p["w3"], p["b3"]) + conv_s2(v4, p["w4"], p["b4"])
    v11 = bn(v10)
    v12 = bn(v10)
    v13 = v11 * v12
    v14 = v11 - v13
    return v13 + v14


# ---------------------------------------------------------------------------
# Deterministic parameter init (PyTorch-style uniform bounds, synthetic)
# ---------------------------------------------------------------------------
def init_params(key):
    def conv_params(k, cout, cin):
        k1, k2 = jax.random.split(k)
        bound = 1.0 / (cin ** 0.5)  # fan_in = cin * 1 * 1
        w = jax.random.uniform(k1, (cout, cin), jnp.float32, -bound, bound)
        b = jax.random.uniform(k2, (cout, 1), jnp.float32, -bound, bound)
        return w, b

    ks = jax.random.split(key, 4)
    w1, b1 = conv_params(ks[0], 8, 3)
    w2, b2 = conv_params(ks[1], 8, 3)
    w3, b3 = conv_params(ks[2], 8, 8)
    w4, b4 = conv_params(ks[3], 8, 8)
    return dict(w1=w1, b1=b1, w2=w2, b2=b2, w3=w3, b3=b3, w4=w4, b4=b4)


if __name__ == "__main__":
    key = jax.random.PRNGKey(0)
    kx1, kx2 = jax.random.split(key)
    # Shapes matching the module spec: (1, 3, 64, 64) NCHW inputs.
    x1 = jax.random.normal(kx1, (1, 3, 64, 64), jnp.float32)
    x2 = jax.random.normal(kx2, (1, 3, 64, 64), jnp.float32)

    params = init_params(jax.random.PRNGKey(42))

    out = jax.block_until_ready(model_forward(x1, x2, params))
    ref = ref_forward(x1, x2, params)

    assert out.shape == ref.shape == (1, 8, 34, 34), (out.shape, ref.shape)
    max_err = float(jnp.max(jnp.abs(out - ref)))
    assert jnp.allclose(out, ref, atol=2e-4, rtol=2e-4), f"mismatch vs reference, max_err={max_err}"

    print("KERNEL_OK")
</pallas_src>

<mosaic_0001>
module attributes {stable_mosaic.version = 11 : i64} {
  func.func @kernel(%arg0: memref<3x4096xf32, #tpu.memory_space<vmem>>, %arg1: memref<3x4096xf32, #tpu.memory_space<vmem>>, %arg2: memref<3x1024xf32, #tpu.memory_space<vmem>>, %arg3: memref<3x1024xf32, #tpu.memory_space<vmem>>, %arg4: memref<8x3xf32, #tpu.memory_space<vmem>>, %arg5: memref<8x1xf32, #tpu.memory_space<vmem>>, %arg6: memref<8x3xf32, #tpu.memory_space<vmem>>, %arg7: memref<8x1xf32, #tpu.memory_space<vmem>>, %arg8: memref<8x8xf32, #tpu.memory_space<vmem>>, %arg9: memref<8x1xf32, #tpu.memory_space<vmem>>, %arg10: memref<8x8xf32, #tpu.memory_space<vmem>>, %arg11: memref<8x1xf32, #tpu.memory_space<vmem>>, %arg12: memref<8x1024xf32, #tpu.memory_space<vmem>>, %arg13: memref<8x2xf32, #tpu.memory_space<vmem>>) attributes {dimension_semantics = [], scalar_prefetch = 0 : i64, scratch_operands = 0 : i64, tpu.core_type = #tpu.core_type<tc>} {
    %c0 = arith.constant 0 : index
    %c0_0 = arith.constant 0 : index
    %0 = vector.load %arg0[%c0, %c0_0] : memref<3x4096xf32, #tpu.memory_space<vmem>>, vector<3x4096xf32>
    %c0_1 = arith.constant 0 : index
    %c0_2 = arith.constant 0 : index
    %1 = vector.load %arg2[%c0_1, %c0_2] : memref<3x1024xf32, #tpu.memory_space<vmem>>, vector<3x1024xf32>
    %c0_3 = arith.constant 0 : index
    %c0_4 = arith.constant 0 : index
    %2 = vector.load %arg4[%c0_3, %c0_4] : memref<8x3xf32, #tpu.memory_space<vmem>>, vector<8x3xf32>
    %c0_5 = arith.constant 0 : index
    %c0_6 = arith.constant 0 : index
    %3 = vector.load %arg5[%c0_5, %c0_6] : memref<8x1xf32, #tpu.memory_space<vmem>>, vector<8x1xf32>
    %4 = vector.extract_strided_slice %2 {offsets = [0, 0], sizes = [8, 1], strides = [1, 1]} : vector<8x3xf32> to vector<8x1xf32>
    %5 = vector.extract_strided_slice %0 {offsets = [0, 0], sizes = [1, 4096], strides = [1, 1]} : vector<3x4096xf32> to vector<1x4096xf32>
    %6 = vector.broadcast %4 : vector<8x1xf32> to vector<8x4096xf32>
    %7 = vector.broadcast %5 : vector<1x4096xf32> to vector<8x4096xf32>
    %8 = arith.mulf %6, %7 : vector<8x4096xf32>
    %9 = vector.extract_strided_slice %2 {offsets = [0, 1], sizes = [8, 1], strides = [1, 1]} : vector<8x3xf32> to vector<8x1xf32>
    %10 = vector.extract_strided_slice %0 {offsets = [1, 0], sizes = [1, 4096], strides = [1, 1]} : vector<3x4096xf32> to vector<1x4096xf32>
    %11 = vector.broadcast %9 : vector<8x1xf32> to vector<8x4096xf32>
    %12 = vector.broadcast %10 : vector<1x4096xf32> to vector<8x4096xf32>
    %13 = arith.mulf %11, %12 : vector<8x4096xf32>
    %14 = arith.addf %8, %13 : vector<8x4096xf32>
    %15 = vector.extract_strided_slice %2 {offsets = [0, 2], sizes = [8, 1], strides = [1, 1]} : vector<8x3xf32> to vector<8x1xf32>
    %16 = vector.extract_strided_slice %0 {offsets = [2, 0], sizes = [1, 4096], strides = [1, 1]} : vector<3x4096xf32> to vector<1x4096xf32>
    %17 = vector.broadcast %15 : vector<8x1xf32> to vector<8x4096xf32>
    %18 = vector.broadcast %16 : vector<1x4096xf32> to vector<8x4096xf32>
    %19 = arith.mulf %17, %18 : vector<8x4096xf32>
    %20 = arith.addf %14, %19 : vector<8x4096xf32>
    %21 = vector.broadcast %3 : vector<8x1xf32> to vector<8x4096xf32>
    %22 = arith.addf %20, %21 : vector<8x4096xf32>
    %cst = arith.constant dense<0.000000e+00> : vector<8xf32>
    %23 = vector.multi_reduction <add>, %22, %cst [1] : vector<8x4096xf32> to vector<8xf32>
    %24 = vector.shape_cast %23 : vector<8xf32> to vector<8x1xf32>
    %cst_7 = arith.constant 2.600000e+02 : f32
    %25 = vector.broadcast %cst_7 : f32 to vector<8x1xf32>
    %26 = arith.mulf %25, %3 : vector<8x1xf32>
    %27 = arith.addf %24, %26 : vector<8x1xf32>
    %cst_8 = arith.constant 4.356000e+03 : f32
    %28 = vector.broadcast %cst_8 : f32 to vector<8x1xf32>
    %29 = arith.divf %27, %28 : vector<8x1xf32>
    %30 = vector.broadcast %29 : vector<8x1xf32> to vector<8x4096xf32>
    %31 = arith.subf %22, %30 : vector<8x4096xf32>
    %32 = arith.subf %3, %29 : vector<8x1xf32>
    %33 = arith.mulf %31, %31 : vector<8x4096xf32>
    %cst_9 = arith.constant dense<0.000000e+00> : vector<8xf32>
    %34 = vector.multi_reduction <add>, %33, %cst_9 [1] : vector<8x4096xf32> to vector<8xf32>
    %35 = vector.shape_cast %34 : vector<8xf32> to vector<8x1xf32>
    %cst_10 = arith.constant 2.600000e+02 : f32
    %36 = vector.broadcast %cst_10 : f32 to vector<8x1xf32>
    %37 = arith.mulf %36, %32 : vector<8x1xf32>
    %38 = arith.mulf %37, %32 : vector<8x1xf32>
    %39 = arith.addf %35, %38 : vector<8x1xf32>
    %cst_11 = arith.constant 4.356000e+03 : f32
    %40 = vector.broadcast %cst_11 : f32 to vector<8x1xf32>
    %41 = arith.divf %39, %40 : vector<8x1xf32>
    %cst_12 = arith.constant 9.99999974E-6 : f32
    %42 = vector.broadcast %cst_12 : f32 to vector<8x1xf32>
    %43 = arith.addf %41, %42 : vector<8x1xf32>
    %44 = math.rsqrt %43 : vector<8x1xf32>
    %45 = vector.extract_strided_slice %2 {offsets = [0, 0], sizes = [8, 1], strides = [1, 1]} : vector<8x3xf32> to vector<8x1xf32>
    %46 = vector.extract_strided_slice %1 {offsets = [0, 0], sizes = [1, 1024], strides = [1, 1]} : vector<3x1024xf32> to vector<1x1024xf32>
    %47 = vector.broadcast %45 : vector<8x1xf32> to vector<8x1024xf32>
    %48 = vector.broadcast %46 : vector<1x1024xf32> to vector<8x1024xf32>
    %49 = arith.mulf %47, %48 : vector<8x1024xf32>
    %50 = vector.extract_strided_slice %2 {offsets = [0, 1], sizes = [8, 1], strides = [1, 1]} : vector<8x3xf32> to vector<8x1xf32>
    %51 = vector.extract_strided_slice %1 {offsets = [1, 0], sizes = [1, 1024], strides = [1, 1]} : vector<3x1024xf32> to vector<1x1024xf32>
    %52 = vector.broadcast %50 : vector<8x1xf32> to vector<8x1024xf32>
    %53 = vector.broadcast %51 : vector<1x1024xf32> to vector<8x1024xf32>
    %54 = arith.mulf %52, %53 : vector<8x1024xf32>
    %55 = arith.addf %49, %54 : vector<8x1024xf32>
    %56 = vector.extract_strided_slice %2 {offsets = [0, 2], sizes = [8, 1], strides = [1, 1]} : vector<8x3xf32> to vector<8x1xf32>
    %57 = vector.extract_strided_slice %1 {offsets = [2, 0], sizes = [1, 1024], strides = [1, 1]} : vector<3x1024xf32> to vector<1x1024xf32>
    %58 = vector.broadcast %56 : vector<8x1xf32> to vector<8x1024xf32>
    %59 = vector.broadcast %57 : vector<1x1024xf32> to vector<8x1024xf32>
    %60 = arith.mulf %58, %59 : vector<8x1024xf32>
    %61 = arith.addf %55, %60 : vector<8x1024xf32>
    %62 = vector.broadcast %3 : vector<8x1xf32> to vector<8x1024xf32>
    %63 = arith.addf %61, %62 : vector<8x1024xf32>
    %64 = vector.broadcast %29 : vector<8x1xf32> to vector<8x1024xf32>
    %65 = arith.subf %63, %64 : vector<8x1024xf32>
    %66 = vector.broadcast %44 : vector<8x1xf32> to vector<8x1024xf32>
    %67 = arith.mulf %65, %66 : vector<8x1024xf32>
    %68 = arith.mulf %32, %44 : vector<8x1xf32>
    %c0_13 = arith.constant 0 : index
    %c0_14 = arith.constant 0 : index
    %69 = vector.load %arg1[%c0_13, %c0_14] : memref<3x4096xf32, #tpu.memory_space<vmem>>, vector<3x4096xf32>
    %c0_15 = arith.constant 0 : index
    %c0_16 = arith.constant 0 : index
    %70 = vector.load %arg3[%c0_15, %c0_16] : memref<3x1024xf32, #tpu.memory_space<vmem>>, vector<3x1024xf32>
    %c0_17 = arith.constant 0 : index
    %c0_18 = arith.constant 0 : index
    %71 = vector.load %arg6[%c0_17, %c0_18] : memref<8x3xf32, #tpu.memory_space<vmem>>, vector<8x3xf32>
    %c0_19 = arith.constant 0 : index
    %c0_20 = arith.constant 0 : index
    %72 = vector.load %arg7[%c0_19, %c0_20] : memref<8x1xf32, #tpu.memory_space<vmem>>, vector<8x1xf32>
    %73 = vector.extract_strided_slice %71 {offsets = [0, 0], sizes = [8, 1], strides = [1, 1]} : vector<8x3xf32> to vector<8x1xf32>
    %74 = vector.extract_strided_slice %69 {offsets = [0, 0], sizes = [1, 4096], strides = [1, 1]} : vector<3x4096xf32> to vector<1x4096xf32>
    %75 = vector.broadcast %73 : vector<8x1xf32> to vector<8x4096xf32>
    %76 = vector.broadcast %74 : vector<1x4096xf32> to vector<8x4096xf32>
    %77 = arith.mulf %75, %76 : vector<8x4096xf32>
    %78 = vector.extract_strided_slice %71 {offsets = [0, 1], sizes = [8, 1], strides = [1, 1]} : vector<8x3xf32> to vector<8x1xf32>
    %79 = vector.extract_strided_slice %69 {offsets = [1, 0], sizes = [1, 4096], strides = [1, 1]} : vector<3x4096xf32> to vector<1x4096xf32>
    %80 = vector.broadcast %78 : vector<8x1xf32> to vector<8x4096xf32>
    %81 = vector.broadcast %79 : vector<1x4096xf32> to vector<8x4096xf32>
    %82 = arith.mulf %80, %81 : vector<8x4096xf32>
    %83 = arith.addf %77, %82 : vector<8x4096xf32>
    %84 = vector.extract_strided_slice %71 {offsets = [0, 2], sizes = [8, 1], strides = [1, 1]} : vector<8x3xf32> to vector<8x1xf32>
    %85 = vector.extract_strided_slice %69 {offsets = [2, 0], sizes = [1, 4096], strides = [1, 1]} : vector<3x4096xf32> to vector<1x4096xf32>
    %86 = vector.broadcast %84 : vector<8x1xf32> to vector<8x4096xf32>
    %87 = vector.broadcast %85 : vector<1x4096xf32> to vector<8x4096xf32>
    %88 = arith.mulf %86, %87 : vector<8x4096xf32>
    %89 = arith.addf %83, %88 : vector<8x4096xf32>
    %90 = vector.broadcast %72 : vector<8x1xf32> to vector<8x4096xf32>
    %91 = arith.addf %89, %90 : vector<8x4096xf32>
    %cst_21 = arith.constant dense<0.000000e+00> : vector<8xf32>
    %92 = vector.multi_reduction <add>, %91, %cst_21 [1] : vector<8x4096xf32> to vector<8xf32>
    %93 = vector.shape_cast %92 : vector<8xf32> to vector<8x1xf32>
    %cst_22 = arith.constant 2.600000e+02 : f32
    %94 = vector.broadcast %cst_22 : f32 to vector<8x1xf32>
    %95 = arith.mulf %94, %72 : vector<8x1xf32>
    %96 = arith.addf %93, %95 : vector<8x1xf32>
    %cst_23 = arith.constant 4.356000e+03 : f32
    %97 = vector.broadcast %cst_23 : f32 to vector<8x1xf32>
    %98 = arith.divf %96, %97 : vector<8x1xf32>
    %99 = vector.broadcast %98 : vector<8x1xf32> to vector<8x4096xf32>
    %100 = arith.subf %91, %99 : vector<8x4096xf32>
    %101 = arith.subf %72, %98 : vector<8x1xf32>
    %102 = arith.mulf %100, %100 : vector<8x4096xf32>
    %cst_24 = arith.constant dense<0.000000e+00> : vector<8xf32>
    %103 = vector.multi_reduction <add>, %102, %cst_24 [1] : vector<8x4096xf32> to vector<8xf32>
    %104 = vector.shape_cast %103 : vector<8xf32> to vector<8x1xf32>
    %cst_25 = arith.constant 2.600000e+02 : f32
    %105 = vector.broadcast %cst_25 : f32 to vector<8x1xf32>
    %106 = arith.mulf %105, %101 : vector<8x1xf32>
    %107 = arith.mulf %106, %101 : vector<8x1xf32>
    %108 = arith.addf %104, %107 : vector<8x1xf32>
    %cst_26 = arith.constant 4.356000e+03 : f32
    %109 = vector.broadcast %cst_26 : f32 to vector<8x1xf32>
    %110 = arith.divf %108, %109 : vector<8x1xf32>
    %cst_27 = arith.constant 9.99999974E-6 : f32
    %111 = vector.broadcast %cst_27 : f32 to vector<8x1xf32>
    %112 = arith.addf %110, %111 : vector<8x1xf32>
    %113 = math.rsqrt %112 : vector<8x1xf32>
    %114 = vector.extract_strided_slice %71 {offsets = [0, 0], sizes = [8, 1], strides = [1, 1]} : vector<8x3xf32> to vector<8x1xf32>
    %115 = vector.extract_strided_slice %70 {offsets = [0, 0], sizes = [1, 1024], strides = [1, 1]} : vector<3x1024xf32> to vector<1x1024xf32>
    %116 = vector.broadcast %114 : vector<8x1xf32> to vector<8x1024xf32>
    %117 = vector.broadcast %115 : vector<1x1024xf32> to vector<8x1024xf32>
    %118 = arith.mulf %116, %117 : vector<8x1024xf32>
    %119 = vector.extract_strided_slice %71 {offsets = [0, 1], sizes = [8, 1], strides = [1, 1]} : vector<8x3xf32> to vector<8x1xf32>
    %120 = vector.extract_strided_slice %70 {offsets = [1, 0], sizes = [1, 1024], strides = [1, 1]} : vector<3x1024xf32> to vector<1x1024xf32>
    %121 = vector.broadcast %119 : vector<8x1xf32> to vector<8x1024xf32>
    %122 = vector.broadcast %120 : vector<1x1024xf32> to vector<8x1024xf32>
    %123 = arith.mulf %121, %122 : vector<8x1024xf32>
    %124 = arith.addf %118, %123 : vector<8x1024xf32>
    %125 = vector.extract_strided_slice %71 {offsets = [0, 2], sizes = [8, 1], strides = [1, 1]} : vector<8x3xf32> to vector<8x1xf32>
    %126 = vector.extract_strided_slice %70 {offsets = [2, 0], sizes = [1, 1024], strides = [1, 1]} : vector<3x1024xf32> to vector<1x1024xf32>
    %127 = vector.broadcast %125 : vector<8x1xf32> to vector<8x1024xf32>
    %128 = vector.broadcast %126 : vector<1x1024xf32> to vector<8x1024xf32>
    %129 = arith.mulf %127, %128 : vector<8x1024xf32>
    %130 = arith.addf %124, %129 : vector<8x1024xf32>
    %131 = vector.broadcast %72 : vector<8x1xf32> to vector<8x1024xf32>
    %132 = arith.addf %130, %131 : vector<8x1024xf32>
    %133 = vector.broadcast %98 : vector<8x1xf32> to vector<8x1024xf32>
    %134 = arith.subf %132, %133 : vector<8x1024xf32>
    %135 = vector.broadcast %113 : vector<8x1xf32> to vector<8x1024xf32>
    %136 = arith.mulf %134, %135 : vector<8x1024xf32>
    %137 = arith.mulf %101, %113 : vector<8x1xf32>
    %c0_28 = arith.constant 0 : index
    %c0_29 = arith.constant 0 : index
    %138 = vector.load %arg9[%c0_28, %c0_29] : memref<8x1xf32, #tpu.memory_space<vmem>>, vector<8x1xf32>
    %c0_30 = arith.constant 0 : index
    %c0_31 = arith.constant 0 : index
    %139 = vector.load %arg11[%c0_30, %c0_31] : memref<8x1xf32, #tpu.memory_space<vmem>>, vector<8x1xf32>
    %140 = arith.addf %138, %139 : vector<8x1xf32>
    %c0_32 = arith.constant 0 : index
    %c0_33 = arith.constant 0 : index
    %141 = vector.load %arg8[%c0_32, %c0_33] : memref<8x8xf32, #tpu.memory_space<vmem>>, vector<8x8xf32>
    %142 = vector.extract_strided_slice %141 {offsets = [0, 0], sizes = [8, 1], strides = [1, 1]} : vector<8x8xf32> to vector<8x1xf32>
    %143 = vector.extract_strided_slice %67 {offsets = [0, 0], sizes = [1, 1024], strides = [1, 1]} : vector<8x1024xf32> to vector<1x1024xf32>
    %144 = vector.broadcast %142 : vector<8x1xf32> to vector<8x1024xf32>
    %145 = vector.broadcast %143 : vector<1x1024xf32> to vector<8x1024xf32>
    %146 = arith.mulf %144, %145 : vector<8x1024xf32>
    %147 = vector.extract_strided_slice %141 {offsets = [0, 1], sizes = [8, 1], strides = [1, 1]} : vector<8x8xf32> to vector<8x1xf32>
    %148 = vector.extract_strided_slice %67 {offsets = [1, 0], sizes = [1, 1024], strides = [1, 1]} : vector<8x1024xf32> to vector<1x1024xf32>
    %149 = vector.broadcast %147 : vector<8x1xf32> to vector<8x1024xf32>
    %150 = vector.broadcast %148 : vector<1x1024xf32> to vector<8x1024xf32>
    %151 = arith.mulf %149, %150 : vector<8x1024xf32>
    %152 = arith.addf %146, %151 : vector<8x1024xf32>
    %153 = vector.extract_strided_slice %141 {offsets = [0, 2], sizes = [8, 1], strides = [1, 1]} : vector<8x8xf32> to vector<8x1xf32>
    %154 = vector.extract_strided_slice %67 {offsets = [2, 0], sizes = [1, 1024], strides = [1, 1]} : vector<8x1024xf32> to vector<1x1024xf32>
    %155 = vector.broadcast %153 : vector<8x1xf32> to vector<8x1024xf32>
    %156 = vector.broadcast %154 : vector<1x1024xf32> to vector<8x1024xf32>
    %157 = arith.mulf %155, %156 : vector<8x1024xf32>
    %158 = arith.addf %152, %157 : vector<8x1024xf32>
    %159 = vector.extract_strided_slice %141 {offsets = [0, 3], sizes = [8, 1], strides = [1, 1]} : vector<8x8xf32> to vector<8x1xf32>
    %160 = vector.extract_strided_slice %67 {offsets = [3, 0], sizes = [1, 1024], strides = [1, 1]} : vector<8x1024xf32> to vector<1x1024xf32>
    %161 = vector.broadcast %159 : vector<8x1xf32> to vector<8x1024xf32>
    %162 = vector.broadcast %160 : vector<1x1024xf32> to vector<8x1024xf32>
    %163 = arith.mulf %161, %162 : vector<8x1024xf32>
    %164 = arith.addf %158, %163 : vector<8x1024xf32>
    %165 = vector.extract_strided_slice %141 {offsets = [0, 4], sizes = [8, 1], strides = [1, 1]} : vector<8x8xf32> to vector<8x1xf32>
    %166 = vector.extract_strided_slice %67 {offsets = [4, 0], sizes = [1, 1024], strides = [1, 1]} : vector<8x1024xf32> to vector<1x1024xf32>
    %167 = vector.broadcast %165 : vector<8x1xf32> to vector<8x1024xf32>
    %168 = vector.broadcast %166 : vector<1x1024xf32> to vector<8x1024xf32>
    %169 = arith.mulf %167, %168 : vector<8x1024xf32>
    %170 = arith.addf %164, %169 : vector<8x1024xf32>
    %171 = vector.extract_strided_slice %141 {offsets = [0, 5], sizes = [8, 1], strides = [1, 1]} : vector<8x8xf32> to vector<8x1xf32>
    %172 = vector.extract_strided_slice %67 {offsets = [5, 0], sizes = [1, 1024], strides = [1, 1]} : vector<8x1024xf32> to vector<1x1024xf32>
    %173 = vector.broadcast %171 : vector<8x1xf32> to vector<8x1024xf32>
    %174 = vector.broadcast %172 : vector<1x1024xf32> to vector<8x1024xf32>
    %175 = arith.mulf %173, %174 : vector<8x1024xf32>
    %176 = arith.addf %170, %175 : vector<8x1024xf32>
    %177 = vector.extract_strided_slice %141 {offsets = [0, 6], sizes = [8, 1], strides = [1, 1]} : vector<8x8xf32> to vector<8x1xf32>
    %178 = vector.extract_strided_slice %67 {offsets = [6, 0], sizes = [1, 1024], strides = [1, 1]} : vector<8x1024xf32> to vector<1x1024xf32>
    %179 = vector.broadcast %177 : vector<8x1xf32> to vector<8x1024xf32>
    %180 = vector.broadcast %178 : vector<1x1024xf32> to vector<8x1024xf32>
    %181 = arith.mulf %179, %180 : vector<8x1024xf32>
    %182 = arith.addf %176, %181 : vector<8x1024xf32>
    %183 = vector.extract_strided_slice %141 {offsets = [0, 7], sizes = [8, 1], strides = [1, 1]} : vector<8x8xf32> to vector<8x1xf32>
    %184 = vector.extract_strided_slice %67 {offsets = [7, 0], sizes = [1, 1024], strides = [1, 1]} : vector<8x1024xf32> to vector<1x1024xf32>
    %185 = vector.broadcast %183 : vector<8x1xf32> to vector<8x1024xf32>
    %186 = vector.broadcast %184 : vector<1x1024xf32> to vector<8x1024xf32>
    %187 = arith.mulf %185, %186 : vector<8x1024xf32>
    %188 = arith.addf %182, %187 : vector<8x1024xf32>
    %c0_34 = arith.constant 0 : index
    %c0_35 = arith.constant 0 : index
    %189 = vector.load %arg10[%c0_34, %c0_35] : memref<8x8xf32, #tpu.memory_space<vmem>>, vector<8x8xf32>
    %190 = vector.extract_strided_slice %189 {offsets = [0, 0], sizes = [8, 1], strides = [1, 1]} : vector<8x8xf32> to vector<8x1xf32>
    %191 = vector.extract_strided_slice %136 {offsets = [0, 0], sizes = [1, 1024], strides = [1, 1]} : vector<8x1024xf32> to vector<1x1024xf32>
    %192 = vector.broadcast %190 : vector<8x1xf32> to vector<8x1024xf32>
    %193 = vector.broadcast %191 : vector<1x1024xf32> to vector<8x1024xf32>
    %194 = arith.mulf %192, %193 : vector<8x1024xf32>
    %195 = vector.extract_strided_slice %189 {offsets = [0, 1], sizes = [8, 1], strides = [1, 1]} : vector<8x8xf32> to vector<8x1xf32>
    %196 = vector.extract_strided_slice %136 {offsets = [1, 0], sizes = [1, 1024], strides = [1, 1]} : vector<8x1024xf32> to vector<1x1024xf32>
    %197 = vector.broadcast %195 : vector<8x1xf32> to vector<8x1024xf32>
    %198 = vector.broadcast %196 : vector<1x1024xf32> to vector<8x1024xf32>
    %199 = arith.mulf %197, %198 : vector<8x1024xf32>
    %200 = arith.addf %194, %199 : vector<8x1024xf32>
    %201 = vector.extract_strided_slice %189 {offsets = [0, 2], sizes = [8, 1], strides = [1, 1]} : vector<8x8xf32> to vector<8x1xf32>
    %202 = vector.extract_strided_slice %136 {offsets = [2, 0], sizes = [1, 1024], strides = [1, 1]} : vector<8x1024xf32> to vector<1x1024xf32>
    %203 = vector.broadcast %201 : vector<8x1xf32> to vector<8x1024xf32>
    %204 = vector.broadcast %202 : vector<1x1024xf32> to vector<8x1024xf32>
    %205 = arith.mulf %203, %204 : vector<8x1024xf32>
    %206 = arith.addf %200, %205 : vector<8x1024xf32>
    %207 = vector.extract_strided_slice %189 {offsets = [0, 3], sizes = [8, 1], strides = [1, 1]} : vector<8x8xf32> to vector<8x1xf32>
    %208 = vector.extract_strided_slice %136 {offsets = [3, 0], sizes = [1, 1024], strides = [1, 1]} : vector<8x1024xf32> to vector<1x1024xf32>
    %209 = vector.broadcast %207 : vector<8x1xf32> to vector<8x1024xf32>
    %210 = vector.broadcast %208 : vector<1x1024xf32> to vector<8x1024xf32>
    %211 = arith.mulf %209, %210 : vector<8x1024xf32>
    %212 = arith.addf %206, %211 : vector<8x1024xf32>
    %213 = vector.extract_strided_slice %189 {offsets = [0, 4], sizes = [8, 1], strides = [1, 1]} : vector<8x8xf32> to vector<8x1xf32>
    %214 = vector.extract_strided_slice %136 {offsets = [4, 0], sizes = [1, 1024], strides = [1, 1]} : vector<8x1024xf32> to vector<1x1024xf32>
    %215 = vector.broadcast %213 : vector<8x1xf32> to vector<8x1024xf32>
    %216 = vector.broadcast %214 : vector<1x1024xf32> to vector<8x1024xf32>
    %217 = arith.mulf %215, %216 : vector<8x1024xf32>
    %218 = arith.addf %212, %217 : vector<8x1024xf32>
    %219 = vector.extract_strided_slice %189 {offsets = [0, 5], sizes = [8, 1], strides = [1, 1]} : vector<8x8xf32> to vector<8x1xf32>
    %220 = vector.extract_strided_slice %136 {offsets = [5, 0], sizes = [1, 1024], strides = [1, 1]} : vector<8x1024xf32> to vector<1x1024xf32>
    %221 = vector.broadcast %219 : vector<8x1xf32> to vector<8x1024xf32>
    %222 = vector.broadcast %220 : vector<1x1024xf32> to vector<8x1024xf32>
    %223 = arith.mulf %221, %222 : vector<8x1024xf32>
    %224 = arith.addf %218, %223 : vector<8x1024xf32>
    %225 = vector.extract_strided_slice %189 {offsets = [0, 6], sizes = [8, 1], strides = [1, 1]} : vector<8x8xf32> to vector<8x1xf32>
    %226 = vector.extract_strided_slice %136 {offsets = [6, 0], sizes = [1, 1024], strides = [1, 1]} : vector<8x1024xf32> to vector<1x1024xf32>
    %227 = vector.broadcast %225 : vector<8x1xf32> to vector<8x1024xf32>
    %228 = vector.broadcast %226 : vector<1x1024xf32> to vector<8x1024xf32>
    %229 = arith.mulf %227, %228 : vector<8x1024xf32>
    %230 = arith.addf %224, %229 : vector<8x1024xf32>
    %231 = vector.extract_strided_slice %189 {offsets = [0, 7], sizes = [8, 1], strides = [1, 1]} : vector<8x8xf32> to vector<8x1xf32>
    %232 = vector.extract_strided_slice %136 {offsets = [7, 0], sizes = [1, 1024], strides = [1, 1]} : vector<8x1024xf32> to vector<1x1024xf32>
    %233 = vector.broadcast %231 : vector<8x1xf32> to vector<8x1024xf32>
    %234 = vector.broadcast %232 : vector<1x1024xf32> to vector<8x1024xf32>
    %235 = arith.mulf %233, %234 : vector<8x1024xf32>
    %236 = arith.addf %230, %235 : vector<8x1024xf32>
    %237 = arith.addf %188, %236 : vector<8x1024xf32>
    %238 = vector.broadcast %140 : vector<8x1xf32> to vector<8x1024xf32>
    %239 = arith.addf %237, %238 : vector<8x1024xf32>
    %c0_36 = arith.constant 0 : index
    %c0_37 = arith.constant 0 : index
    %240 = vector.load %arg8[%c0_36, %c0_37] : memref<8x8xf32, #tpu.memory_space<vmem>>, vector<8x8xf32>
    %241 = vector.extract_strided_slice %240 {offsets = [0, 0], sizes = [8, 1], strides = [1, 1]} : vector<8x8xf32> to vector<8x1xf32>
    %242 = vector.extract_strided_slice %68 {offsets = [0, 0], sizes = [1, 1], strides = [1, 1]} : vector<8x1xf32> to vector<1x1xf32>
    %243 = vector.broadcast %242 : vector<1x1xf32> to vector<8x1xf32>
    %244 = arith.mulf %241, %243 : vector<8x1xf32>
    %245 = vector.extract_strided_slice %240 {offsets = [0, 1], sizes = [8, 1], strides = [1, 1]} : vector<8x8xf32> to vector<8x1xf32>
    %246 = vector.extract_strided_slice %68 {offsets = [1, 0], sizes = [1, 1], strides = [1, 1]} : vector<8x1xf32> to vector<1x1xf32>
    %247 = vector.broadcast %246 : vector<1x1xf32> to vector<8x1xf32>
    %248 = arith.mulf %245, %247 : vector<8x1xf32>
    %249 = arith.addf %244, %248 : vector<8x1xf32>
    %250 = vector.extract_strided_slice %240 {offsets = [0, 2], sizes = [8, 1], strides = [1, 1]} : vector<8x8xf32> to vector<8x1xf32>
    %251 = vector.extract_strided_slice %68 {offsets = [2, 0], sizes = [1, 1], strides = [1, 1]} : vector<8x1xf32> to vector<1x1xf32>
    %252 = vector.broadcast %251 : vector<1x1xf32> to vector<8x1xf32>
    %253 = arith.mulf %250, %252 : vector<8x1xf32>
    %254 = arith.addf %249, %253 : vector<8x1xf32>
    %255 = vector.extract_strided_slice %240 {offsets = [0, 3], sizes = [8, 1], strides = [1, 1]} : vector<8x8xf32> to vector<8x1xf32>
    %256 = vector.extract_strided_slice %68 {offsets = [3, 0], sizes = [1, 1], strides = [1, 1]} : vector<8x1xf32> to vector<1x1xf32>
    %257 = vector.broadcast %256 : vector<1x1xf32> to vector<8x1xf32>
    %258 = arith.mulf %255, %257 : vector<8x1xf32>
    %259 = arith.addf %254, %258 : vector<8x1xf32>
    %260 = vector.extract_strided_slice %240 {offsets = [0, 4], sizes = [8, 1], strides = [1, 1]} : vector<8x8xf32> to vector<8x1xf32>
    %261 = vector.extract_strided_slice %68 {offsets = [4, 0], sizes = [1, 1], strides = [1, 1]} : vector<8x1xf32> to vector<1x1xf32>
    %262 = vector.broadcast %261 : vector<1x1xf32> to vector<8x1xf32>
    %263 = arith.mulf %260, %262 : vector<8x1xf32>
    %264 = arith.addf %259, %263 : vector<8x1xf32>
    %265 = vector.extract_strided_slice %240 {offsets = [0, 5], sizes = [8, 1], strides = [1, 1]} : vector<8x8xf32> to vector<8x1xf32>
    %266 = vector.extract_strided_slice %68 {offsets = [5, 0], sizes = [1, 1], strides = [1, 1]} : vector<8x1xf32> to vector<1x1xf32>
    %267 = vector.broadcast %266 : vector<1x1xf32> to vector<8x1xf32>
    %268 = arith.mulf %265, %267 : vector<8x1xf32>
    %269 = arith.addf %264, %268 : vector<8x1xf32>
    %270 = vector.extract_strided_slice %240 {offsets = [0, 6], sizes = [8, 1], strides = [1, 1]} : vector<8x8xf32> to vector<8x1xf32>
    %271 = vector.extract_strided_slice %68 {offsets = [6, 0], sizes = [1, 1], strides = [1, 1]} : vector<8x1xf32> to vector<1x1xf32>
    %272 = vector.broadcast %271 : vector<1x1xf32> to vector<8x1xf32>
    %273 = arith.mulf %270, %272 : vector<8x1xf32>
    %274 = arith.addf %269, %273 : vector<8x1xf32>
    %275 = vector.extract_strided_slice %240 {offsets = [0, 7], sizes = [8, 1], strides = [1, 1]} : vector<8x8xf32> to vector<8x1xf32>
    %276 = vector.extract_strided_slice %68 {offsets = [7, 0], sizes = [1, 1], strides = [1, 1]} : vector<8x1xf32> to vector<1x1xf32>
    %277 = vector.broadcast %276 : vector<1x1xf32> to vector<8x1xf32>
    %278 = arith.mulf %275, %277 : vector<8x1xf32>
    %279 = arith.addf %274, %278 : vector<8x1xf32>
    %c0_38 = arith.constant 0 : index
    %c0_39 = arith.constant 0 : index
    %280 = vector.load %arg10[%c0_38, %c0_39] : memref<8x8xf32, #tpu.memory_space<vmem>>, vector<8x8xf32>
    %281 = vector.extract_strided_slice %280 {offsets = [0, 0], sizes = [8, 1], strides = [1, 1]} : vector<8x8xf32> to vector<8x1xf32>
    %282 = vector.extract_strided_slice %137 {offsets = [0, 0], sizes = [1, 1], strides = [1, 1]} : vector<8x1xf32> to vector<1x1xf32>
    %283 = vector.broadcast %282 : vector<1x1xf32> to vector<8x1xf32>
    %284 = arith.mulf %281, %283 : vector<8x1xf32>
    %285 = vector.extract_strided_slice %280 {offsets = [0, 1], sizes = [8, 1], strides = [1, 1]} : vector<8x8xf32> to vector<8x1xf32>
    %286 = vector.extract_strided_slice %137 {offsets = [1, 0], sizes = [1, 1], strides = [1, 1]} : vector<8x1xf32> to vector<1x1xf32>
    %287 = vector.broadcast %286 : vector<1x1xf32> to vector<8x1xf32>
    %288 = arith.mulf %285, %287 : vector<8x1xf32>
    %289 = arith.addf %284, %288 : vector<8x1xf32>
    %290 = vector.extract_strided_slice %280 {offsets = [0, 2], sizes = [8, 1], strides = [1, 1]} : vector<8x8xf32> to vector<8x1xf32>
    %291 = vector.extract_strided_slice %137 {offsets = [2, 0], sizes = [1, 1], strides = [1, 1]} : vector<8x1xf32> to vector<1x1xf32>
    %292 = vector.broadcast %291 : vector<1x1xf32> to vector<8x1xf32>
    %293 = arith.mulf %290, %292 : vector<8x1xf32>
    %294 = arith.addf %289, %293 : vector<8x1xf32>
    %295 = vector.extract_strided_slice %280 {offsets = [0, 3], sizes = [8, 1], strides = [1, 1]} : vector<8x8xf32> to vector<8x1xf32>
    %296 = vector.extract_strided_slice %137 {offsets = [3, 0], sizes = [1, 1], strides = [1, 1]} : vector<8x1xf32> to vector<1x1xf32>
    %297 = vector.broadcast %296 : vector<1x1xf32> to vector<8x1xf32>
    %298 = arith.mulf %295, %297 : vector<8x1xf32>
    %299 = arith.addf %294, %298 : vector<8x1xf32>
    %300 = vector.extract_strided_slice %280 {offsets = [0, 4], sizes = [8, 1], strides = [1, 1]} : vector<8x8xf32> to vector<8x1xf32>
    %301 = vector.extract_strided_slice %137 {offsets = [4, 0], sizes = [1, 1], strides = [1, 1]} : vector<8x1xf32> to vector<1x1xf32>
    %302 = vector.broadcast %301 : vector<1x1xf32> to vector<8x1xf32>
    %303 = arith.mulf %300, %302 : vector<8x1xf32>
    %304 = arith.addf %299, %303 : vector<8x1xf32>
    %305 = vector.extract_strided_slice %280 {offsets = [0, 5], sizes = [8, 1], strides = [1, 1]} : vector<8x8xf32> to vector<8x1xf32>
    %306 = vector.extract_strided_slice %137 {offsets = [5, 0], sizes = [1, 1], strides = [1, 1]} : vector<8x1xf32> to vector<1x1xf32>
    %307 = vector.broadcast %306 : vector<1x1xf32> to vector<8x1xf32>
    %308 = arith.mulf %305, %307 : vector<8x1xf32>
    %309 = arith.addf %304, %308 : vector<8x1xf32>
    %310 = vector.extract_strided_slice %280 {offsets = [0, 6], sizes = [8, 1], strides = [1, 1]} : vector<8x8xf32> to vector<8x1xf32>
    %311 = vector.extract_strided_slice %137 {offsets = [6, 0], sizes = [1, 1], strides = [1, 1]} : vector<8x1xf32> to vector<1x1xf32>
    %312 = vector.broadcast %311 : vector<1x1xf32> to vector<8x1xf32>
    %313 = arith.mulf %310, %312 : vector<8x1xf32>
    %314 = arith.addf %309, %313 : vector<8x1xf32>
    %315 = vector.extract_strided_slice %280 {offsets = [0, 7], sizes = [8, 1], strides = [1, 1]} : vector<8x8xf32> to vector<8x1xf32>
    %316 = vector.extract_strided_slice %137 {offsets = [7, 0], sizes = [1, 1], strides = [1, 1]} : vector<8x1xf32> to vector<1x1xf32>
    %317 = vector.broadcast %316 : vector<1x1xf32> to vector<8x1xf32>
    %318 = arith.mulf %315, %317 : vector<8x1xf32>
    %319 = arith.addf %314, %318 : vector<8x1xf32>
    %320 = arith.addf %279, %319 : vector<8x1xf32>
    %321 = arith.addf %320, %140 : vector<8x1xf32>
    %cst_40 = arith.constant dense<0.000000e+00> : vector<8xf32>
    %322 = vector.multi_reduction <add>, %239, %cst_40 [1] : vector<8x1024xf32> to vector<8xf32>
    %323 = vector.shape_cast %322 : vector<8xf32> to vector<8x1xf32>
    %cst_41 = arith.constant 6.700000e+01 : f32
    %324 = vector.broadcast %cst_41 : f32 to vector<8x1xf32>
    %325 = arith.mulf %324, %140 : vector<8x1xf32>
    %326 = arith.addf %323, %325 : vector<8x1xf32>
    %cst_42 = arith.constant 6.500000e+01 : f32
    %327 = vector.broadcast %cst_42 : f32 to vector<8x1xf32>
    %328 = arith.mulf %327, %321 : vector<8x1xf32>
    %329 = arith.addf %326, %328 : vector<8x1xf32>
    %cst_43 = arith.constant 1.156000e+03 : f32
    %330 = vector.broadcast %cst_43 : f32 to vector<8x1xf32>
    %331 = arith.divf %329, %330 : vector<8x1xf32>
    %332 = vector.broadcast %331 : vector<8x1xf32> to vector<8x1024xf32>
    %333 = arith.subf %239, %332 : vector<8x1024xf32>
    %334 = arith.subf %140, %331 : vector<8x1xf32>
    %335 = arith.subf %321, %331 : vector<8x1xf32>
    %336 = arith.mulf %333, %333 : vector<8x1024xf32>
    %cst_44 = arith.constant dense<0.000000e+00> : vector<8xf32>
    %337 = vector.multi_reduction <add>, %336, %cst_44 [1] : vector<8x1024xf32> to vector<8xf32>
    %338 = vector.shape_cast %337 : vector<8xf32> to vector<8x1xf32>
    %cst_45 = arith.constant 6.700000e+01 : f32
    %339 = vector.broadcast %cst_45 : f32 to vector<8x1xf32>
    %340 = arith.mulf %339, %334 : vector<8x1xf32>
    %341 = arith.mulf %340, %334 : vector<8x1xf32>
    %342 = arith.addf %338, %341 : vector<8x1xf32>
    %cst_46 = arith.constant 6.500000e+01 : f32
    %343 = vector.broadcast %cst_46 : f32 to vector<8x1xf32>
    %344 = arith.mulf %343, %335 : vector<8x1xf32>
    %345 = arith.mulf %344, %335 : vector<8x1xf32>
    %346 = arith.addf %342, %345 : vector<8x1xf32>
    %cst_47 = arith.constant 1.156000e+03 : f32
    %347 = vector.broadcast %cst_47 : f32 to vector<8x1xf32>
    %348 = arith.divf %346, %347 : vector<8x1xf32>
    %cst_48 = arith.constant 9.99999974E-6 : f32
    %349 = vector.broadcast %cst_48 : f32 to vector<8x1xf32>
    %350 = arith.addf %348, %349 : vector<8x1xf32>
    %351 = math.rsqrt %350 : vector<8x1xf32>
    %352 = vector.broadcast %351 : vector<8x1xf32> to vector<8x1024xf32>
    %353 = arith.mulf %333, %352 : vector<8x1024xf32>
    %c0_49 = arith.constant 0 : index
    %c0_50 = arith.constant 0 : index
    %354 = vector.load %arg12[%c0_49, %c0_50] : memref<8x1024xf32, #tpu.memory_space<vmem>>, vector<8x1024xf32>
    tpu.vector_store %arg12[%c0_49, %c0_50], %353 {strides = array<i32>} : memref<8x1024xf32, #tpu.memory_space<vmem>>, vector<8x1024xf32>,
    %355 = arith.mulf %334, %351 : vector<8x1xf32>
    %c0_51 = arith.constant 0 : index
    %c0_52 = arith.constant 0 : index
    %356 = vector.load %arg13[%c0_51, %c0_52] : memref<8x2xf32, #tpu.memory_space<vmem>>, vector<8x1xf32>
    tpu.vector_store %arg13[%c0_51, %c0_52], %355 {strides = array<i32>} : memref<8x2xf32, #tpu.memory_space<vmem>>, vector<8x1xf32>,
    %357 = arith.mulf %335, %351 : vector<8x1xf32>
    %c0_53 = arith.constant 0 : index
    %c1 = arith.constant 1 : index
    %358 = vector.load %arg13[%c0_53, %c1] : memref<8x2xf32, #tpu.memory_space<vmem>>, vector<8x1xf32>
    tpu.vector_store %arg13[%c0_53, %c1], %357 {strides = array<i32>} : memref<8x2xf32, #tpu.memory_space<vmem>>, vector<8x1xf32>,
    return
  }
}

</mosaic_0001>

<bundles_post_ra>
// kernel: squeeze.8
= control target key start
LH: loop header
LB: loop body
LE: loop exit
PB: predicated region body
PF: predicated region fallthrough
CT: control target
= control target key end

     0   :  { %vm24_vm0 = vcmask 1041409   ;;  %s27_s10 = smov 12  ;;  %vm29_vm1 = vcmask 1043458   ;;  %vm33_vm2 = vcmask 1044484   ;;  %s36_s15 = smov 96  ;;  %vm38_vm3 = vcmask 1046533   ;;  %s743_s0 = inlined_call_operand.vmem [shape: f32[1,3,32,32], index: 0, kind: input, shape index: {}]   ;;  %s744_s1 = inlined_call_operand.vmem [shape: f32[3,1024], index: 1, kind: output, shape index: {}]  }
   0x1   :  { %v384_v0 = vld [vmem:[%s743_s0 + $0x3] sm:$0x1]   ;;  %v387_v4 = vld [vmem:[%s743_s0 + $0x23] sm:$0x10]   ;;  %v389_v6 = vld [vmem:[%s743_s0 + $0x24] sm:$0x80]  }
   0x2   :  { %v385_v1 = vld [vmem:[%s743_s0 + $0x22] sm:$0x2]   ;;  %vm42_vm4 = vcmask 1047559   ;;  %v402_v9 = vld [vmem:[%s743_s0 + $0x2] sm:$0x1]   ;;  %s127_s24 = smov 12 }
   0x3   :  { %v25_v2 = vsel %vm24_vm0, %v385_v1, %v384_v0  ;;  %v386_v3 = vld [vmem:[%s743_s0 + $0xbb] ss:$-60 sm:%s27_s10]   ;;  %v403_v10 = vld [vmem:[%s743_s0 + $0x21] sm:$0x2]   ;;  %v405_v13 = vld [vmem:[%s743_s0 + $0x22] sm:$0x10]  }
   0x4   :  { %v30_v5 = vsel %vm29_vm1, %v386_v3, %v25_v2  ;;  %v388_v8 = vld [vmem:[%s743_s0 + $0x173] ss:$-60 sm:%s36_s15]   ;;  %v125_v12 = vsel %vm24_vm0, %v403_v10, %v402_v9  ;;  %s136_s27 = smov 96  ;;  %v407_v14 = vld [vmem:[%s743_s0 + $0x23] sm:$0x80]   ;;  %s59_s5 = smov 12 }
   0x5   :  { %v34_v7 = vsel %vm33_vm2, %v387_v4, %v30_v5  ;;  %v404_v16 = vld [vmem:[%s743_s0 + $0xba] ss:$-60 sm:%s127_s24]   ;;  %s448_s6 = smov 96   ;;  %v390_v19 = vld [vmem:[%s743_s0 + $0x13] sm:$0x1]   ;;  %s68_s15 = smov 96 }
   0x6   :  { %v39_v11 = vsel %vm38_vm3, %v388_v8, %v34_v7  ;;  %v406_v17 = vld [vmem:[%s743_s0 + $0x172] ss:$-60 sm:%s136_s27]   ;;  %v130_v18 = vsel %vm29_vm1, %v404_v16, %v125_v12  ;;  %v391_v20 = vld [vmem:[%s743_s0 + $0x32] sm:$0x2]   ;;  %v393_v21 = vld [vmem:[%s743_s0 + $0x33] sm:$0x10]  }
   0x7   :  { %v43_v15 = vsel %vm42_vm4, %v389_v6, %v39_v11  ;;  %v134_v22 = vsel %vm33_vm2, %v405_v13, %v130_v18  ;;  %v57_v23 = vsel %vm24_vm0, %v391_v20, %v390_v19  ;;  %v392_v24 = vld [vmem:[%s743_s0 + $0xcb] ss:$-60 sm:%s59_s5]   ;;  %s86_s18 = smov 3  ;;  %vm90_vm5 = vcmask 1042434   ;;  %s93_s23 = smov 24 }
   0x8   :  { %44 = vrot.lane.b32.xlu0 %v43_v15, %s448_s6  ;;  %v395_v25 = vld [vmem:[%s743_s0 + $0x34] sm:$0x80]   ;;  %v139_v26 = vsel %vm38_vm3, %v406_v17, %v134_v22  ;;  %v62_v27 = vsel %vm29_vm1, %v392_v24, %v57_v23  ;;  %v397_v32 = vld [vmem:[%s743_s0 + $0x2d] sm:$0x4]   ;;  %vm95_vm6 = vcmask 1044483   ;;  %vm99_vm7 = vcmask 1045509  }
   0x9   :  { %v394_v28 = vld [vmem:[%s743_s0 + $0x183] ss:$-60 sm:%s68_s15]   ;;  %v143_v30 = vsel %vm42_vm4, %v407_v14, %v139_v26  ;;  %v66_v31 = vsel %vm33_vm2, %v393_v21, %v62_v27  ;;  %s449_s28 = smov 64   ;;  %vm103_vm8 = vcmask 1046534   ;;  %s159_s4 = smov 12  ;;  %vm3_vm9 = vcmask 261120  }
   0xa   :  { %v396_v29 = vld [vmem:[%s743_s0 + $0x4b] ss:$-60 sm:%s86_s18]   ;;  %144 = vrot.lane.b32.xlu1 %v143_v30, %s449_s28  ;;  %v71_v34 = vsel %vm38_vm3, %v394_v28, %v66_v31  ;;  %v408_v41 = vld [vmem:[%s743_s0 + $0x12] sm:$0x1]   ;;  %s168_s16 = smov 96  ;;  %s186_s17 = smov 3 }
   0xb   :  { %v398_v33 = vld [vmem:[%s743_s0 + $0x2b] ss:$12 sm:%s93_s23]   ;;  %v91_v35 = vsel %vm90_vm5, %v397_v32, %v396_v29  ;;  %v75_v38 = vsel %vm42_vm4, %v395_v25, %v71_v34  ;;  %v409_v42 = vld [vmem:[%s743_s0 + $0x31] sm:$0x2]   ;;  %v411_v46 = vld [vmem:[%s743_s0 + $0x32] sm:$0x10]  }
   0xc   :  { %v399_v36 = vld [vmem:[%s743_s0 + $0x1a] sm:$0x20]   ;;  %v96_v39 = vsel %vm95_vm6, %v398_v33, %v91_v35  ;;  %76 = vrot.lane.b32.xlu0 %v75_v38, %s448_s6  ;;  %v157_v44 = vsel %vm24_vm0, %v409_v42, %v408_v41  ;;  %v410_v45 = vld [vmem:[%s743_s0 + $0xca] ss:$-60 sm:%s159_s4]   ;;  %s193_s26 = smov 24  ;;  %s227_s30 = smov 12 }
   0xd   :  { %v400_v37 = vld [vmem:[%s743_s0 + $0x39] sm:$0x40]   ;;  %v100_v43 = vsel %vm99_vm7, %v399_v36, %v96_v39  ;;  %v162_v48 = vsel %vm29_vm1, %v410_v45, %v157_v44  ;;  %v412_v49 = vld [vmem:[%s743_s0 + $0x182] ss:$-60 sm:%s168_s16]   ;;  %s236_s5 = smov 96  ;;  %s268_s18 = smov 96 }
   0xe   :  { %v401_v40 = vld [vmem:[%s743_s0 + $0x58] sm:$0x80]   ;;  %v104_v47 = vsel %vm103_vm8, %v400_v37, %v100_v43  ;;  %v413_v50 = vld [vmem:[%s743_s0 + $0x33] sm:$0x80]   ;;  %v415_v51 = vld [vmem:[%s743_s0 + $0x2c] sm:$0x4]   ;;  %v166_v53 = vsel %vm33_vm2, %v411_v46, %v162_v48 }
   0xf   :  { %v108_v52 = vsel %vm42_vm4, %v401_v40, %v104_v47  ;;  %v414_v54 = vld [vmem:[%s743_s0 + $0x4a] ss:$-60 sm:%s186_s17]   ;;  %v171_v56 = vsel %vm38_vm3, %v412_v49, %v166_v53  ;;  %v420_v63 = vld [vmem:[%s743_s0 + $0x1] sm:$0x1]   ;;  %v423_v4 = vld [vmem:[%s743_s0 + $0x21] sm:$0x10]  }
  0x10   :  { %v417_v55 = vld [vmem:[%s743_s0 + $0x19] sm:$0x20]   ;;  %109 = vrot.lane.b32.xlu1 %v108_v52, %s448_s6  ;;  %v191_v57 = vsel %vm90_vm5, %v415_v51, %v414_v54  ;;  %v175_v60 = vsel %vm42_vm4, %v413_v50, %v171_v56  ;;  %v421_v0 = vld [vmem:[%s743_s0 + $0x20] sm:$0x2]   ;;  %s259_s17 = smov 12  ;;  %s293_s7 = smov 24 }
  0x11   :  { %v416_v58 = vld [vmem:[%s743_s0 + $0x2a] ss:$12 sm:%s193_s26]   ;;  %176 = vrot.lane.b32.xlu0 %v175_v60, %s449_s28  ;;  %v225_v2 = vsel %vm24_vm0, %v421_v0, %v420_v63  ;;  %v425_v8 = vld [vmem:[%s743_s0 + $0x22] sm:$0x80]   ;;  %s450_s14 = smov 32   ;;  %vm46_vm10 = vcmask 1048320  }
  0x12   :  { %v418_v59 = vld [vmem:[%s743_s0 + $0x38] sm:$0x40]   ;;  %v196_v61 = vsel %vm95_vm6, %v416_v58, %v191_v57  ;;  %v422_v3 = vld [vmem:[%s743_s0 + $0xb9] ss:$-60 sm:%s227_s30]   ;;  %v2_v31 = vld [vmem:[%s743_s0] ss:$4 sm:$0xff]  }
  0x13   :  { %v419_v62 = vld [vmem:[%s743_s0 + $0x57] sm:$0x80]   ;;  %v200_v1 = vsel %vm99_vm7, %v417_v55, %v196_v61  ;;  %v230_v6 = vsel %vm29_vm1, %v422_v3, %v225_v2  ;;  %v424_v7 = vld [vmem:[%s743_s0 + $0x171] ss:$-60 sm:%s236_s5]   ;;  %s286_s5 = smov 3  ;;  %vm146_vm11 = vcmask 785920  }
  0x14   :  { %v204_v5 = vsel %vm103_vm8, %v418_v59, %v200_v1  ;;  %v426_v9 = vld [vmem:[%s743_s0 + $0x11] sm:$0x1]   ;;  %v234_v11 = vsel %vm33_vm2, %v423_v4, %v230_v6  ;;  %v429_v14 = vld [vmem:[%s743_s0 + $0x31] sm:$0x10]   ;;  %v431_v18 = vld [vmem:[%s743_s0 + $0x32] sm:$0x80]  }
  0x15   :  { %v208_v10 = vsel %vm42_vm4, %v419_v62, %v204_v5  ;;  %v427_v12 = vld [vmem:[%s743_s0 + $0x30] sm:$0x2]   ;;  %v239_v15 = vsel %vm38_vm3, %v424_v7, %v234_v11  ;;  %v433_v22 = vld [vmem:[%s743_s0 + $0x2b] sm:$0x4]   ;;  %v435_v23 = vld [vmem:[%s743_s0 + $0x18] sm:$0x20]  }
  0x16   :  { %v428_v13 = vld [vmem:[%s743_s0 + $0xc9] ss:$-60 sm:%s259_s17]   ;;  %209 = vrot.lane.b32.xlu1 %v208_v10, %s449_s28  ;;  %v257_v16 = vsel %vm24_vm0, %v427_v12, %v426_v9  ;;  %v243_v19 = vsel %vm42_vm4, %v425_v8, %v239_v15  ;;  %v382_v32 = vld [vmem:[%s743_s0 + $0x20] ss:$4 sm:$0xff]   ;;  %vm246_vm12 = vcmask 523520  }
  0x17   :  { %v430_v17 = vld [vmem:[%s743_s0 + $0x181] ss:$-60 sm:%s268_s18]   ;;  %v262_v20 = vsel %vm29_vm1, %v428_v13, %v257_v16  ;;  %244 = vrot.lane.b32.xlu0 %v243_v19, %s450_s14  ;;  %4 = vst.msk [vmem:[#allocation0] ss:$8 sm:$0xf] %vm3_vm9, %v2_v31  }
  0x18   :  { %v432_v21 = vld [vmem:[%s743_s0 + $0x49] ss:$-60 sm:%s286_s5]   ;;  %v266_v24 = vsel %vm33_vm2, %v429_v14, %v262_v20  ;;  %10 = vst.msk [vmem:[#allocation0 + $0x1] ss:$8 sm:$0xf] %vm3_vm9, %v382_v32  }
  0x19   :  { %v291_v25 = vsel %vm90_vm5, %v433_v22, %v432_v21  ;;  %v434_v26 = vld [vmem:[%s743_s0 + $0x29] ss:$12 sm:%s293_s7]   ;;  %v271_v28 = vsel %vm38_vm3, %v430_v17, %v266_v24  ;;  %v383_v35 = vld [vmem:[%s743_s0 + $0x40] ss:$4 sm:$0xff]  }
  0x1a   :  { %v436_v27 = vld [vmem:[%s743_s0 + $0x37] sm:$0x40]   ;;  %v296_v29 = vsel %vm95_vm6, %v434_v26, %v291_v25  ;;  %v275_v33 = vsel %vm42_vm4, %v431_v18, %v271_v28  ;;  %5 = vst.msk [vmem:[#allocation0] ss:$8 sm:$0xf0] %vm3_vm9, %v2_v31  }
  0x1b   :  { %v437_v30 = vld [vmem:[%s743_s0 + $0x56] sm:$0x80]   ;;  %v300_v34 = vsel %vm99_vm7, %v435_v23, %v296_v29  ;;  %12 = vst.msk [vmem:[#allocation0 + $0x1] ss:$8 sm:$0xf0] %vm3_vm9, %v382_v32   ;;  %276 = vrot.lane.b32.xlu1 %v275_v33, %s450_s14 }
  0x1c   :  { %v304_v36 = vsel %vm103_vm8, %v436_v27, %v300_v34  ;;  %17 = vst.msk [vmem:[#allocation0 + $0x2] ss:$8 sm:$0xf] %vm3_vm9, %v383_v35   ;;  %19 = vst.msk [vmem:[#allocation0 + $0x2] ss:$8 sm:$0xf0] %vm3_vm9, %v383_v35  }
  0x1d   :  { %v308_v37 = vsel %vm42_vm4, %v437_v30, %v304_v36 }
  0x1e   :  { %309 = vrot.lane.b32.xlu0 %v308_v37, %s450_s14 }
  0x7a   :  { %v45_v38 = vpop.permute.xlu0 %44  }
  0x7b   :  { %47 = vst.msk [vmem:[#allocation0] sm:$0x7] %vm46_vm10, %v45_v38   ;;  %49 = vst.msk [vmem:[#allocation0 + $0x5] sm:$0x38] %vm46_vm10, %v45_v38  }
  0x7c   :  { %51 = vst.msk [vmem:[#allocation0 + $0xa] sm:$0xc0] %vm46_vm10, %v45_v38   ;;  %v145_v39 = vpop.permute.xlu1 %144  }
  0x7d   :  { %147 = vst.msk [vmem:[#allocation0] sm:$0x7] %vm146_vm11, %v145_v39   ;;  %149 = vst.msk [vmem:[#allocation0 + $0x5] sm:$0x38] %vm146_vm11, %v145_v39  }
  0x7e   :  { %151 = vst.msk [vmem:[#allocation0 + $0xa] sm:$0xc0] %vm146_vm11, %v145_v39   ;;  %v77_v40 = vpop.permute.xlu0 %76  }
  0x7f   :  { %80 = vst.msk [vmem:[#allocation0 + $0x20] sm:$0x7] %vm46_vm10, %v77_v40   ;;  %82 = vst.msk [vmem:[#allocation0 + $0x25] sm:$0x38] %vm46_vm10, %v77_v40  }
  0x80   :  { %84 = vst.msk [vmem:[#allocation0 + $0x2a] sm:$0xc0] %vm46_vm10, %v77_v40  }
  0x82   :  { %v110_v41 = vpop.permute.xlu1 %109  }
  0x83   :  { %113 = vst.msk [vmem:[#allocation0 + $0x12] ss:$6 sm:$0x3] %vm46_vm10, %v110_v41   ;;  %115 = vst.msk [vmem:[#allocation0 + $0x17] sm:$0xc] %vm46_vm10, %v110_v41   ;;  %v177_v42 = vpop.permute.xlu0 %176  }
  0x84   :  { %117 = vst.msk [vmem:[#allocation0 + $0x1a] ss:$6 sm:$0x30] %vm46_vm10, %v110_v41   ;;  %119 = vst.msk [vmem:[#allocation0 + $0x33] sm:$0xc0] %vm46_vm10, %v110_v41  }
  0x85   :  { %180 = vst.msk [vmem:[#allocation0 + $0x20] sm:$0x7] %vm146_vm11, %v177_v42   ;;  %182 = vst.msk [vmem:[#allocation0 + $0x25] sm:$0x38] %vm146_vm11, %v177_v42  }
  0x86   :  { %184 = vst.msk [vmem:[#allocation0 + $0x2a] sm:$0xc0] %vm146_vm11, %v177_v42  }
  0x88   :  { %v210_v43 = vpop.permute.xlu1 %209  }
  0x89   :  { %213 = vst.msk [vmem:[#allocation0 + $0x12] ss:$6 sm:$0x3] %vm146_vm11, %v210_v43   ;;  %215 = vst.msk [vmem:[#allocation0 + $0x17] sm:$0xc] %vm146_vm11, %v210_v43   ;;  %v245_v44 = vpop.permute.xlu0 %244  }
  0x8a   :  { %217 = vst.msk [vmem:[#allocation0 + $0x1a] ss:$6 sm:$0x30] %vm146_vm11, %v210_v43   ;;  %219 = vst.msk [vmem:[#allocation0 + $0x33] sm:$0xc0] %vm146_vm11, %v210_v43  }
  0x8b   :  { %247 = vst.msk [vmem:[#allocation0] sm:$0x7] %vm246_vm12, %v245_v44   ;;  %249 = vst.msk [vmem:[#allocation0 + $0x5] sm:$0x38] %vm246_vm12, %v245_v44  }
  0x8c   :  { %251 = vst.msk [vmem:[#allocation0 + $0xa] sm:$0xc0] %vm246_vm12, %v245_v44  }
  0x8d   :  { %v277_v45 = vpop.permute.xlu1 %276  }
  0x8e   :  { %280 = vst.msk [vmem:[#allocation0 + $0x20] sm:$0x7] %vm246_vm12, %v277_v45   ;;  %282 = vst.msk [vmem:[#allocation0 + $0x25] sm:$0x38] %vm246_vm12, %v277_v45  }
  0x8f   :  { %284 = vst.msk [vmem:[#allocation0 + $0x2a] sm:$0xc0] %vm246_vm12, %v277_v45  }
  0x90   :  { %v310_v46 = vpop.permute.xlu0 %309  }
  0x91   :  { %313 = vst.msk [vmem:[#allocation0 + $0x12] ss:$6 sm:$0x3] %vm246_vm12, %v310_v46   ;;  %315 = vst.msk [vmem:[#allocation0 + $0x17] sm:$0xc] %vm246_vm12, %v310_v46  }
  0x92   :  { %317 = vst.msk [vmem:[#allocation0 + $0x1a] ss:$6 sm:$0x30] %vm246_vm12, %v310_v46   ;;  %319 = vst.msk [vmem:[#allocation0 + $0x33] sm:$0xc0] %vm246_vm12, %v310_v46  }
  0x93   :  { %v324_v47 = vld [vmem:[#allocation0] sm:$0xf]  ;;  %v329_v48 = vld [vmem:[#allocation0 + $0x8] sm:$0xf] }
  0x94   :  { %327 = vst [vmem:[%s744_s1] sm:$0xf] %v324_v47  ;;  %438 = vst [vmem:[%s744_s1 + $0x4] sm:$0xf] %v329_v48 }
  0x95   :  { %v349_v49 = vld [vmem:[#allocation0 + $0x20] sm:$0xf]  ;;  %v356_v50 = vld [vmem:[#allocation0 + $0x28] sm:$0xf] }
  0x96   :  { %441 = vst [vmem:[%s744_s1 + $0x10] sm:$0xf] %v349_v49  ;;  %442 = vst [vmem:[%s744_s1 + $0x14] sm:$0xf] %v356_v50 }
  0x98   :  { %v342_v51 = vld [vmem:[#allocation0 + $0x18] sm:$0xf]  ;;  %v335_v53 = vld [vmem:[#allocation0 + $0x10] sm:$0xf] }
  0x99   :  { %v370_v52 = vld [vmem:[#allocation0 + $0x38] sm:$0xf]  ;;  %440 = vst [vmem:[%s744_s1 + $0xc] sm:$0xf] %v342_v51  ;;  %439 = vst [vmem:[%s744_s1 + $0x8] sm:$0xf] %v335_v53 }
  0x9a   :  { %444 = vst [vmem:[%s744_s1 + $0x1c] sm:$0xf] %v370_v52  ;;  %v363_v54 = vld [vmem:[#allocation0 + $0x30] sm:$0xf] }
  0x9b   :  { %443 = vst [vmem:[%s744_s1 + $0x18] sm:$0xf] %v363_v54 }

// kernel: squeeze.6
= control target key start
LH: loop header
LB: loop body
LE: loop exit
PB: predicated region body
PF: predicated region fallthrough
CT: control target
= control target key end

     0   :  { %vm87_vm0 = vcmask 1041409   ;;  %vm92_vm1 = vcmask 1043458   ;;  %vm96_vm2 = vcmask 1044484   ;;  %vm101_vm3 = vcmask 1046533   ;;  %s155_s6 = smov 12  ;;  %s164_s11 = smov 96  ;;  %s1350_s0 = inlined_call_operand.vmem [shape: f32[1,3,64,64], index: 0, kind: input, shape index: {}]   ;;  %s1351_s1 = inlined_call_operand.vmem [shape: f32[3,4096], index: 1, kind: output, shape index: {}]  }
   0x1   :  { %vm105_vm4 = vcmask 1047559   ;;  %v763_v0 = vld [vmem:[%s1350_s0 + $0x11] sm:$0x1]   ;;  %v766_v4 = vld [vmem:[%s1350_s0 + $0x4f] sm:$0x10]   ;;  %s90_s24 = smov 12 }
   0x2   :  { %v764_v1 = vld [vmem:[%s1350_s0 + $0x50] sm:$0x2]   ;;  %v768_v5 = vld [vmem:[%s1350_s0 + $0x4e] sm:$0x80]   ;;  %v751_v8 = vld [vmem:[%s1350_s0 + $0x1] sm:$0x1]  }
   0x3   :  { %v153_v2 = vsel %vm87_vm0, %v764_v1, %v763_v0  ;;  %v765_v3 = vld [vmem:[%s1350_s0 + $0x18d] ss:$-126 sm:%s155_s6]   ;;  %v752_v9 = vld [vmem:[%s1350_s0 + $0x40] sm:$0x2]   ;;  %v754_v12 = vld [vmem:[%s1350_s0 + $0x3f] sm:$0x10]  }
   0x4   :  { %v158_v6 = vsel %vm92_vm1, %v765_v3, %v153_v2  ;;  %v767_v7 = vld [vmem:[%s1350_s0 + $0x309] ss:$-126 sm:%s164_s11]   ;;  %v88_v11 = vsel %vm87_vm0, %v752_v9, %v751_v8  ;;  %s99_s27 = smov 96  ;;  %v756_v13 = vld [vmem:[%s1350_s0 + $0x3e] sm:$0x80]   ;;  %s188_s5 = smov 12 }
   0x5   :  { %v162_v10 = vsel %vm96_vm2, %v766_v4, %v158_v6  ;;  %v753_v15 = vld [vmem:[%s1350_s0 + $0x17d] ss:$-126 sm:%s90_s24]   ;;  %s197_s6 = smov 96  ;;  %v769_v19 = vld [vmem:[%s1350_s0 + $0x19] sm:$0x1]   ;;  %s855_s13 = smov 64  }
   0x6   :  { %v167_v14 = vsel %vm101_vm3, %v767_v7, %v162_v10  ;;  %v755_v16 = vld [vmem:[%s1350_s0 + $0x2f9] ss:$-126 sm:%s99_s27]   ;;  %v93_v18 = vsel %vm92_vm1, %v753_v15, %v88_v11  ;;  %s122_s18 = smov 12  ;;  %s131_s19 = smov 96  ;;  %v757_v29 = vld [vmem:[%s1350_s0 + $0x9] sm:$0x1]  }
   0x7   :  { %v171_v17 = vsel %vm105_vm4, %v768_v5, %v167_v14  ;;  %v770_v20 = vld [vmem:[%s1350_s0 + $0x58] sm:$0x2]   ;;  %v97_v22 = vsel %vm96_vm2, %v754_v12, %v93_v18  ;;  %v772_v24 = vld [vmem:[%s1350_s0 + $0x57] sm:$0x10]   ;;  %v774_v28 = vld [vmem:[%s1350_s0 + $0x56] sm:$0x80]  }
   0x8   :  { %v771_v21 = vld [vmem:[%s1350_s0 + $0x195] ss:$-126 sm:%s188_s5]   ;;  %172 = vrot.lane.b32.xlu1 %v171_v17, %s855_s13  ;;  %v186_v23 = vsel %vm87_vm0, %v770_v20, %v769_v19  ;;  %v102_v26 = vsel %vm101_vm3, %v755_v16, %v97_v22  ;;  %v758_v30 = vld [vmem:[%s1350_s0 + $0x48] sm:$0x2]   ;;  %s254_s7 = smov 12  ;;  %s263_s8 = smov 96 }
   0x9   :  { %v773_v25 = vld [vmem:[%s1350_s0 + $0x311] ss:$-126 sm:%s197_s6]   ;;  %v191_v27 = vsel %vm92_vm1, %v771_v21, %v186_v23  ;;  %v106_v31 = vsel %vm105_vm4, %v756_v13, %v102_v26  ;;  %v120_v33 = vsel %vm87_vm0, %v758_v30, %v757_v29  ;;  %v760_v35 = vld [vmem:[%s1350_s0 + $0x47] sm:$0x10]   ;;  %v762_v36 = vld [vmem:[%s1350_s0 + $0x46] sm:$0x80]  }
   0xa   :  { %v195_v32 = vsel %vm96_vm2, %v772_v24, %v191_v27  ;;  %v759_v34 = vld [vmem:[%s1350_s0 + $0x185] ss:$-126 sm:%s122_s18]   ;;  %107 = vrot.lane.b32.xlu0 %v106_v31, %s855_s13  ;;  %s221_s20 = smov 12  ;;  %s230_s21 = smov 96  ;;  %v775_v52 = vld [vmem:[%s1350_s0 + $0x21] sm:$0x1]  }
   0xb   :  { %v200_v37 = vsel %vm101_vm3, %v773_v25, %v195_v32  ;;  %v125_v38 = vsel %vm92_vm1, %v759_v34, %v120_v33  ;;  %v761_v39 = vld [vmem:[%s1350_s0 + $0x301] ss:$-126 sm:%s131_s19]   ;;  %s320_s3 = smov 12  ;;  %s329_s4 = smov 96  ;;  %v793_v62 = vld [vmem:[%s1350_s0 + $0x39] sm:$0x1]  }
   0xc   :  { %v781_v40 = vld [vmem:[%s1350_s0 + $0x29] sm:$0x1]   ;;  %v204_v41 = vsel %vm105_vm4, %v774_v28, %v200_v37  ;;  %v129_v42 = vsel %vm96_vm2, %v760_v35, %v125_v38  ;;  %v784_v45 = vld [vmem:[%s1350_s0 + $0x67] sm:$0x10]   ;;  %v786_v49 = vld [vmem:[%s1350_s0 + $0x66] sm:$0x80]  }
   0xd   :  { %v782_v43 = vld [vmem:[%s1350_s0 + $0x68] sm:$0x2]   ;;  %205 = vrot.lane.b32.xlu1 %v204_v41, %s855_s13  ;;  %v134_v46 = vsel %vm101_vm3, %v761_v39, %v129_v42  ;;  %v776_v53 = vld [vmem:[%s1350_s0 + $0x60] sm:$0x2]   ;;  %v778_v57 = vld [vmem:[%s1350_s0 + $0x5f] sm:$0x10]  }
   0xe   :  { %v783_v44 = vld [vmem:[%s1350_s0 + $0x1a5] ss:$-126 sm:%s254_s7]   ;;  %v252_v47 = vsel %vm87_vm0, %v782_v43, %v781_v40  ;;  %v138_v50 = vsel %vm105_vm4, %v762_v36, %v134_v46  ;;  %v219_v56 = vsel %vm87_vm0, %v776_v53, %v775_v52  ;;  %v794_v63 = vld [vmem:[%s1350_s0 + $0x78] sm:$0x2]   ;;  %v796_v4 = vld [vmem:[%s1350_s0 + $0x77] sm:$0x10]  }
   0xf   :  { %v785_v48 = vld [vmem:[%s1350_s0 + $0x321] ss:$-126 sm:%s263_s8]   ;;  %v257_v51 = vsel %vm92_vm1, %v783_v44, %v252_v47  ;;  %139 = vrot.lane.b32.xlu0 %v138_v50, %s855_s13  ;;  %v318_v2 = vsel %vm87_vm0, %v794_v63, %v793_v62  ;;  %v798_v5 = vld [vmem:[%s1350_s0 + $0x76] sm:$0x80]   ;;  %s287_s22 = smov 12  ;;  %s296_s23 = smov 96 }
  0x10   :  { %v777_v54 = vld [vmem:[%s1350_s0 + $0x19d] ss:$-126 sm:%s221_s20]   ;;  %v261_v55 = vsel %vm96_vm2, %v784_v45, %v257_v51  ;;  %v787_v9 = vld [vmem:[%s1350_s0 + $0x31] sm:$0x1]   ;;  %v790_v14 = vld [vmem:[%s1350_s0 + $0x6f] sm:$0x10]  }
  0x11   :  { %v779_v58 = vld [vmem:[%s1350_s0 + $0x319] ss:$-126 sm:%s230_s21]   ;;  %v266_v59 = vsel %vm101_vm3, %v785_v48, %v261_v55  ;;  %v224_v60 = vsel %vm92_vm1, %v777_v54, %v219_v56  ;;  %v788_v12 = vld [vmem:[%s1350_s0 + $0x70] sm:$0x2]   ;;  %v792_v18 = vld [vmem:[%s1350_s0 + $0x6e] sm:$0x80]  }
  0x12   :  { %v780_v61 = vld [vmem:[%s1350_s0 + $0x5e] sm:$0x80]   ;;  %v270_v0 = vsel %vm105_vm4, %v786_v49, %v266_v59  ;;  %v228_v1 = vsel %vm96_vm2, %v778_v57, %v224_v60  ;;  %v795_v3 = vld [vmem:[%s1350_s0 + $0x1b5] ss:$-126 sm:%s320_s3]   ;;  %v285_v16 = vsel %vm87_vm0, %v788_v12, %v787_v9  ;;  %vm351_vm5 = vcmask 1042434   ;;  %s382_s5 = smov 3 }
  0x13   :  { %271 = vrot.lane.b32.xlu1 %v270_v0, %s855_s13  ;;  %v233_v6 = vsel %vm101_vm3, %v779_v58, %v228_v1  ;;  %v323_v7 = vsel %vm92_vm1, %v795_v3, %v318_v2  ;;  %v797_v8 = vld [vmem:[%s1350_s0 + $0x331] ss:$-126 sm:%s329_s4]   ;;  %vm356_vm6 = vcmask 1044483   ;;  %vm360_vm7 = vcmask 1045509   ;;  %s389_s8 = smov 24  ;;  %s347_s14 = smov 3 }
  0x14   :  { %v237_v10 = vsel %vm105_vm4, %v780_v61, %v233_v6  ;;  %v327_v11 = vsel %vm96_vm2, %v796_v4, %v323_v7  ;;  %v789_v13 = vld [vmem:[%s1350_s0 + $0x1ad] ss:$-126 sm:%s287_s22]   ;;  %vm364_vm8 = vcmask 1046534   ;;  %v808_v24 = vld [vmem:[%s1350_s0 + $0x1a] sm:$0x20]   ;;  %s354_s15 = smov 24 }
  0x15   :  { %238 = vrot.lane.b32.xlu0 %v237_v10, %s855_s13  ;;  %v332_v15 = vsel %vm101_vm3, %v797_v8, %v327_v11  ;;  %v791_v17 = vld [vmem:[%s1350_s0 + $0x329] ss:$-126 sm:%s296_s23]   ;;  %v290_v20 = vsel %vm92_vm1, %v789_v13, %v285_v16  ;;  %v809_v28 = vld [vmem:[%s1350_s0 + $0x59] sm:$0x40]   ;;  %s452_s3 = smov 3  ;;  %s459_s4 = smov 24 }
  0x16   :  { %v336_v19 = vsel %vm105_vm4, %v798_v5, %v332_v15  ;;  %v806_v21 = vld [vmem:[%s1350_s0 + $0x55] sm:$0x4]   ;;  %v294_v22 = vsel %vm96_vm2, %v790_v14, %v290_v20  ;;  %v810_v29 = vld [vmem:[%s1350_s0 + $0x98] sm:$0x80]   ;;  %v799_v32 = vld [vmem:[%s1350_s0 + $0x85] ss:$-126 sm:%s347_s14]  }
  0x17   :  { %337 = vrot.lane.b32.xlu1 %v336_v19, %s855_s13  ;;  %v805_v23 = vld [vmem:[%s1350_s0 + $0x95] ss:$-126 sm:%s382_s5]   ;;  %v299_v25 = vsel %vm101_vm3, %v791_v17, %v294_v22  ;;  %v800_v33 = vld [vmem:[%s1350_s0 + $0x45] sm:$0x4]   ;;  %s417_s20 = smov 3  ;;  %s424_s23 = smov 24 }
  0x18   :  { %v387_v26 = vsel %vm351_vm5, %v806_v21, %v805_v23  ;;  %v807_v27 = vld [vmem:[%s1350_s0 + $0x85] ss:$6 sm:%s389_s8]   ;;  %v303_v30 = vsel %vm105_vm4, %v792_v18, %v299_v25  ;;  %v352_v36 = vsel %vm351_vm5, %v800_v33, %v799_v32  ;;  %v801_v37 = vld [vmem:[%s1350_s0 + $0x75] ss:$6 sm:%s354_s15]   ;;  %vm3_vm9 = vcmask 523264  }
  0x19   :  { %v392_v31 = vsel %vm356_vm6, %v807_v27, %v387_v26  ;;  %v802_v34 = vld [vmem:[%s1350_s0 + $0xa] sm:$0x20]   ;;  %304 = vrot.lane.b32.xlu0 %v303_v30, %s855_s13  ;;  %v357_v40 = vsel %vm356_vm6, %v801_v37, %v352_v36  ;;  %v817_v42 = vld [vmem:[%s1350_s0 + $0xb5] ss:$-126 sm:%s452_s3]   ;;  %vm109_vm10 = vcmask 1048064  }
  0x1a   :  { %v396_v35 = vsel %vm360_vm7, %v808_v24, %v392_v31  ;;  %v803_v38 = vld [vmem:[%s1350_s0 + $0x49] sm:$0x40]   ;;  %v818_v43 = vld [vmem:[%s1350_s0 + $0x75] sm:$0x4]   ;;  %v361_v45 = vsel %vm360_vm7, %v802_v34, %v357_v40  ;;  %v820_v48 = vld [vmem:[%s1350_s0 + $0x3a] sm:$0x20]  }
  0x1b   :  { %v400_v39 = vsel %vm364_vm8, %v809_v28, %v396_v35  ;;  %v804_v41 = vld [vmem:[%s1350_s0 + $0x88] sm:$0x80]   ;;  %v457_v46 = vsel %vm351_vm5, %v818_v43, %v817_v42  ;;  %v821_v49 = vld [vmem:[%s1350_s0 + $0x79] sm:$0x40]   ;;  %v365_v50 = vsel %vm364_vm8, %v803_v38, %v361_v45  ;;  %v812_v53 = vld [vmem:[%s1350_s0 + $0x65] sm:$0x4]  }
  0x1c   :  { %v404_v44 = vsel %vm105_vm4, %v810_v29, %v400_v39  ;;  %v819_v47 = vld [vmem:[%s1350_s0 + $0xa5] ss:$6 sm:%s459_s4]   ;;  %v822_v52 = vld [vmem:[%s1350_s0 + $0xb8] sm:$0x80]   ;;  %v369_v54 = vsel %vm105_vm4, %v804_v41, %v365_v50  ;;  %v740_v1 = vld [vmem:[%s1350_s0 + $0x10] ss:$2 sm:$0xff]  }
  0x1d   :  { %405 = vrot.lane.b32.xlu1 %v404_v44, %s855_s13  ;;  %v462_v51 = vsel %vm356_vm6, %v819_v47, %v457_v46  ;;  %v811_v56 = vld [vmem:[%s1350_s0 + $0xa5] ss:$-126 sm:%s417_s20]   ;;  %370 = vrot.lane.b32.xlu0 %v369_v54, %s855_s13  ;;  %10 = vst.msk [vmem:[#allocation0 + $0x40] ss:$8 sm:$0xf] %vm3_vm9, %v740_v1  }
  0x1e   :  { %v466_v55 = vsel %vm360_vm7, %v820_v48, %v462_v51  ;;  %v813_v57 = vld [vmem:[%s1350_s0 + $0x95] ss:$6 sm:%s424_s23]   ;;  %v422_v59 = vsel %vm351_vm5, %v812_v53, %v811_v56  ;;  %v814_v60 = vld [vmem:[%s1350_s0 + $0x2a] sm:$0x20]   ;;  %v744_v2 = vld [vmem:[%s1350_s0 + $0x50] ss:$2 sm:$0xff]  }
  0x1f   :  { %v470_v58 = vsel %vm364_vm8, %v821_v49, %v466_v55  ;;  %v815_v61 = vld [vmem:[%s1350_s0 + $0x69] sm:$0x40]   ;;  %v427_v0 = vsel %vm356_vm6, %v813_v57, %v422_v59  ;;  %v748_v3 = vld [vmem:[%s1350_s0 + $0x90] ss:$2 sm:$0xff]   ;;  %v2_v5 = vld [vmem:[%s1350_s0] ss:$2 sm:$0xff]  }
  0x20   :  { %v816_v62 = vld [vmem:[%s1350_s0 + $0xa8] sm:$0x80]   ;;  %v474_v63 = vsel %vm105_vm4, %v822_v52, %v470_v58  ;;  %v431_v4 = vsel %vm360_vm7, %v814_v60, %v427_v0  ;;  %38 = vst.msk [vmem:[#allocation0 + $0x41] ss:$8 sm:$0xf] %vm3_vm9, %v744_v2  }
  0x21   :  { %475 = vrot.lane.b32.xlu1 %v474_v63, %s855_s13  ;;  %66 = vst.msk [vmem:[#allocation0 + $0x42] ss:$8 sm:$0xf] %vm3_vm9, %v748_v3   ;;  %12 = vst.msk [vmem:[#allocation0 + $0x40] ss:$8 sm:$0xf0] %vm3_vm9, %v740_v1   ;;  %v435_v8 = vsel %vm364_vm8, %v815_v61, %v431_v4 }
  0x22   :  { %40 = vst.msk [vmem:[#allocation0 + $0x41] ss:$8 sm:$0xf0] %vm3_vm9, %v744_v2   ;;  %68 = vst.msk [vmem:[#allocation0 + $0x42] ss:$8 sm:$0xf0] %vm3_vm9, %v748_v3   ;;  %v439_v12 = vsel %vm105_vm4, %v816_v62, %v435_v8 }
  0x23   :  { %v743_v6 = vld [vmem:[%s1350_s0 + $0x40] ss:$2 sm:$0xff]   ;;  %4 = vst.msk [vmem:[#allocation0] ss:$8 sm:$0xf] %vm3_vm9, %v2_v5   ;;  %440 = vrot.lane.b32.xlu0 %v439_v12, %s855_s13 }
  0x24   :  { %v747_v7 = vld [vmem:[%s1350_s0 + $0x80] ss:$2 sm:$0xff]   ;;  %31 = vst.msk [vmem:[#allocation0 + $0x1] ss:$8 sm:$0xf] %vm3_vm9, %v743_v6  }
  0x25   :  { %59 = vst.msk [vmem:[#allocation0 + $0x2] ss:$8 sm:$0xf] %vm3_vm9, %v747_v7   ;;  %5 = vst.msk [vmem:[#allocation0] ss:$8 sm:$0xf0] %vm3_vm9, %v2_v5  }
  0x26   :  { %33 = vst.msk [vmem:[#allocation0 + $0x1] ss:$8 sm:$0xf0] %vm3_vm9, %v743_v6   ;;  %61 = vst.msk [vmem:[#allocation0 + $0x2] ss:$8 sm:$0xf0] %vm3_vm9, %v747_v7  }
  0x27   :  { %v741_v9 = vld [vmem:[%s1350_s0 + $0x20] ss:$2 sm:$0xff]   ;;  %v742_v13 = vld [vmem:[%s1350_s0 + $0x30] ss:$2 sm:$0xff]  }
  0x28   :  { %v745_v10 = vld [vmem:[%s1350_s0 + $0x60] ss:$2 sm:$0xff]   ;;  %19 = vst.msk [vmem:[#allocation0 + $0x80] ss:$8 sm:$0xf0] %vm3_vm9, %v741_v9  }
  0x29   :  { %v749_v11 = vld [vmem:[%s1350_s0 + $0xa0] ss:$2 sm:$0xff]   ;;  %47 = vst.msk [vmem:[#allocation0 + $0x81] ss:$8 sm:$0xf0] %vm3_vm9, %v745_v10  }
  0x2a   :  { %75 = vst.msk [vmem:[#allocation0 + $0x82] ss:$8 sm:$0xf0] %vm3_vm9, %v749_v11   ;;  %17 = vst.msk [vmem:[#allocation0 + $0x80] ss:$8 sm:$0xf] %vm3_vm9, %v741_v9  }
  0x2b   :  { %45 = vst.msk [vmem:[#allocation0 + $0x81] ss:$8 sm:$0xf] %vm3_vm9, %v745_v10   ;;  %73 = vst.msk [vmem:[#allocation0 + $0x82] ss:$8 sm:$0xf] %vm3_vm9, %v749_v11  }
  0x2c   :  { %v746_v14 = vld [vmem:[%s1350_s0 + $0x70] ss:$2 sm:$0xff]   ;;  %26 = vst.msk [vmem:[#allocation0 + $0xc0] ss:$8 sm:$0xf0] %vm3_vm9, %v742_v13  }
  0x2d   :  { %v750_v15 = vld [vmem:[%s1350_s0 + $0xb0] ss:$2 sm:$0xff]   ;;  %54 = vst.msk [vmem:[#allocation0 + $0xc1] ss:$8 sm:$0xf0] %vm3_vm9, %v746_v14  }
  0x2e   :  { %82 = vst.msk [vmem:[#allocation0 + $0xc2] ss:$8 sm:$0xf0] %vm3_vm9, %v750_v15   ;;  %24 = vst.msk [vmem:[#allocation0 + $0xc0] ss:$8 sm:$0xf] %vm3_vm9, %v742_v13  }
  0x2f   :  { %52 = vst.msk [vmem:[#allocation0 + $0xc1] ss:$8 sm:$0xf] %vm3_vm9, %v746_v14   ;;  %80 = vst.msk [vmem:[#allocation0 + $0xc2] ss:$8 sm:$0xf] %vm3_vm9, %v750_v15  }
  0x7a   :  { %v173_v16 = vpop.permute.xlu1 %172  }
  0x7b   :  { %176 = vst.msk [vmem:[#allocation0 + $0x40] sm:$0x7] %vm109_vm10, %v173_v16   ;;  %178 = vst.msk [vmem:[#allocation0 + $0x45] sm:$0x38] %vm109_vm10, %v173_v16  }
  0x7c   :  { %180 = vst.msk [vmem:[#allocation0 + $0x4a] sm:$0xc0] %vm109_vm10, %v173_v16   ;;  %v108_v17 = vpop.permute.xlu0 %107  }
  0x7d   :  { %110 = vst.msk [vmem:[#allocation0] sm:$0x7] %vm109_vm10, %v108_v17   ;;  %112 = vst.msk [vmem:[#allocation0 + $0x5] sm:$0x38] %vm109_vm10, %v108_v17  }
  0x7e   :  { %114 = vst.msk [vmem:[#allocation0 + $0xa] sm:$0xc0] %vm109_vm10, %v108_v17  }
  0x7f   :  { %v206_v18 = vpop.permute.xlu1 %205  }
  0x80   :  { %209 = vst.msk [vmem:[#allocation0 + $0x60] sm:$0x7] %vm109_vm10, %v206_v18   ;;  %211 = vst.msk [vmem:[#allocation0 + $0x65] sm:$0x38] %vm109_vm10, %v206_v18  }
  0x81   :  { %213 = vst.msk [vmem:[#allocation0 + $0x6a] sm:$0xc0] %vm109_vm10, %v206_v18   ;;  %v140_v19 = vpop.permute.xlu0 %139  }
  0x82   :  { %v543_v20 = vld [vmem:[#allocation0 + $0x40] sm:$0xf]  ;;  %v550_v21 = vld [vmem:[#allocation0 + $0x48] sm:$0xf]  ;;  %143 = vst.msk [vmem:[#allocation0 + $0x20] sm:$0x7] %vm109_vm10, %v140_v19  }
  0x83   :  { %145 = vst.msk [vmem:[#allocation0 + $0x25] sm:$0x38] %vm109_vm10, %v140_v19   ;;  %147 = vst.msk [vmem:[#allocation0 + $0x2a] sm:$0xc0] %vm109_vm10, %v140_v19  }
  0x84   :  { %830 = vst [vmem:[%s1351_s1 + $0x20] sm:$0xf] %v543_v20  ;;  %831 = vst [vmem:[%s1351_s1 + $0x24] sm:$0xf] %v550_v21  ;;  %v490_v23 = vld [vmem:[#allocation0] sm:$0xf] }
  0x85   :  { %v272_v22 = vpop.permute.xlu1 %271   ;;  %v495_v24 = vld [vmem:[#allocation0 + $0x8] sm:$0xf]  ;;  %493 = vst [vmem:[%s1351_s1] sm:$0xf] %v490_v23 }
  0x86   :  { %275 = vst.msk [vmem:[#allocation0 + $0xa0] sm:$0x7] %vm109_vm10, %v272_v22   ;;  %277 = vst.msk [vmem:[#allocation0 + $0xa5] sm:$0x38] %vm109_vm10, %v272_v22  }
  0x87   :  { %279 = vst.msk [vmem:[#allocation0 + $0xaa] sm:$0xc0] %vm109_vm10, %v272_v22   ;;  %823 = vst [vmem:[%s1351_s1 + $0x4] sm:$0xf] %v495_v24  ;;  %v239_v25 = vpop.permute.xlu0 %238   ;;  %v571_v26 = vld [vmem:[#allocation0 + $0x60] sm:$0xf] }
  0x88   :  { %v578_v27 = vld [vmem:[#allocation0 + $0x68] sm:$0xf]  ;;  %242 = vst.msk [vmem:[#allocation0 + $0x80] sm:$0x7] %vm109_vm10, %v239_v25   ;;  %244 = vst.msk [vmem:[#allocation0 + $0x85] sm:$0x38] %vm109_vm10, %v239_v25  }
  0x89   :  { %246 = vst.msk [vmem:[#allocation0 + $0x8a] sm:$0xc0] %vm109_vm10, %v239_v25   ;;  %834 = vst [vmem:[%s1351_s1 + $0x30] sm:$0xf] %v571_v26  ;;  %v338_v28 = vpop.permute.xlu1 %337   ;;  %v515_v29 = vld [vmem:[#allocation0 + $0x20] sm:$0xf] }
  0x8a   :  { %835 = vst [vmem:[%s1351_s1 + $0x34] sm:$0xf] %v578_v27  ;;  %v522_v30 = vld [vmem:[#allocation0 + $0x28] sm:$0xf]  ;;  %341 = vst.msk [vmem:[#allocation0 + $0xe0] sm:$0x7] %vm109_vm10, %v338_v28  }
  0x8b   :  { %343 = vst.msk [vmem:[#allocation0 + $0xe5] sm:$0x38] %vm109_vm10, %v338_v28   ;;  %345 = vst.msk [vmem:[#allocation0 + $0xea] sm:$0xc0] %vm109_vm10, %v338_v28   ;;  %v305_v31 = vpop.permute.xlu0 %304  }
  0x8c   :  { %826 = vst [vmem:[%s1351_s1 + $0x10] sm:$0xf] %v515_v29  ;;  %827 = vst [vmem:[%s1351_s1 + $0x14] sm:$0xf] %v522_v30 }
  0x8d   :  { %v627_v32 = vld [vmem:[#allocation0 + $0xa0] sm:$0xf]  ;;  %v634_v33 = vld [vmem:[#allocation0 + $0xa8] sm:$0xf]  ;;  %308 = vst.msk [vmem:[#allocation0 + $0xc0] sm:$0x7] %vm109_vm10, %v305_v31  }
  0x8e   :  { %310 = vst.msk [vmem:[#allocation0 + $0xc5] sm:$0x38] %vm109_vm10, %v305_v31   ;;  %312 = vst.msk [vmem:[#allocation0 + $0xca] sm:$0xc0] %vm109_vm10, %v305_v31  }
  0x8f   :  { %842 = vst [vmem:[%s1351_s1 + $0x50] sm:$0xf] %v627_v32  ;;  %843 = vst [vmem:[%s1351_s1 + $0x54] sm:$0xf] %v634_v33  ;;  %v599_v34 = vld [vmem:[#allocation0 + $0x80] sm:$0xf]  ;;  %v406_v36 = vpop.permute.xlu1 %405   ;;  %v371_v39 = vpop.permute.xlu0 %370  }
  0x90   :  { %v606_v35 = vld [vmem:[#allocation0 + $0x88] sm:$0xf]  ;;  %838 = vst [vmem:[%s1351_s1 + $0x40] sm:$0xf] %v599_v34  ;;  %411 = vst.msk [vmem:[#allocation0 + $0x57] sm:$0xc] %vm109_vm10, %v406_v36  }
  0x91   :  { %839 = vst [vmem:[%s1351_s1 + $0x44] sm:$0xf] %v606_v35  ;;  %409 = vst.msk [vmem:[#allocation0 + $0x52] ss:$6 sm:$0x3] %vm109_vm10, %v406_v36  }
  0x92   :  { %413 = vst.msk [vmem:[#allocation0 + $0x5a] ss:$6 sm:$0x30] %vm109_vm10, %v406_v36   ;;  %415 = vst.msk [vmem:[#allocation0 + $0x73] sm:$0xc0] %vm109_vm10, %v406_v36  }
  0x93   :  { %v683_v37 = vld [vmem:[#allocation0 + $0xe0] sm:$0xf]  ;;  %v690_v38 = vld [vmem:[#allocation0 + $0xe8] sm:$0xf]  ;;  %376 = vst.msk [vmem:[#allocation0 + $0x17] sm:$0xc] %vm109_vm10, %v371_v39   ;;  %v476_v40 = vpop.permute.xlu1 %475  }
  0x94   :  { %850 = vst [vmem:[%s1351_s1 + $0x70] sm:$0xf] %v683_v37  ;;  %851 = vst [vmem:[%s1351_s1 + $0x74] sm:$0xf] %v690_v38  ;;  %v655_v41 = vld [vmem:[#allocation0 + $0xc0] sm:$0xf] }
  0x95   :  { %374 = vst.msk [vmem:[#allocation0 + $0x12] ss:$6 sm:$0x3] %vm109_vm10, %v371_v39   ;;  %378 = vst.msk [vmem:[#allocation0 + $0x1a] ss:$6 sm:$0x30] %vm109_vm10, %v371_v39   ;;  %v441_v43 = vpop.permute.xlu0 %440  }
  0x96   :  { %380 = vst.msk [vmem:[#allocation0 + $0x33] sm:$0xc0] %vm109_vm10, %v371_v39   ;;  %v662_v42 = vld [vmem:[#allocation0 + $0xc8] sm:$0xf]  ;;  %481 = vst.msk [vmem:[#allocation0 + $0xd7] sm:$0xc] %vm109_vm10, %v476_v40  }
  0x97   :  { %479 = vst.msk [vmem:[#allocation0 + $0xd2] ss:$6 sm:$0x3] %vm109_vm10, %v476_v40   ;;  %483 = vst.msk [vmem:[#allocation0 + $0xda] ss:$6 sm:$0x30] %vm109_vm10, %v476_v40  }
  0x98   :  { %485 = vst.msk [vmem:[#allocation0 + $0xf3] sm:$0xc0] %vm109_vm10, %v476_v40   ;;  %846 = vst [vmem:[%s1351_s1 + $0x60] sm:$0xf] %v655_v41  ;;  %v564_v44 = vld [vmem:[#allocation0 + $0x58] sm:$0xf] }
  0x99   :  { %847 = vst [vmem:[%s1351_s1 + $0x64] sm:$0xf] %v662_v42  ;;  %v592_v45 = vld [vmem:[#allocation0 + $0x78] sm:$0xf]  ;;  %v557_v46 = vld [vmem:[#allocation0 + $0x50] sm:$0xf] }
  0x9a   :  { %444 = vst.msk [vmem:[#allocation0 + $0x92] ss:$6 sm:$0x3] %vm109_vm10, %v441_v43   ;;  %446 = vst.msk [vmem:[#allocation0 + $0x97] sm:$0xc] %vm109_vm10, %v441_v43  }
  0x9b   :  { %448 = vst.msk [vmem:[#allocation0 + $0x9a] ss:$6 sm:$0x30] %vm109_vm10, %v441_v43   ;;  %450 = vst.msk [vmem:[#allocation0 + $0xb3] sm:$0xc0] %vm109_vm10, %v441_v43  }
  0x9c   :  { %833 = vst [vmem:[%s1351_s1 + $0x2c] sm:$0xf] %v564_v44  ;;  %837 = vst [vmem:[%s1351_s1 + $0x3c] sm:$0xf] %v592_v45  ;;  %v585_v47 = vld [vmem:[#allocation0 + $0x70] sm:$0xf] }
  0x9d   :  { %832 = vst [vmem:[%s1351_s1 + $0x28] sm:$0xf] %v557_v46  ;;  %v508_v48 = vld [vmem:[#allocation0 + $0x18] sm:$0xf]  ;;  %v501_v50 = vld [vmem:[#allocation0 + $0x10] sm:$0xf] }
  0x9e   :  { %v536_v49 = vld [vmem:[#allocation0 + $0x38] sm:$0xf]  ;;  %836 = vst [vmem:[%s1351_s1 + $0x38] sm:$0xf] %v585_v47  ;;  %825 = vst [vmem:[%s1351_s1 + $0xc] sm:$0xf] %v508_v48 }
  0x9f   :  { %829 = vst [vmem:[%s1351_s1 + $0x1c] sm:$0xf] %v536_v49  ;;  %v529_v51 = vld [vmem:[#allocation0 + $0x30] sm:$0xf]  ;;  %824 = vst [vmem:[%s1351_s1 + $0x8] sm:$0xf] %v501_v50 }
  0xa0   :  { %v669_v52 = vld [vmem:[#allocation0 + $0xd0] sm:$0xf]  ;;  %v676_v53 = vld [vmem:[#allocation0 + $0xd8] sm:$0xf]  ;;  %828 = vst [vmem:[%s1351_s1 + $0x18] sm:$0xf] %v529_v51 }
  0xa1   :  { %v704_v54 = vld [vmem:[#allocation0 + $0xf8] sm:$0xf]  ;;  %848 = vst [vmem:[%s1351_s1 + $0x68] sm:$0xf] %v669_v52  ;;  %849 = vst [vmem:[%s1351_s1 + $0x6c] sm:$0xf] %v676_v53 }
  0xa2   :  { %853 = vst [vmem:[%s1351_s1 + $0x7c] sm:$0xf] %v704_v54  ;;  %v697_v55 = vld [vmem:[#allocation0 + $0xf0] sm:$0xf]  ;;  %v620_v56 = vld [vmem:[#allocation0 + $0x98] sm:$0xf] }
  0xa3   :  { %852 = vst [vmem:[%s1351_s1 + $0x78] sm:$0xf] %v697_v55  ;;  %v648_v57 = vld [vmem:[#allocation0 + $0xb8] sm:$0xf]  ;;  %v613_v58 = vld [vmem:[#allocation0 + $0x90] sm:$0xf] }
  0xa4   :  { %841 = vst [vmem:[%s1351_s1 + $0x4c] sm:$0xf] %v620_v56  ;;  %845 = vst [vmem:[%s1351_s1 + $0x5c] sm:$0xf] %v648_v57  ;;  %v641_v59 = vld [vmem:[#allocation0 + $0xb0] sm:$0xf] }
  0xa5   :  { %840 = vst [vmem:[%s1351_s1 + $0x48] sm:$0xf] %v613_v58  ;;  %844 = vst [vmem:[%s1351_s1 + $0x58] sm:$0xf] %v641_v59 }

// kernel: model_forward.1
= control target key start
LH: loop header
LB: loop body
LE: loop exit
PB: predicated region body
PF: predicated region fallthrough
CT: control target
= control target key end

     0   :  { %v7632_v0 = vmov 0   ;;  %v7634_v3 = vmov 1   ;;  %v7631_v4 = vmov 2   ;;  %v86_v7 = vlaneseq  ;;  %s4352_s27 = smov 3   ;;  %s4353_s28 = smov 4   ;;  %s7617_s6 = inlined_call_operand.vmem [shape: f32[8,3], index: 6, kind: input, shape index: {}]   ;;  %s7618_s4 = inlined_call_operand.vmem [shape: f32[8,3], index: 4, kind: input, shape index: {}]   ;;  %s7619_s5 = inlined_call_operand.vmem [shape: f32[8,1], index: 5, kind: input, shape index: {}]   ;;  %s7620_s7 = inlined_call_operand.vmem [shape: f32[8,1], index: 7, kind: input, shape index: {}]   ;;  %s7621_s0 = inlined_call_operand.vmem [shape: f32[3,4096], index: 0, kind: input, shape index: {}]   ;;  %s7622_s1 = inlined_call_operand.vmem [shape: f32[3,4096], index: 1, kind: input, shape index: {}]   ;;  %s7623_s8 = inlined_call_operand.vmem [shape: f32[8,8], index: 8, kind: input, shape index: {}]   ;;  %s7624_s10 = inlined_call_operand.vmem [shape: f32[8,8], index: 10, kind: input, shape index: {}]   ;;  %s7625_s9 = inlined_call_operand.vmem [shape: f32[8,1], index: 9, kind: input, shape index: {}]   ;;  %s7626_s11 = inlined_call_operand.vmem [shape: f32[8,1], index: 11, kind: input, shape index: {}]   ;;  %s7627_s2 = inlined_call_operand.vmem [shape: f32[3,1024], index: 2, kind: input, shape index: {}]   ;;  %s7628_s3 = inlined_call_operand.vmem [shape: f32[3,1024], index: 3, kind: input, shape index: {}]   ;;  %s7629_s13 = inlined_call_operand.vmem [shape: f32[8,2], index: 13, kind: output, shape index: {1}]   ;;  %s7630_s12 = inlined_call_operand.vmem [shape: f32[8,1024], index: 12, kind: output, shape index: {0}]  }
   0x1   :  { %4309 = vset.pattern.permute.xlu1 %v7632_v0  ;;  %4307 = vset.pattern.permute.xlu0 %v7632_v0  ;;  %v1611_v1 = vld [vmem:[%s7617_s6] sm:$0xff]  ;;  %v4464_v10 = vld [vmem:[%s7621_s0 + $0x8] sm:$0x77]  ;;  %v4469_v11 = vld [vmem:[%s7621_s0 + $0x10] sm:$0x77]  ;;  %s4354_s6 = smov 5  }
   0x2   :  { %v63_v2 = vld [vmem:[%s7618_s4] sm:$0xff]  ;;  %1615 = vperm.xlu1 %4309, %v1611_v1   ;;  %v4454_v8 = vshrl.u32 %v86_v7, 7  ;;  %v4477_v13 = vld [vmem:[%s7621_s0 + $0x18] sm:$0x77]  ;;  %v4490_v16 = vld [vmem:[%s7621_s0 + $0x28] sm:$0x77] }
   0x3   :  { %67 = vperm.xlu0 %4307, %v63_v2   ;;  %v64_v5 = vld [vmem:[%s7619_s5] sm:$0xff]  ;;  %v4495_v17 = vld [vmem:[%s7621_s0 + $0x30] sm:$0x77]  ;;  %v4508_v21 = vld [vmem:[%s7621_s0 + $0x38] sm:$0x77]  ;;  %s4355_s29 = smov 6  }
   0x4   :  { %v1612_v6 = vld [vmem:[%s7620_s7] sm:$0xff]  ;;  %7751 = vst [vmem:[#allocation2_spill] sm:$0xff] %v4454_v8  ;;  %v4472_v12 = vsub.s32 0, %v4454_v8  ;;  %v4485_v15 = vsub.s32 4, %v4454_v8  ;;  %v4500_v19 = vsub.s32 1, %v4454_v8  ;;  %v4503_v20 = vsub.s32 5, %v4454_v8 }
   0x5   :  { %v4459_v9 = vld [vmem:[%s7621_s0] sm:$0x77]  ;;  %v4526_v27 = vld [vmem:[%s7621_s0 + $0x48] sm:$0x77]  ;;  %v4531_v28 = vld [vmem:[%s7621_s0 + $0x50] sm:$0x77] }
   0x6   :  { %4310 = vset.pattern.permute.xlu1 %v7634_v3  ;;  %7752 = vst [vmem:[#allocation3_spill] sm:$0xff] %v4472_v12  ;;  %v4482_v14 = vld [vmem:[%s7621_s0 + $0x20] sm:$0x77]  ;;  %7753 = vst [vmem:[#allocation4_spill] sm:$0xff] %v4485_v15  ;;  %v89_v18 = vrot.slane %v4459_v9, %v4472_v12  ;;  %v93_v23 = vrot.slane %v4459_v9, %v4485_v15  ;;  %v97_v24 = vrot.slane %v4464_v10, %v4472_v12  ;;  %v4544_v33 = vld [vmem:[%s7621_s0 + $0x58] sm:$0x77] }
   0x7   :  { %4308 = vset.pattern.permute.xlu0 %v7634_v3  ;;  %1955 = vperm.xlu1 %4310, %v1611_v1   ;;  %7754 = vst [vmem:[#allocation5_spill] sm:$0xff] %v4500_v19  ;;  %7755 = vst [vmem:[#allocation6_spill] sm:$0xff] %v4503_v20  ;;  %v4513_v22 = vld [vmem:[%s7621_s0 + $0x40] sm:$0x77]  ;;  %v101_v25 = vrot.slane %v4464_v10, %v4485_v15  ;;  %v105_v26 = vrot.slane %v4469_v11, %v4472_v12  ;;  %v4562_v39 = vld [vmem:[%s7621_s0 + $0x68] sm:$0x77] }
   0x8   :  { %407 = vperm.xlu0 %4308, %v63_v2   ;;  %v109_v29 = vrot.slane %v4469_v11, %v4485_v15  ;;  %v113_v30 = vrot.slane %v4477_v13, %v4472_v12  ;;  %v117_v31 = vrot.slane %v4477_v13, %v4485_v15  ;;  %v121_v32 = vrot.slane %v4482_v14, %v4472_v12  ;;  %v4549_v34 = vld [vmem:[%s7621_s0 + $0x60] sm:$0x77]  ;;  %v4567_v40 = vld [vmem:[%s7621_s0 + $0x70] sm:$0x77]  ;;  %v4580_v45 = vld [vmem:[%s7621_s0 + $0x78] sm:$0x77] }
   0x9   :  { %v125_v35 = vrot.slane %v4482_v14, %v4485_v15  ;;  %v129_v36 = vrot.slane %v4490_v16, %v4472_v12  ;;  %v133_v37 = vrot.slane %v4490_v16, %v4485_v15  ;;  %v137_v38 = vrot.slane %v4495_v17, %v4472_v12  ;;  %s4356_s4 = smov 7   ;;  %s4358_s25 = smov 126  }
   0xa   :  { %v141_v41 = vrot.slane %v4495_v17, %v4485_v15  ;;  %v145_v42 = vrot.slane %v4508_v21, %v4472_v12  ;;  %v149_v43 = vrot.slane %v4508_v21, %v4485_v15  ;;  %v153_v44 = vrot.slane %v4513_v22, %v4472_v12  ;;  %s4359_s26 = smov 125   ;;  %s4360_s0 = smov 124  }
   0xb   :  { %4311 = vset.pattern.permute.xlu1 %v7631_v4  ;;  %v157_v46 = vrot.slane %v4513_v22, %v4485_v15  ;;  %v161_v47 = vrot.slane %v4526_v27, %v4472_v12  ;;  %v165_v48 = vrot.slane %v4526_v27, %v4485_v15  ;;  %v169_v49 = vrot.slane %v4531_v28, %v4472_v12 }
   0xc   :  { %4312 = vset.pattern.permute.xlu0 %v7631_v4  ;;  %763 = vperm.xlu1 %4311, %v63_v2   ;;  %v173_v50 = vrot.slane %v4531_v28, %v4485_v15  ;;  %v177_v51 = vrot.slane %v4544_v33, %v4472_v12  ;;  %v181_v52 = vrot.slane %v4544_v33, %v4485_v15  ;;  %vm4268_vm0 = vcmask 7168  }
   0xd   :  { %2311 = vperm.xlu0 %4312, %v1611_v1   ;;  %v185_v53 = vrot.slane %v4549_v34, %v4472_v12  ;;  %v189_v54 = vrot.slane %v4549_v34, %v4485_v15  ;;  %v193_v55 = vrot.slane %v4562_v39, %v4472_v12  ;;  %v197_v56 = vrot.slane %v4562_v39, %v4485_v15 }
   0xe   :  { %v201_v57 = vrot.slane %v4567_v40, %v4472_v12  ;;  %v205_v58 = vrot.slane %v4567_v40, %v4485_v15  ;;  %v209_v59 = vrot.slane %v4580_v45, %v4472_v12  ;;  %v213_v60 = vrot.slane %v4580_v45, %v4485_v15 }
   0xf   :  { %v4613_v61 = vrot.slane %v89_v18, %v4472_v12  ;;  %v4616_v62 = vrot.slane %v93_v23, %v4472_v12  ;;  %v4619_v63 = vrot.slane %v97_v24, %v4472_v12  ;;  %v4622_v1 = vrot.slane %v101_v25, %v4472_v12 }
  0x10   :  { %4313 = vset.pattern.permute.xlu1 %v7632_v0  ;;  %v4625_v2 = vrot.slane %v105_v26, %v4472_v12  ;;  %v4634_v7 = vrot.slane %v117_v31, %v4472_v12  ;;  %v4637_v18 = vrot.slane %v121_v32, %v4472_v12  ;;  %v4640_v23 = vrot.slane %v125_v35, %v4472_v12 }
  0x11   :  { %1120 = vperm.xlu1 %4313, %v64_v5   ;;  %4314 = vset.pattern.permute.xlu0 %v7632_v0  ;;  %7756 = vst [vmem:[#allocation7_spill] sm:$0xff] %v4619_v63  ;;  %7757 = vst [vmem:[#allocation8_spill] sm:$0xff] %v4622_v1  ;;  %v4628_v5 = vrot.slane %v109_v29, %v4472_v12  ;;  %v4643_v24 = vrot.slane %v129_v36, %v4472_v12  ;;  %vm4275_vm1 = vcmask 15368  }
  0x12   :  { %7758 = vst [vmem:[#allocation9_spill] sm:$0xff] %v4625_v2  ;;  %7761 = vst [vmem:[#allocation12_spill] sm:$0xff] %v4634_v7  ;;  %v4646_v25 = vrot.slane %v133_v37, %v4472_v12  ;;  %v4649_v26 = vrot.slane %v137_v38, %v4472_v12  ;;  %v4652_v29 = vrot.slane %v141_v41, %v4472_v12 }
  0x13   :  { %7759 = vst [vmem:[#allocation10_spill] sm:$0xff] %v4628_v5  ;;  %7762 = vst [vmem:[#allocation13_spill] sm:$0xff] %v4637_v18  ;;  %v4658_v31 = vrot.slane %v149_v43, %v4472_v12  ;;  %v4661_v32 = vrot.slane %v153_v44, %v4472_v12  ;;  %v4664_v35 = vrot.slane %v157_v46, %v4472_v12 }
  0x14   :  { %7763 = vst [vmem:[#allocation14_spill] sm:$0xff] %v4640_v23  ;;  %7764 = vst [vmem:[#allocation15_spill] sm:$0xff] %v4643_v24  ;;  %v4667_v36 = vrot.slane %v161_v47, %v4472_v12  ;;  %v4670_v37 = vrot.slane %v165_v48, %v4472_v12  ;;  %v4673_v38 = vrot.slane %v169_v49, %v4472_v12 }
  0x15   :  { %2668 = vperm.xlu1 %4313, %v1612_v6   ;;  %v4631_v6 = vrot.slane %v113_v30, %v4472_v12  ;;  %7765 = vst [vmem:[#allocation16_spill] sm:$0xff] %v4646_v25  ;;  %7766 = vst [vmem:[#allocation17_spill] sm:$0xff] %v4649_v26  ;;  %v4655_v30 = vrot.slane %v145_v42, %v4472_v12  ;;  %v4676_v41 = vrot.slane %v173_v50, %v4472_v12 }
  0x16   :  { %7767 = vst [vmem:[#allocation18_spill] sm:$0xff] %v4652_v29  ;;  %7769 = vst [vmem:[#allocation20_spill] sm:$0xff] %v4658_v31  ;;  %v4679_v42 = vrot.slane %v177_v51, %v4472_v12  ;;  %v4682_v43 = vrot.slane %v181_v52, %v4472_v12  ;;  %v4685_v44 = vrot.slane %v185_v53, %v4472_v12 }
  0x17   :  { %7760 = vst [vmem:[#allocation11_spill] sm:$0xff] %v4631_v6  ;;  %7768 = vst [vmem:[#allocation19_spill] sm:$0xff] %v4655_v30  ;;  %v4688_v46 = vrot.slane %v189_v54, %v4472_v12  ;;  %v4691_v47 = vrot.slane %v193_v55, %v4472_v12  ;;  %v4694_v48 = vrot.slane %v197_v56, %v4472_v12 }
  0x18   :  { %7770 = vst [vmem:[#allocation21_spill] sm:$0xff] %v4661_v32  ;;  %7771 = vst [vmem:[#allocation22_spill] sm:$0xff] %v4664_v35  ;;  %v4697_v49 = vrot.slane %v201_v57, %v4472_v12  ;;  %v4700_v50 = vrot.slane %v205_v58, %v4472_v12  ;;  %v4703_v51 = vrot.slane %v209_v59, %v4472_v12 }
  0x19   :  { %7772 = vst [vmem:[#allocation23_spill] sm:$0xff] %v4667_v36  ;;  %7773 = vst [vmem:[#allocation24_spill] sm:$0xff] %v4670_v37  ;;  %v4706_v52 = vrot.slane %v213_v60, %v4472_v12  ;;  %v413_v53 = vrot.slane %v4459_v9, %v4500_v19  ;;  %v417_v54 = vrot.slane %v4459_v9, %v4503_v20 }
  0x1a   :  { %7774 = vst [vmem:[#allocation25_spill] sm:$0xff] %v4673_v38  ;;  %7775 = vst [vmem:[#allocation26_spill] sm:$0xff] %v4676_v41  ;;  %v421_v55 = vrot.slane %v4464_v10, %v4500_v19  ;;  %v425_v56 = vrot.slane %v4464_v10, %v4503_v20  ;;  %v429_v57 = vrot.slane %v4469_v11, %v4500_v19 }
  0x1b   :  { %7776 = vst [vmem:[#allocation27_spill] sm:$0xff] %v4679_v42  ;;  %7777 = vst [vmem:[#allocation28_spill] sm:$0xff] %v4682_v43  ;;  %v433_v58 = vrot.slane %v4469_v11, %v4503_v20  ;;  %v437_v59 = vrot.slane %v4477_v13, %v4500_v19  ;;  %v441_v60 = vrot.slane %v4477_v13, %v4503_v20 }
  0x1c   :  { %7778 = vst [vmem:[#allocation29_spill] sm:$0xff] %v4685_v44  ;;  %7779 = vst [vmem:[#allocation30_spill] sm:$0xff] %v4688_v46  ;;  %v445_v4 = vrot.slane %v4482_v14, %v4500_v19  ;;  %v449_v0 = vrot.slane %v4482_v14, %v4503_v20  ;;  %v453_v3 = vrot.slane %v4490_v16, %v4500_v19 }
  0x1d   :  { %7780 = vst [vmem:[#allocation31_spill] sm:$0xff] %v4691_v47  ;;  %7781 = vst [vmem:[#allocation32_spill] sm:$0xff] %v4694_v48  ;;  %v473_v48 = vrot.slane %v4508_v21, %v4503_v20  ;;  %v477_v47 = vrot.slane %v4513_v22, %v4500_v19  ;;  %v481_v46 = vrot.slane %v4513_v22, %v4503_v20 }
  0x1e   :  { %7782 = vst [vmem:[#allocation33_spill] sm:$0xff] %v4697_v49  ;;  %7783 = vst [vmem:[#allocation34_spill] sm:$0xff] %v4700_v50  ;;  %v465_v50 = vrot.slane %v4495_v17, %v4503_v20  ;;  %v469_v49 = vrot.slane %v4508_v21, %v4500_v19  ;;  %v485_v44 = vrot.slane %v4526_v27, %v4500_v19 }
  0x1f   :  { %7784 = vst [vmem:[#allocation35_spill] sm:$0xff] %v4703_v51  ;;  %7785 = vst [vmem:[#allocation36_spill] sm:$0xff] %v4706_v52  ;;  %v457_v52 = vrot.slane %v4490_v16, %v4503_v20  ;;  %v461_v51 = vrot.slane %v4495_v17, %v4500_v19  ;;  %v489_v43 = vrot.slane %v4526_v27, %v4503_v20 }
  0x20   :  { %v493_v42 = vrot.slane %v4531_v28, %v4500_v19  ;;  %v497_v41 = vrot.slane %v4531_v28, %v4503_v20  ;;  %v501_v38 = vrot.slane %v4544_v33, %v4500_v19  ;;  %v505_v37 = vrot.slane %v4544_v33, %v4503_v20 }
  0x21   :  { %v509_v36 = vrot.slane %v4549_v34, %v4500_v19  ;;  %v513_v35 = vrot.slane %v4549_v34, %v4503_v20  ;;  %v517_v32 = vrot.slane %v4562_v39, %v4500_v19  ;;  %v521_v31 = vrot.slane %v4562_v39, %v4503_v20 }
  0x22   :  { %v525_v30 = vrot.slane %v4567_v40, %v4500_v19  ;;  %v529_v29 = vrot.slane %v4567_v40, %v4503_v20  ;;  %v533_v26 = vrot.slane %v4580_v45, %v4500_v19  ;;  %v537_v25 = vrot.slane %v4580_v45, %v4503_v20 }
  0x23   :  { %v4773_v24 = vrot.slane %v413_v53, %v4500_v19  ;;  %v4776_v23 = vrot.slane %v417_v54, %v4500_v19  ;;  %v4779_v18 = vrot.slane %v421_v55, %v4500_v19  ;;  %v4782_v7 = vrot.slane %v425_v56, %v4500_v19 }
  0x24   :  { %v4785_v6 = vrot.slane %v429_v57, %v4500_v19  ;;  %v4788_v5 = vrot.slane %v433_v58, %v4500_v19  ;;  %v4791_v2 = vrot.slane %v437_v59, %v4500_v19  ;;  %v4794_v53 = vrot.slane %v441_v60, %v4500_v19 }
  0x25   :  { %7786 = vst [vmem:[#allocation37_spill] sm:$0xff] %v4779_v18  ;;  %7787 = vst [vmem:[#allocation38_spill] sm:$0xff] %v4782_v7  ;;  %v4797_v54 = vrot.slane %v445_v4, %v4500_v19  ;;  %v4800_v55 = vrot.slane %v449_v0, %v4500_v19  ;;  %v4803_v56 = vrot.slane %v453_v3, %v4500_v19 }
  0x26   :  { %7788 = vst [vmem:[#allocation39_spill] sm:$0xff] %v4785_v6  ;;  %7789 = vst [vmem:[#allocation40_spill] sm:$0xff] %v4788_v5  ;;  %v4806_v57 = vrot.slane %v457_v52, %v4500_v19  ;;  %v4809_v58 = vrot.slane %v461_v51, %v4500_v19  ;;  %v4812_v59 = vrot.slane %v465_v50, %v4500_v19 }
  0x27   :  { %7790 = vst [vmem:[#allocation41_spill] sm:$0xff] %v4791_v2  ;;  %7791 = vst [vmem:[#allocation42_spill] sm:$0xff] %v4794_v53  ;;  %v4815_v60 = vrot.slane %v469_v49, %v4500_v19  ;;  %v4818_v4 = vrot.slane %v473_v48, %v4500_v19  ;;  %v4821_v0 = vrot.slane %v477_v47, %v4500_v19  ;;  %v4842_v47 = vsub.s32 2, %v4454_v8 }
  0x28   :  { %7792 = vst [vmem:[#allocation43_spill] sm:$0xff] %v4797_v54  ;;  %7793 = vst [vmem:[#allocation44_spill] sm:$0xff] %v4800_v55  ;;  %v4824_v3 = vrot.slane %v481_v46, %v4500_v19  ;;  %v4827_v52 = vrot.slane %v485_v44, %v4500_v19  ;;  %v4830_v51 = vrot.slane %v489_v43, %v4500_v19  ;;  %v4845_v46 = vsub.s32 6, %v4454_v8  ;;  %v4850_v43 = vld [vmem:[%s7622_s1] sm:$0x77] }
  0x29   :  { %7794 = vst [vmem:[#allocation45_spill] sm:$0xff] %v4803_v56  ;;  %7795 = vst [vmem:[#allocation46_spill] sm:$0xff] %v4806_v57  ;;  %v4833_v50 = vrot.slane %v493_v42, %v4500_v19  ;;  %v4836_v49 = vrot.slane %v497_v41, %v4500_v19  ;;  %v4839_v48 = vrot.slane %v501_v38, %v4500_v19  ;;  %v4855_v42 = vld [vmem:[%s7622_s1 + $0x8] sm:$0x77] }
  0x2a   :  { %7796 = vst [vmem:[#allocation47_spill] sm:$0xff] %v4809_v58  ;;  %7797 = vst [vmem:[#allocation48_spill] sm:$0xff] %v4812_v59  ;;  %v4858_v41 = vrot.slane %v505_v37, %v4500_v19  ;;  %v4861_v38 = vrot.slane %v509_v36, %v4500_v19  ;;  %v4864_v44 = vrot.slane %v513_v35, %v4500_v19 }
  0x2b   :  { %7798 = vst [vmem:[#allocation49_spill] sm:$0xff] %v4815_v60  ;;  %7799 = vst [vmem:[#allocation50_spill] sm:$0xff] %v4818_v4  ;;  %v4867_v8 = vrot.slane %v517_v32, %v4500_v19  ;;  %v4879_v37 = vrot.slane %v533_v26, %v4500_v19  ;;  %v4882_v36 = vrot.slane %v537_v25, %v4500_v19 }
  0x2c   :  { %7800 = vst [vmem:[#allocation51_spill] sm:$0xff] %v4821_v0  ;;  %7801 = vst [vmem:[#allocation52_spill] sm:$0xff] %v4824_v3  ;;  %v777_v26 = vrot.slane %v4464_v10, %v4842_v47  ;;  %v781_v35 = vrot.slane %v4464_v10, %v4845_v46  ;;  %v785_v32 = vrot.slane %v4469_v11, %v4842_v47 }
  0x2d   :  { %7802 = vst [vmem:[#allocation53_spill] sm:$0xff] %v4827_v52  ;;  %7803 = vst [vmem:[#allocation54_spill] sm:$0xff] %v4830_v51  ;;  %v805_v25 = vrot.slane %v4482_v14, %v4845_v46  ;;  %v809_v10 = vrot.slane %v4490_v16, %v4842_v47  ;;  %v869_v51 = vrot.slane %v4549_v34, %v4845_v46 }
  0x2e   :  { %7804 = vst [vmem:[#allocation55_spill] sm:$0xff] %v4833_v50  ;;  %7805 = vst [vmem:[#allocation56_spill] sm:$0xff] %v4836_v49  ;;  %v4873_v49 = vrot.slane %v525_v30, %v4500_v19  ;;  %v4876_v50 = vrot.slane %v529_v29, %v4500_v19  ;;  %v769_v30 = vrot.slane %v4459_v9, %v4842_v47 }
  0x2f   :  { %7806 = vst [vmem:[#allocation57_spill] sm:$0xff] %v4839_v48  ;;  %7807 = vst [vmem:[#allocation58_spill] sm:$0xff] %v4842_v47  ;;  %v4870_v48 = vrot.slane %v521_v31, %v4500_v19  ;;  %v773_v29 = vrot.slane %v4459_v9, %v4845_v46  ;;  %v789_v31 = vrot.slane %v4469_v11, %v4845_v46 }
  0x30   :  { %7808 = vst [vmem:[#allocation59_spill] sm:$0xff] %v4845_v46  ;;  %7809 = vst [vmem:[#allocation60_spill] sm:$0xff] %v4858_v41  ;;  %v797_v9 = vrot.slane %v4477_v13, %v4845_v46  ;;  %v817_v11 = vrot.slane %v4495_v17, %v4842_v47  ;;  %v861_v41 = vrot.slane %v4544_v33, %v4845_v46 }
  0x31   :  { %7810 = vst [vmem:[#allocation61_spill] sm:$0xff] %v4861_v38  ;;  %7811 = vst [vmem:[#allocation62_spill] sm:$0xff] %v4864_v44  ;;  %v845_v44 = vrot.slane %v4526_v27, %v4845_v46  ;;  %v853_v38 = vrot.slane %v4531_v28, %v4845_v46  ;;  %v877_v52 = vrot.slane %v4562_v39, %v4845_v46 }
  0x32   :  { %7812 = vst [vmem:[#allocation63_spill] sm:$0xff] %v4867_v8  ;;  %7813 = vst [vmem:[#allocation64_spill] sm:$0xff] %v4870_v48  ;;  %v829_v48 = vrot.slane %v4508_v21, %v4845_v46  ;;  %v837_v8 = vrot.slane %v4513_v22, %v4845_v46  ;;  %v885_v3 = vrot.slane %v4567_v40, %v4845_v46 }
  0x33   :  { %7814 = vst [vmem:[#allocation65_spill] sm:$0xff] %v4873_v49  ;;  %7815 = vst [vmem:[#allocation66_spill] sm:$0xff] %v4876_v50  ;;  %v813_v50 = vrot.slane %v4490_v16, %v4845_v46  ;;  %v821_v49 = vrot.slane %v4495_v17, %v4845_v46  ;;  %v841_v16 = vrot.slane %v4526_v27, %v4842_v47 }
  0x34   :  { %7816 = vst [vmem:[#allocation67_spill] sm:$0xff] %v4879_v37  ;;  %7817 = vst [vmem:[#allocation68_spill] sm:$0xff] %v4882_v36  ;;  %v793_v36 = vrot.slane %v4477_v13, %v4842_v47  ;;  %v801_v37 = vrot.slane %v4482_v14, %v4842_v47  ;;  %v825_v13 = vrot.slane %v4508_v21, %v4842_v47 }
  0x35   :  { %v833_v14 = vrot.slane %v4513_v22, %v4842_v47  ;;  %v849_v17 = vrot.slane %v4531_v28, %v4842_v47  ;;  %v857_v21 = vrot.slane %v4544_v33, %v4842_v47  ;;  %v865_v22 = vrot.slane %v4549_v34, %v4842_v47 }
  0x36   :  { %v873_v27 = vrot.slane %v4562_v39, %v4842_v47  ;;  %v881_v28 = vrot.slane %v4567_v40, %v4842_v47  ;;  %v889_v33 = vrot.slane %v4580_v45, %v4842_v47  ;;  %v893_v0 = vrot.slane %v4580_v45, %v4845_v46 }
  0x37   :  { %v4957_v34 = vrot.slane %v769_v30, %v4842_v47  ;;  %v4960_v4 = vrot.slane %v773_v29, %v4842_v47  ;;  %v4963_v39 = vrot.slane %v777_v26, %v4842_v47  ;;  %v4966_v60 = vrot.slane %v781_v35, %v4842_v47 }
  0x38   :  { %v4969_v40 = vrot.slane %v785_v32, %v4842_v47  ;;  %v4972_v59 = vrot.slane %v789_v31, %v4842_v47  ;;  %v4975_v45 = vrot.slane %v793_v36, %v4842_v47  ;;  %v4978_v30 = vrot.slane %v797_v9, %v4842_v47 }
  0x39   :  { %7818 = vst [vmem:[#allocation69_spill] sm:$0xff] %v4963_v39  ;;  %7819 = vst [vmem:[#allocation70_spill] sm:$0xff] %v4966_v60  ;;  %v4981_v29 = vrot.slane %v801_v37, %v4842_v47  ;;  %v4984_v26 = vrot.slane %v805_v25, %v4842_v47  ;;  %v4987_v35 = vrot.slane %v809_v10, %v4842_v47 }
  0x3a   :  { %7820 = vst [vmem:[#allocation71_spill] sm:$0xff] %v4969_v40  ;;  %7821 = vst [vmem:[#allocation72_spill] sm:$0xff] %v4972_v59  ;;  %v4990_v32 = vrot.slane %v813_v50, %v4842_v47  ;;  %v4993_v31 = vrot.slane %v817_v11, %v4842_v47  ;;  %v4996_v36 = vrot.slane %v821_v49, %v4842_v47 }
  0x3b   :  { %7822 = vst [vmem:[#allocation73_spill] sm:$0xff] %v4975_v45  ;;  %7823 = vst [vmem:[#allocation74_spill] sm:$0xff] %v4978_v30  ;;  %v4999_v9 = vrot.slane %v825_v13, %v4842_v47  ;;  %v5002_v37 = vrot.slane %v829_v48, %v4842_v47  ;;  %v5005_v25 = vrot.slane %v833_v14, %v4842_v47  ;;  %v5033_v14 = vld [vmem:[%s7622_s1 + $0x18] sm:$0x77] }
  0x3c   :  { %7824 = vst [vmem:[#allocation75_spill] sm:$0xff] %v4981_v29  ;;  %7825 = vst [vmem:[#allocation76_spill] sm:$0xff] %v4984_v26  ;;  %v5008_v10 = vrot.slane %v837_v8, %v4842_v47  ;;  %v5011_v50 = vrot.slane %v841_v16, %v4842_v47  ;;  %v5014_v11 = vrot.slane %v845_v44, %v4842_v47  ;;  %v5028_v8 = vld [vmem:[%s7622_s1 + $0x10] sm:$0x77] }
  0x3d   :  { %7826 = vst [vmem:[#allocation77_spill] sm:$0xff] %v4987_v35  ;;  %7827 = vst [vmem:[#allocation78_spill] sm:$0xff] %v4990_v32  ;;  %v5017_v49 = vrot.slane %v849_v17, %v4842_v47  ;;  %v5020_v13 = vrot.slane %v853_v38, %v4842_v47  ;;  %v5023_v48 = vrot.slane %v857_v21, %v4842_v47  ;;  %v5050_v21 = vld [vmem:[%s7622_s1 + $0x20] sm:$0x77] }
  0x3e   :  { %7828 = vst [vmem:[#allocation79_spill] sm:$0xff] %v4993_v31  ;;  %7829 = vst [vmem:[#allocation80_spill] sm:$0xff] %v4996_v36  ;;  %v5036_v44 = vrot.slane %v861_v41, %v4842_v47  ;;  %v5039_v16 = vrot.slane %v865_v22, %v4842_v47  ;;  %v5042_v38 = vrot.slane %v869_v51, %v4842_v47 }
  0x3f   :  { %7830 = vst [vmem:[#allocation81_spill] sm:$0xff] %v4999_v9  ;;  %7831 = vst [vmem:[#allocation82_spill] sm:$0xff] %v5002_v37  ;;  %v5045_v17 = vrot.slane %v873_v27, %v4842_v47  ;;  %v5058_v41 = vrot.slane %v877_v52, %v4842_v47  ;;  %v5061_v22 = vrot.slane %v881_v28, %v4842_v47  ;;  %v5090_v28 = vld [vmem:[%s7622_s1 + $0x48] sm:$0x77]  ;;  %v5137_v37 = vld [vmem:[%s7622_s1 + $0x70] sm:$0x77] }
  0x40   :  { %7832 = vst [vmem:[#allocation83_spill] sm:$0xff] %v5005_v25  ;;  %7833 = vst [vmem:[#allocation84_spill] sm:$0xff] %v5008_v10  ;;  %v5064_v51 = vrot.slane %v885_v3, %v4842_v47  ;;  %v5067_v27 = vrot.slane %v889_v33, %v4842_v47  ;;  %v5080_v52 = vrot.slane %v893_v0, %v4842_v47  ;;  %v5085_v3 = vld [vmem:[%s7622_s1 + $0x40] sm:$0x77]  ;;  %v5142_v9 = vld [vmem:[%s7622_s1 + $0x78] sm:$0x77] }
  0x41   :  { %7834 = vst [vmem:[#allocation85_spill] sm:$0xff] %v5011_v50  ;;  %7835 = vst [vmem:[#allocation86_spill] sm:$0xff] %v5014_v11  ;;  %v1653_v33 = vrot.slane %v5028_v8, %v4472_v12  ;;  %v1661_v0 = vrot.slane %v5033_v14, %v4472_v12  ;;  %v1701_v31 = vrot.slane %v5085_v3, %v4472_v12 }
  0x42   :  { %7836 = vst [vmem:[#allocation87_spill] sm:$0xff] %v5017_v49  ;;  %7837 = vst [vmem:[#allocation88_spill] sm:$0xff] %v5020_v13  ;;  %v5119_v13 = vld [vmem:[%s7622_s1 + $0x60] sm:$0x77]  ;;  %v5124_v49 = vld [vmem:[%s7622_s1 + $0x68] sm:$0x77]  ;;  %v1705_v32 = vrot.slane %v5085_v3, %v4485_v15  ;;  %v1709_v58 = vrot.slane %v5090_v28, %v4472_v12  ;;  %v1713_v35 = vrot.slane %v5090_v28, %v4485_v15 }
  0x43   :  { %7838 = vst [vmem:[#allocation89_spill] sm:$0xff] %v5023_v48  ;;  %7839 = vst [vmem:[#allocation90_spill] sm:$0xff] %v5036_v44  ;;  %v5055_v48 = vld [vmem:[%s7622_s1 + $0x28] sm:$0x77]  ;;  %v1733_v55 = vrot.slane %v5119_v13, %v4472_v12  ;;  %v1737_v30 = vrot.slane %v5119_v13, %v4485_v15  ;;  %v1741_v54 = vrot.slane %v5124_v49, %v4472_v12 }
  0x44   :  { %7840 = vst [vmem:[#allocation91_spill] sm:$0xff] %v5039_v16  ;;  %7841 = vst [vmem:[#allocation92_spill] sm:$0xff] %v5042_v38  ;;  %v5077_v38 = vld [vmem:[%s7622_s1 + $0x38] sm:$0x77]  ;;  %v1673_v16 = vrot.slane %v5050_v21, %v4485_v15  ;;  %v1677_v44 = vrot.slane %v5055_v48, %v4472_v12  ;;  %v1681_v11 = vrot.slane %v5055_v48, %v4485_v15 }
  0x45   :  { %7842 = vst [vmem:[#allocation93_spill] sm:$0xff] %v5045_v17  ;;  %7843 = vst [vmem:[#allocation94_spill] sm:$0xff] %v5058_v41  ;;  %v5072_v17 = vld [vmem:[%s7622_s1 + $0x30] sm:$0x77]  ;;  %v1669_v41 = vrot.slane %v5050_v21, %v4472_v12  ;;  %v1693_v25 = vrot.slane %v5077_v38, %v4472_v12  ;;  %v1697_v36 = vrot.slane %v5077_v38, %v4485_v15 }
  0x46   :  { %7844 = vst [vmem:[#allocation95_spill] sm:$0xff] %v5061_v22  ;;  %7845 = vst [vmem:[#allocation96_spill] sm:$0xff] %v5064_v51  ;;  %v5106_v51 = vld [vmem:[%s7622_s1 + $0x58] sm:$0x77]  ;;  %v1665_v22 = vrot.slane %v5033_v14, %v4485_v15  ;;  %v1685_v50 = vrot.slane %v5072_v17, %v4472_v12  ;;  %v1689_v10 = vrot.slane %v5072_v17, %v4485_v15 }
  0x47   :  { %7846 = vst [vmem:[#allocation97_spill] sm:$0xff] %v5067_v27  ;;  %7847 = vst [vmem:[#allocation98_spill] sm:$0xff] %v5072_v17  ;;  %v1657_v27 = vrot.slane %v5028_v8, %v4485_v15  ;;  %v1725_v56 = vrot.slane %v5106_v51, %v4472_v12  ;;  %v1729_v29 = vrot.slane %v5106_v51, %v4485_v15 }
  0x48   :  { %7848 = vst [vmem:[#allocation99_spill] sm:$0xff] %v5077_v38  ;;  %7849 = vst [vmem:[#allocation100_spill] sm:$0xff] %v5080_v52  ;;  %v5101_v52 = vld [vmem:[%s7622_s1 + $0x50] sm:$0x77]  ;;  %v1745_v45 = vrot.slane %v5124_v49, %v4485_v15  ;;  %v1749_v53 = vrot.slane %v5137_v37, %v4472_v12  ;;  %v1753_v59 = vrot.slane %v5137_v37, %v4485_v15 }
  0x49   :  { %7850 = vst [vmem:[#allocation101_spill] sm:$0xff] %v5085_v3  ;;  %7851 = vst [vmem:[#allocation102_spill] sm:$0xff] %v5090_v28  ;;  %v1717_v57 = vrot.slane %v5101_v52, %v4472_v12  ;;  %v1721_v26 = vrot.slane %v5101_v52, %v4485_v15  ;;  %v1757_v2 = vrot.slane %v5142_v9, %v4472_v12 }
  0x4a   :  { %7852 = vst [vmem:[#allocation103_spill] sm:$0xff] %v5101_v52  ;;  %7853 = vst [vmem:[#allocation104_spill] sm:$0xff] %v5106_v51  ;;  %v1761_v40 = vrot.slane %v5142_v9, %v4485_v15  ;;  %v7858_v5 = vrot.slane %v4850_v43, %v4472_v12  ;;  %v7860_v6 = vrot.slane %v4850_v43, %v4485_v15 }
  0x4b   :  { %7854 = vst [vmem:[#allocation105_spill] sm:$0xff] %v5119_v13  ;;  %7855 = vst [vmem:[#allocation106_spill] sm:$0xff] %v5124_v49  ;;  %v7862_v7 = vrot.slane %v4855_v42, %v4472_v12  ;;  %v7864_v18 = vrot.slane %v4855_v42, %v4485_v15  ;;  %v1993_v15 = vrot.slane %v5050_v21, %v4500_v19 }
  0x4c   :  { %7856 = vst [vmem:[#allocation107_spill] sm:$0xff] %v5137_v37  ;;  %7857 = vst [vmem:[#allocation108_spill] sm:$0xff] %v5142_v9  ;;  %v5182_v60 = vrot.slane %v7858_v5, %v4472_v12  ;;  %v5188_v39 = vrot.slane %v7860_v6, %v4472_v12  ;;  %v5203_v5 = vrot.slane %v1653_v33, %v4472_v12 }
  0x4d   :  { %v5194_v1 = vrot.slane %v7862_v7, %v4472_v12  ;;  %v5200_v63 = vrot.slane %v7864_v18, %v4472_v12  ;;  %v5209_v6 = vrot.slane %v1661_v0, %v4472_v12  ;;  %v5215_v7 = vrot.slane %v1669_v41, %v4472_v12 }
  0x4e   :  { %7859 = vst [vmem:[#allocation109_spill] sm:$0xff] %v5182_v60  ;;  %7861 = vst [vmem:[#allocation110_spill] sm:$0xff] %v5188_v39  ;;  %v5206_v60 = vrot.slane %v1657_v27, %v4472_v12  ;;  %v5212_v39 = vrot.slane %v1665_v22, %v4472_v12  ;;  %v5221_v18 = vrot.slane %v1677_v44, %v4472_v12 }
  0x4f   :  { %7863 = vst [vmem:[#allocation111_spill] sm:$0xff] %v5194_v1  ;;  %7865 = vst [vmem:[#allocation112_spill] sm:$0xff] %v5200_v63  ;;  %v5218_v1 = vrot.slane %v1673_v16, %v4472_v12  ;;  %v5224_v33 = vrot.slane %v1681_v11, %v4472_v12  ;;  %v5227_v27 = vrot.slane %v1685_v50, %v4472_v12 }
  0x50   :  { %7866 = vst [vmem:[#allocation113_spill] sm:$0xff] %v5203_v5  ;;  %7867 = vst [vmem:[#allocation114_spill] sm:$0xff] %v5206_v60  ;;  %v5230_v0 = vrot.slane %v1689_v10, %v4472_v12  ;;  %v5233_v22 = vrot.slane %v1693_v25, %v4472_v12  ;;  %v5236_v41 = vrot.slane %v1697_v36, %v4472_v12 }
  0x51   :  { %7868 = vst [vmem:[#allocation115_spill] sm:$0xff] %v5209_v6  ;;  %7869 = vst [vmem:[#allocation116_spill] sm:$0xff] %v5212_v39  ;;  %v5239_v16 = vrot.slane %v1701_v31, %v4472_v12  ;;  %v5242_v44 = vrot.slane %v1705_v32, %v4472_v12  ;;  %v5245_v11 = vrot.slane %v1709_v58, %v4472_v12 }
  0x52   :  { %7870 = vst [vmem:[#allocation117_spill] sm:$0xff] %v5215_v7  ;;  %7871 = vst [vmem:[#allocation118_spill] sm:$0xff] %v5218_v1  ;;  %v5248_v50 = vrot.slane %v1713_v35, %v4472_v12  ;;  %v5251_v10 = vrot.slane %v1717_v57, %v4472_v12  ;;  %v5254_v25 = vrot.slane %v1721_v26, %v4472_v12 }
  0x53   :  { %7872 = vst [vmem:[#allocation119_spill] sm:$0xff] %v5221_v18  ;;  %7873 = vst [vmem:[#allocation120_spill] sm:$0xff] %v5224_v33  ;;  %v5257_v36 = vrot.slane %v1725_v56, %v4472_v12  ;;  %v5260_v31 = vrot.slane %v1729_v29, %v4472_v12  ;;  %v5263_v32 = vrot.slane %v1733_v55, %v4472_v12 }
  0x54   :  { %7874 = vst [vmem:[#allocation121_spill] sm:$0xff] %v5227_v27  ;;  %7875 = vst [vmem:[#allocation122_spill] sm:$0xff] %v5230_v0  ;;  %v5266_v58 = vrot.slane %v1737_v30, %v4472_v12  ;;  %v5269_v35 = vrot.slane %v1741_v54, %v4472_v12  ;;  %v5272_v57 = vrot.slane %v1745_v45, %v4472_v12 }
  0x55   :  { %7876 = vst [vmem:[#allocation123_spill] sm:$0xff] %v5233_v22  ;;  %7877 = vst [vmem:[#allocation124_spill] sm:$0xff] %v5236_v41  ;;  %v5275_v26 = vrot.slane %v1749_v53, %v4472_v12  ;;  %v5278_v56 = vrot.slane %v1753_v59, %v4472_v12  ;;  %v5281_v29 = vrot.slane %v1757_v2, %v4472_v12 }
  0x56   :  { %7878 = vst [vmem:[#allocation125_spill] sm:$0xff] %v5239_v16  ;;  %7879 = vst [vmem:[#allocation126_spill] sm:$0xff] %v5242_v44  ;;  %v5284_v55 = vrot.slane %v1761_v40, %v4472_v12  ;;  %v1961_v30 = vrot.slane %v4850_v43, %v4500_v19  ;;  %v1965_v54 = vrot.slane %v4850_v43, %v4503_v20 }
  0x57   :  { %7880 = vst [vmem:[#allocation127_spill] sm:$0xff] %v5245_v11  ;;  %7881 = vst [vmem:[#allocation128_spill] sm:$0xff] %v5248_v50  ;;  %v1969_v45 = vrot.slane %v4855_v42, %v4500_v19  ;;  %v1973_v53 = vrot.slane %v4855_v42, %v4503_v20  ;;  %v1977_v59 = vrot.slane %v5028_v8, %v4500_v19 }
  0x58   :  { %7882 = vst [vmem:[#allocation129_spill] sm:$0xff] %v5251_v10  ;;  %7883 = vst [vmem:[#allocation130_spill] sm:$0xff] %v5254_v25  ;;  %v1981_v2 = vrot.slane %v5028_v8, %v4503_v20  ;;  %v1985_v40 = vrot.slane %v5033_v14, %v4500_v19  ;;  %v1989_v12 = vrot.slane %v5033_v14, %v4503_v20 }
  0x59   :  { %7884 = vst [vmem:[#allocation131_spill] sm:$0xff] %v5257_v36  ;;  %7885 = vst [vmem:[#allocation132_spill] sm:$0xff] %v5260_v31  ;;  %v2029_v31 = vrot.slane %v5085_v3, %v4503_v20  ;;  %v2033_v36 = vrot.slane %v5090_v28, %v4500_v19  ;;  %v2037_v25 = vrot.slane %v5090_v28, %v4503_v20  ;;  %v7981_v28 = vld [vmem:[#allocation80_spill] sm:$0xff] }
  0x5a   :  { %7886 = vst [vmem:[#allocation133_spill] sm:$0xff] %v5263_v32  ;;  %7887 = vst [vmem:[#allocation134_spill] sm:$0xff] %v5266_v58  ;;  %v2021_v58 = vrot.slane %v5077_v38, %v4503_v20  ;;  %v2025_v32 = vrot.slane %v5085_v3, %v4500_v19  ;;  %v2041_v10 = vrot.slane %v5101_v52, %v4500_v19 }
  0x5b   :  { %7888 = vst [vmem:[#allocation135_spill] sm:$0xff] %v5269_v35  ;;  %7889 = vst [vmem:[#allocation136_spill] sm:$0xff] %v5272_v57  ;;  %v2013_v57 = vrot.slane %v5072_v17, %v4503_v20  ;;  %v2017_v35 = vrot.slane %v5077_v38, %v4500_v19  ;;  %v2045_v50 = vrot.slane %v5101_v52, %v4503_v20 }
  0x5c   :  { %7890 = vst [vmem:[#allocation137_spill] sm:$0xff] %v5275_v26  ;;  %7891 = vst [vmem:[#allocation138_spill] sm:$0xff] %v5278_v56  ;;  %v2005_v56 = vrot.slane %v5055_v48, %v4503_v20  ;;  %v2009_v26 = vrot.slane %v5072_v17, %v4500_v19  ;;  %v2049_v11 = vrot.slane %v5106_v51, %v4500_v19 }
  0x5d   :  { %7892 = vst [vmem:[#allocation139_spill] sm:$0xff] %v5281_v29  ;;  %7893 = vst [vmem:[#allocation140_spill] sm:$0xff] %v5284_v55  ;;  %v1997_v55 = vrot.slane %v5050_v21, %v4503_v20  ;;  %v2001_v29 = vrot.slane %v5055_v48, %v4500_v19  ;;  %v2053_v44 = vrot.slane %v5106_v51, %v4503_v20 }
  0x5e   :  { %v2057_v16 = vrot.slane %v5119_v13, %v4500_v19  ;;  %v2061_v41 = vrot.slane %v5119_v13, %v4503_v20  ;;  %v2065_v22 = vrot.slane %v5124_v49, %v4500_v19  ;;  %v2069_v27 = vrot.slane %v5124_v49, %v4503_v20  ;;  %v7942_v49 = vld [vmem:[#allocation42_spill] sm:$0xff] }
  0x5f   :  { %v2073_v33 = vrot.slane %v5137_v37, %v4500_v19  ;;  %v2077_v18 = vrot.slane %v5137_v37, %v4503_v20  ;;  %v2081_v1 = vrot.slane %v5142_v9, %v4500_v19  ;;  %v2085_v7 = vrot.slane %v5142_v9, %v4503_v20 }
  0x60   :  { %v5353_v39 = vrot.slane %v1961_v30, %v4500_v19  ;;  %v5356_v6 = vrot.slane %v1965_v54, %v4500_v19  ;;  %v5359_v60 = vrot.slane %v1969_v45, %v4500_v19  ;;  %v5362_v5 = vrot.slane %v1973_v53, %v4500_v19 }
  0x61   :  { %v5365_v63 = vrot.slane %v1977_v59, %v4500_v19  ;;  %v5371_v20 = vrot.slane %v1985_v40, %v4500_v19  ;;  %v5374_v30 = vrot.slane %v1989_v12, %v4500_v19  ;;  %v5377_v54 = vrot.slane %v1993_v15, %v4500_v19 }
  0x62   :  { %v5380_v45 = vrot.slane %v1997_v55, %v4500_v19  ;;  %v5383_v53 = vrot.slane %v2001_v29, %v4500_v19  ;;  %v5391_v40 = vrot.slane %v2009_v26, %v4500_v19  ;;  %v5394_v12 = vrot.slane %v2013_v57, %v4500_v19 }
  0x63   :  { %v5397_v15 = vrot.slane %v2017_v35, %v4500_v19  ;;  %v5400_v55 = vrot.slane %v2021_v58, %v4500_v19  ;;  %v5403_v29 = vrot.slane %v2025_v32, %v4500_v19  ;;  %v5414_v57 = vrot.slane %v2037_v25, %v4500_v19 }
  0x64   :  { %7895 = vst [vmem:[#allocation142_spill] sm:$0xff] %v5383_v53  ;;  %7898 = vst [vmem:[#allocation145_spill] sm:$0xff] %v5391_v40  ;;  %v5406_v53 = vrot.slane %v2029_v31, %v4500_v19  ;;  %v5417_v35 = vrot.slane %v2041_v10, %v4500_v19  ;;  %v5420_v58 = vrot.slane %v2045_v50, %v4500_v19 }
  0x65   :  { %7899 = vst [vmem:[#allocation146_spill] sm:$0xff] %v5394_v12  ;;  %7900 = vst [vmem:[#allocation147_spill] sm:$0xff] %v5397_v15  ;;  %v5423_v32 = vrot.slane %v2049_v11, %v4500_v19  ;;  %v5426_v31 = vrot.slane %v2053_v44, %v4500_v19  ;;  %v5435_v25 = vrot.slane %v2065_v22, %v4500_v19 }
  0x66   :  { %7901 = vst [vmem:[#allocation148_spill] sm:$0xff] %v5400_v55  ;;  %7902 = vst [vmem:[#allocation149_spill] sm:$0xff] %v5403_v29  ;;  %v5438_v10 = vrot.slane %v2069_v27, %v4500_v19  ;;  %v5441_v50 = vrot.slane %v2073_v33, %v4500_v19  ;;  %v5444_v11 = vrot.slane %v2077_v18, %v4500_v19 }
  0x67   :  { %7903 = vst [vmem:[#allocation150_spill] sm:$0xff] %v5406_v53  ;;  %7906 = vst [vmem:[#allocation153_spill] sm:$0xff] %v5414_v57  ;;  %v5447_v44 = vrot.slane %v2081_v1, %v4500_v19 }
  0x68   :  { %7907 = vst [vmem:[#allocation154_spill] sm:$0xff] %v5417_v35  ;;  %7908 = vst [vmem:[#allocation155_spill] sm:$0xff] %v5420_v58 }
  0x69   :  { %7909 = vst [vmem:[#allocation156_spill] sm:$0xff] %v5423_v32  ;;  %7910 = vst [vmem:[#allocation157_spill] sm:$0xff] %v5426_v31 }
  0x6a   :  { %7913 = vst [vmem:[#allocation160_spill] sm:$0xff] %v5435_v25  ;;  %7914 = vst [vmem:[#allocation161_spill] sm:$0xff] %v5438_v10  ;;  %v7923_v25 = vld [vmem:[#allocation8_spill] sm:$0xff] }
  0x6b   :  { %7915 = vst [vmem:[#allocation162_spill] sm:$0xff] %v5441_v50  ;;  %7916 = vst [vmem:[#allocation163_spill] sm:$0xff] %v5444_v11 }
  0x6c   :  { %7917 = vst [vmem:[#allocation164_spill] sm:$0xff] %v5447_v44 }
  0x7d   :  { %v5340_v0 = vpop.permute.xlu1 %1615 }
  0x7e   :  { %7894 = vst [vmem:[#allocation141_spill] sm:$0xff] %v5340_v0  ;;  %v5368_v0 = vrot.slane %v1981_v2, %v4500_v19  ;;  %v5385_v59 = vpop.permute.xlu0 %67  ;;  %v5388_v2 = vrot.slane %v2005_v56, %v4500_v19  ;;  %v5409_v56 = vrot.slane %v2033_v36, %v4500_v19  ;;  %v5429_v36 = vrot.slane %v2057_v16, %v4500_v19 }
  0x7f   :  { %7896 = vst [vmem:[#allocation143_spill] sm:$0xff] %v5385_v59  ;;  %v5450_v16 = vrot.slane %v2085_v7, %v4500_v19  ;;  %v375_v18 = vmul.f32 %v4616_v62, %v5385_v59  ;;  %v377_v22 = vmul.f32 %v7923_v25, %v5385_v59  ;;  %v7930_v25 = vld [vmem:[#allocation10_spill] sm:$0xff] }
  0x80   :  { %7897 = vst [vmem:[#allocation144_spill] sm:$0xff] %v5388_v2  ;;  %7904 = vst [vmem:[#allocation151_spill] sm:$0xff] %v5409_v56  ;;  %v5432_v56 = vrot.slane %v2061_v41, %v4500_v19  ;;  %v2317_v41 = vrot.slane %v4850_v43, %v4842_v47 }
  0x81   :  { %7911 = vst [vmem:[#allocation158_spill] sm:$0xff] %v5429_v36  ;;  %7918 = vst [vmem:[#allocation165_spill] sm:$0xff] %v5450_v16  ;;  %v374_v16 = vmul.f32 %v4613_v61, %v5385_v59  ;;  %v7925_v36 = vld [vmem:[#allocation69_spill] sm:$0xff] }
  0x82   :  { %v5411_v26 = vpop.permute.xlu1 %1955  ;;  %7912 = vst [vmem:[#allocation159_spill] sm:$0xff] %v5432_v56  ;;  %v7924_v56 = vld [vmem:[#allocation38_spill] sm:$0xff]  ;;  %v5555_v37 = vrot.slane %v2317_v41, %v4842_v47  ;;  %v7937_v41 = vrot.slane %v4850_v43, %v4845_v46  ;;  %v7941_v43 = vld [vmem:[#allocation12_spill] sm:$0xff] }
  0x83   :  { %7905 = vst [vmem:[#allocation152_spill] sm:$0xff] %v5411_v26  ;;  %v5458_v33 = vpop.permute.xlu0 %407 }
  0x84   :  { %7919 = vst [vmem:[#allocation166_spill] sm:$0xff] %v5458_v33  ;;  %v698_v1 = vmul.f32 %v4773_v24, %v5458_v33  ;;  %v699_v7 = vmul.f32 %v4776_v23, %v5458_v33  ;;  %v7922_v23 = vld [vmem:[#allocation37_spill] sm:$0xff]  ;;  %v701_v27 = vmul.f32 %v7924_v56, %v5458_v33  ;;  %v7931_v56 = vld [vmem:[#allocation40_spill] sm:$0xff]  ;;  %v705_v13 = vmul.f32 %v7942_v49, %v5458_v33 }
  0x85   :  { %v700_v50 = vmul.f32 %v7922_v23, %v5458_v33  ;;  %v7929_v23 = vld [vmem:[#allocation70_spill] sm:$0xff]  ;;  %v703_v61 = vmul.f32 %v7931_v56, %v5458_v33 }
  0x86   :  { %v730_v10 = vadd.f32 %v698_v1, %v374_v16  ;;  %v731_v19 = vadd.f32 %v699_v7, %v375_v18  ;;  %v733_v1 = vadd.f32 %v701_v27, %v377_v22  ;;  %v7932_v7 = vld [vmem:[#allocation71_spill] sm:$0xff]  ;;  %v5573_v22 = vrot.slane %v7937_v41, %v4842_v47 }
  0x87   :  { %v5476_v44 = vpop.permute.xlu1 %763  ;;  %v381_v41 = vmul.f32 %v7941_v43, %v5385_v59 }
  0x88   :  { %7920 = vst [vmem:[#allocation167_spill] sm:$0xff] %v5476_v44  ;;  %v1054_v62 = vmul.f32 %v4957_v34, %v5476_v44  ;;  %v1055_v24 = vmul.f32 %v4960_v4, %v5476_v44  ;;  %v7921_v4 = vld [vmem:[#allocation7_spill] sm:$0xff]  ;;  %v1057_v16 = vmul.f32 %v7929_v23, %v5476_v44  ;;  %v379_v34 = vmul.f32 %v7930_v25, %v5385_v59  ;;  %v7936_v23 = vld [vmem:[#allocation41_spill] sm:$0xff] }
  0x89   :  { %v376_v11 = vmul.f32 %v7921_v4, %v5385_v59  ;;  %v1056_v4 = vmul.f32 %v7925_v36, %v5476_v44  ;;  %v7927_v36 = vld [vmem:[#allocation9_spill] sm:$0xff]  ;;  %v704_v56 = vmul.f32 %v7936_v23, %v5458_v33  ;;  %v1067_v53 = vmul.f32 %v7981_v28, %v5476_v44 }
  0x8a   :  { %v1086_v31 = vadd.f32 %v1054_v62, %v730_v10  ;;  %v1087_v32 = vadd.f32 %v1055_v24, %v731_v19  ;;  %v378_v19 = vmul.f32 %v7927_v36, %v5385_v59  ;;  %v7928_v10 = vld [vmem:[#allocation39_spill] sm:$0xff]  ;;  %v1058_v36 = vmul.f32 %v7932_v7, %v5476_v44 }
  0x8b   :  { %v702_v62 = vmul.f32 %v7928_v10, %v5458_v33  ;;  %v732_v24 = vadd.f32 %v700_v50, %v376_v11  ;;  %v7935_v11 = vld [vmem:[#allocation11_spill] sm:$0xff]  ;;  %v735_v51 = vadd.f32 %v703_v61, %v379_v34 }
  0x8c   :  { %v5534_v18 = vpop.permute.xlu1 %1120  ;;  %v380_v25 = vmul.f32 %v7935_v11, %v5385_v59  ;;  %v7940_v11 = vrot.slane %v4855_v42, %v4845_v46  ;;  %v7947_v61 = vld [vmem:[#allocation43_spill] sm:$0xff] }
  0x8d   :  { %7926 = vst [vmem:[#allocation7_spill] sm:$0xff] %v5534_v18  ;;  %v1088_v9 = vadd.f32 %v1056_v4, %v732_v24  ;;  %v5560_v10 = vadd.f32 %v5534_v18, %v1086_v31  ;;  %v5563_v50 = vadd.f32 %v5534_v18, %v1087_v32  ;;  %v7938_v31 = vrot.slane %v4855_v42, %v4842_v47  ;;  %v7939_v4 = vld [vmem:[#allocation72_spill] sm:$0xff] }
  0x8e   :  { %v734_v32 = vadd.f32 %v702_v62, %v378_v19  ;;  %v1059_v7 = vmul.f32 %v7939_v4, %v5476_v44  ;;  %v1089_v24 = vadd.f32 %v1057_v16, %v733_v1  ;;  %v5587_v23 = vrot.slane %v7940_v11, %v4842_v47  ;;  %v7944_v16 = vld [vmem:[#allocation73_spill] sm:$0xff] }
  0x8f   :  { %7933 = vst [vmem:[#allocation37_spill] sm:$0xff] %v5560_v10  ;;  %7934 = vst [vmem:[#allocation8_spill] sm:$0xff] %v5563_v50  ;;  %v5579_v27 = vrot.slane %v7938_v31, %v4842_v47  ;;  %v7943_v19 = vrot.slane %v5028_v8, %v4842_v47  ;;  %v1060_v1 = vmul.f32 %v7944_v16, %v5476_v44  ;;  %v7946_v11 = vld [vmem:[#allocation13_spill] sm:$0xff] }
  0x90   :  { %v1090_v31 = vadd.f32 %v1058_v36, %v734_v32  ;;  %v5602_v42 = vadd.f32 %v5534_v18, %v1088_v9  ;;  %v1155_v4 = vadd.f32 %v5563_v50, %v5560_v10  ;;  %v382_v49 = vmul.f32 %v7946_v11, %v5385_v59  ;;  %v7949_v36 = vld [vmem:[#allocation74_spill] sm:$0xff] }
  0x91   :  { %v5597_v62 = vrot.slane %v7943_v19, %v4842_v47  ;;  %v706_v34 = vmul.f32 %v7947_v61, %v5458_v33  ;;  %v736_v43 = vadd.f32 %v704_v56, %v380_v25  ;;  %v7948_v19 = vrot.slane %v5028_v8, %v4845_v46  ;;  %v7951_v11 = vld [vmem:[#allocation14_spill] sm:$0xff]  ;;  %v7952_v25 = vld [vmem:[#allocation44_spill] sm:$0xff] }
  0x92   :  { %7945 = vst [vmem:[#allocation38_spill] sm:$0xff] %v5602_v42  ;;  %v1061_v9 = vmul.f32 %v7949_v36, %v5476_v44  ;;  %v1091_v32 = vadd.f32 %v1059_v7, %v735_v51  ;;  %v5619_v16 = vadd.f32 %v5534_v18, %v1089_v24  ;;  %v1156_v50 = vadd.f32 %v1155_v4, %v5602_v42  ;;  %v7954_v51 = vld [vmem:[#allocation75_spill] sm:$0xff] }
  0x93   :  { %v5614_v58 = vrot.slane %v7948_v19, %v4842_v47  ;;  %v383_v10 = vmul.f32 %v7951_v11, %v5385_v59  ;;  %v707_v56 = vmul.f32 %v7952_v25, %v5458_v33  ;;  %v737_v61 = vadd.f32 %v705_v13, %v381_v41  ;;  %v7956_v11 = vld [vmem:[#allocation15_spill] sm:$0xff]  ;;  %v7957_v13 = vld [vmem:[#allocation45_spill] sm:$0xff] }
  0x94   :  { %7950 = vst [vmem:[#allocation69_spill] sm:$0xff] %v5619_v16  ;;  %v7953_v8 = vrot.slane %v5033_v14, %v4842_v47  ;;  %v1062_v7 = vmul.f32 %v7954_v51, %v5476_v44  ;;  %v1092_v24 = vadd.f32 %v1060_v1, %v736_v43  ;;  %v5635_v36 = vadd.f32 %v5534_v18, %v1090_v31  ;;  %v7959_v1 = vld [vmem:[#allocation76_spill] sm:$0xff] }
  0x95   :  { %v1157_v4 = vadd.f32 %v1156_v50, %v5619_v16  ;;  %v384_v42 = vmul.f32 %v7956_v11, %v5385_v59  ;;  %v708_v41 = vmul.f32 %v7957_v13, %v5458_v33  ;;  %v738_v25 = vadd.f32 %v706_v34, %v382_v49  ;;  %v7961_v11 = vld [vmem:[#allocation16_spill] sm:$0xff]  ;;  %v7962_v49 = vld [vmem:[#allocation46_spill] sm:$0xff] }
  0x96   :  { %v5630_v19 = vrot.slane %v7953_v8, %v4842_v47  ;;  %7955 = vst [vmem:[#allocation9_spill] sm:$0xff] %v5635_v36  ;;  %v7958_v8 = vrot.slane %v5033_v14, %v4845_v46  ;;  %v1063_v43 = vmul.f32 %v7959_v1, %v5476_v44  ;;  %v1093_v31 = vadd.f32 %v1061_v9, %v737_v61  ;;  %v7964_v9 = vld [vmem:[#allocation77_spill] sm:$0xff] }
  0x97   :  { %v5651_v51 = vadd.f32 %v5534_v18, %v1091_v32  ;;  %v1158_v50 = vadd.f32 %v1157_v4, %v5635_v36  ;;  %v385_v16 = vmul.f32 %v7961_v11, %v5385_v59  ;;  %v709_v34 = vmul.f32 %v7962_v49, %v5458_v33  ;;  %v7966_v11 = vld [vmem:[#allocation17_spill] sm:$0xff] }
  0x98   :  { %v5646_v35 = vrot.slane %v7958_v8, %v4842_v47  ;;  %v739_v13 = vadd.f32 %v707_v56, %v383_v10  ;;  %v7963_v14 = vrot.slane %v5050_v21, %v4842_v47  ;;  %v1064_v61 = vmul.f32 %v7964_v9, %v5476_v44  ;;  %v7967_v10 = vld [vmem:[#allocation47_spill] sm:$0xff] }
  0x99   :  { %7960 = vst [vmem:[#allocation39_spill] sm:$0xff] %v5651_v51  ;;  %v1094_v32 = vadd.f32 %v1062_v7, %v738_v25  ;;  %v5667_v1 = vadd.f32 %v5534_v18, %v1092_v24  ;;  %v1159_v4 = vadd.f32 %v1158_v50, %v5651_v51  ;;  %v386_v36 = vmul.f32 %v7966_v11, %v5385_v59  ;;  %v7970_v7 = vld [vmem:[#allocation78_spill] sm:$0xff] }
  0x9a   :  { %v5662_v8 = vrot.slane %v7963_v14, %v4842_v47  ;;  %v710_v56 = vmul.f32 %v7967_v10, %v5458_v33  ;;  %v740_v49 = vadd.f32 %v708_v41, %v384_v42  ;;  %v7968_v14 = vrot.slane %v5050_v21, %v4845_v46  ;;  %v7972_v11 = vld [vmem:[#allocation18_spill] sm:$0xff]  ;;  %v7973_v42 = vld [vmem:[#allocation48_spill] sm:$0xff] }
  0x9b   :  { %7965 = vst [vmem:[#allocation70_spill] sm:$0xff] %v5667_v1  ;;  %v1065_v25 = vmul.f32 %v7970_v7, %v5476_v44  ;;  %v1095_v24 = vadd.f32 %v1063_v43, %v739_v13  ;;  %v5683_v9 = vadd.f32 %v5534_v18, %v1093_v31  ;;  %v1160_v50 = vadd.f32 %v1159_v4, %v5667_v1  ;;  %v7976_v43 = vld [vmem:[#allocation79_spill] sm:$0xff] }
  0x9c   :  { %v5678_v52 = vrot.slane %v7968_v14, %v4842_v47  ;;  %v387_v51 = vmul.f32 %v7972_v11, %v5385_v59  ;;  %v711_v41 = vmul.f32 %v7973_v42, %v5458_v33  ;;  %v741_v10 = vadd.f32 %v709_v34, %v385_v16  ;;  %v7978_v11 = vld [vmem:[#allocation19_spill] sm:$0xff]  ;;  %v7979_v16 = vld [vmem:[#allocation20_spill] sm:$0xff]  ;;  %v7980_v42 = vld [vmem:[#allocation49_spill] sm:$0xff] }
  0x9d   :  { %7971 = vst [vmem:[#allocation40_spill] sm:$0xff] %v5683_v9  ;;  %v7974_v21 = vrot.slane %v5055_v48, %v4842_v47  ;;  %v1066_v13 = vmul.f32 %v7976_v43, %v5476_v44  ;;  %v1096_v31 = vadd.f32 %v1064_v61, %v740_v49  ;;  %v5699_v7 = vadd.f32 %v5534_v18, %v1094_v32  ;;  %v7983_v49 = vld [vmem:[#allocation21_spill] sm:$0xff] }
  0x9e   :  { %7969 = vst [vmem:[#allocation10_spill] sm:$0xff] %v5678_v52  ;;  %v1161_v4 = vadd.f32 %v1160_v50, %v5683_v9  ;;  %v388_v1 = vmul.f32 %v7978_v11, %v5385_v59  ;;  %v389_v34 = vmul.f32 %v7979_v16, %v5385_v59  ;;  %v712_v57 = vmul.f32 %v7980_v42, %v5458_v33  ;;  %v7984_v11 = vld [vmem:[#allocation22_spill] sm:$0xff]  ;;  %v8036_v52 = vld [vmem:[#allocation92_spill] sm:$0xff] }
  0x9f   :  { %v5694_v14 = vrot.slane %v7974_v21, %v4842_v47  ;;  %7977 = vst [vmem:[#allocation11_spill] sm:$0xff] %v5699_v7  ;;  %v742_v21 = vadd.f32 %v710_v56, %v386_v36  ;;  %v1097_v43 = vadd.f32 %v1065_v25, %v741_v10  ;;  %v5711_v61 = vadd.f32 %v5534_v18, %v1095_v24  ;;  %v7985_v16 = vld [vmem:[#allocation50_spill] sm:$0xff]  ;;  %v7986_v36 = vld [vmem:[#allocation81_spill] sm:$0xff]  ;;  %v7988_v10 = vld [vmem:[#allocation23_spill] sm:$0xff] }
  0xa0   :  { %v1162_v32 = vadd.f32 %v1161_v4, %v5699_v7  ;;  %v390_v50 = vmul.f32 %v7983_v49, %v5385_v59  ;;  %v391_v9 = vmul.f32 %v7984_v11, %v5385_v59  ;;  %v713_v29 = vmul.f32 %v7985_v16, %v5458_v33  ;;  %v7989_v49 = vld [vmem:[#allocation24_spill] sm:$0xff]  ;;  %v7990_v11 = vld [vmem:[#allocation51_spill] sm:$0xff] }
  0xa1   :  { %7975 = vst [vmem:[#allocation71_spill] sm:$0xff] %v5694_v14  ;;  %7982 = vst [vmem:[#allocation41_spill] sm:$0xff] %v5711_v61  ;;  %v743_v42 = vadd.f32 %v711_v41, %v387_v51  ;;  %v1068_v56 = vmul.f32 %v7986_v36, %v5476_v44  ;;  %v1098_v28 = vadd.f32 %v1066_v13, %v742_v21  ;;  %v7991_v51 = vld [vmem:[#allocation82_spill] sm:$0xff]  ;;  %v7993_v21 = vld [vmem:[#allocation25_spill] sm:$0xff] }
  0xa2   :  { %v5723_v25 = vadd.f32 %v5534_v18, %v1096_v31  ;;  %v1163_v24 = vadd.f32 %v1162_v32, %v5711_v61  ;;  %v392_v4 = vmul.f32 %v7988_v10, %v5385_v59  ;;  %v393_v7 = vmul.f32 %v7989_v49, %v5385_v59  ;;  %v7994_v10 = vld [vmem:[#allocation26_spill] sm:$0xff]  ;;  %v7995_v49 = vld [vmem:[#allocation52_spill] sm:$0xff] }
  0xa3   :  { %v714_v3 = vmul.f32 %v7990_v11, %v5458_v33  ;;  %v744_v16 = vadd.f32 %v712_v57, %v388_v1  ;;  %v1069_v41 = vmul.f32 %v7991_v51, %v5476_v44  ;;  %v1099_v36 = vadd.f32 %v1067_v53, %v743_v42  ;;  %v7996_v57 = vld [vmem:[#allocation83_spill] sm:$0xff] }
  0xa4   :  { %7987 = vst [vmem:[#allocation72_spill] sm:$0xff] %v5723_v25  ;;  %v5735_v13 = vadd.f32 %v5534_v18, %v1097_v43  ;;  %v1164_v31 = vadd.f32 %v1163_v24, %v5723_v25  ;;  %v394_v32 = vmul.f32 %v7993_v21, %v5385_v59  ;;  %v395_v61 = vmul.f32 %v7994_v10, %v5385_v59  ;;  %v7998_v42 = vld [vmem:[#allocation27_spill] sm:$0xff]  ;;  %v7999_v21 = vld [vmem:[#allocation28_spill] sm:$0xff]  ;;  %v8000_v10 = vld [vmem:[#allocation53_spill] sm:$0xff] }
  0xa5   :  { %v715_v55 = vmul.f32 %v7995_v49, %v5458_v33  ;;  %v745_v11 = vadd.f32 %v713_v29, %v389_v34  ;;  %v1070_v1 = vmul.f32 %v7996_v57, %v5476_v44  ;;  %v1100_v51 = vadd.f32 %v1068_v56, %v744_v16  ;;  %v8001_v29 = vld [vmem:[#allocation84_spill] sm:$0xff]  ;;  %v8003_v16 = vld [vmem:[#allocation29_spill] sm:$0xff] }
  0xa6   :  { %7992 = vst [vmem:[#allocation12_spill] sm:$0xff] %v5735_v13  ;;  %v5747_v53 = vadd.f32 %v5534_v18, %v1098_v28  ;;  %v1165_v43 = vadd.f32 %v1164_v31, %v5735_v13  ;;  %v396_v24 = vmul.f32 %v7998_v42, %v5385_v59  ;;  %v397_v25 = vmul.f32 %v7999_v21, %v5385_v59  ;;  %v8004_v42 = vld [vmem:[#allocation30_spill] sm:$0xff] }
  0xa7   :  { %v716_v15 = vmul.f32 %v8000_v10, %v5458_v33  ;;  %v746_v49 = vadd.f32 %v714_v3, %v390_v50  ;;  %v1071_v34 = vmul.f32 %v8001_v29, %v5476_v44  ;;  %v1101_v57 = vadd.f32 %v1069_v41, %v745_v11  ;;  %v8005_v21 = vld [vmem:[#allocation54_spill] sm:$0xff]  ;;  %v8006_v3 = vld [vmem:[#allocation85_spill] sm:$0xff]  ;;  %v8008_v11 = vld [vmem:[#allocation31_spill] sm:$0xff] }
  0xa8   :  { %7997 = vst [vmem:[#allocation42_spill] sm:$0xff] %v5747_v53  ;;  %v5759_v56 = vadd.f32 %v5534_v18, %v1099_v36  ;;  %v1166_v28 = vadd.f32 %v1165_v43, %v5747_v53  ;;  %v398_v31 = vmul.f32 %v8003_v16, %v5385_v59  ;;  %v399_v13 = vmul.f32 %v8004_v42, %v5385_v59  ;;  %v8009_v16 = vld [vmem:[#allocation32_spill] sm:$0xff]  ;;  %v8010_v42 = vld [vmem:[#allocation55_spill] sm:$0xff] }
  0xa9   :  { %v717_v38 = vmul.f32 %v8005_v21, %v5458_v33  ;;  %v747_v10 = vadd.f32 %v715_v55, %v391_v9  ;;  %v1072_v50 = vmul.f32 %v8006_v3, %v5476_v44  ;;  %v1102_v29 = vadd.f32 %v1070_v1, %v746_v49  ;;  %v8011_v55 = vld [vmem:[#allocation86_spill] sm:$0xff]  ;;  %v8013_v49 = vld [vmem:[#allocation33_spill] sm:$0xff] }
  0xaa   :  { %8002 = vst [vmem:[#allocation73_spill] sm:$0xff] %v5759_v56  ;;  %v5771_v41 = vadd.f32 %v5534_v18, %v1100_v51  ;;  %v1167_v36 = vadd.f32 %v1166_v28, %v5759_v56  ;;  %v400_v43 = vmul.f32 %v8008_v11, %v5385_v59  ;;  %v401_v53 = vmul.f32 %v8009_v16, %v5385_v59  ;;  %v8014_v11 = vld [vmem:[#allocation34_spill] sm:$0xff]  ;;  %v8015_v16 = vld [vmem:[#allocation56_spill] sm:$0xff] }
  0xab   :  { %v718_v12 = vmul.f32 %v8010_v42, %v5458_v33  ;;  %v748_v21 = vadd.f32 %v716_v15, %v392_v4  ;;  %v1073_v9 = vmul.f32 %v8011_v55, %v5476_v44  ;;  %v1103_v3 = vadd.f32 %v1071_v34, %v747_v10  ;;  %v8016_v15 = vld [vmem:[#allocation87_spill] sm:$0xff] }
  0xac   :  { %8007 = vst [vmem:[#allocation13_spill] sm:$0xff] %v5771_v41  ;;  %v5783_v1 = vadd.f32 %v5534_v18, %v1101_v57  ;;  %v1168_v51 = vadd.f32 %v1167_v36, %v5771_v41  ;;  %v402_v28 = vmul.f32 %v8013_v49, %v5385_v59  ;;  %v403_v56 = vmul.f32 %v8014_v11, %v5385_v59  ;;  %v8018_v10 = vld [vmem:[#allocation35_spill] sm:$0xff]  ;;  %v8019_v49 = vld [vmem:[#allocation36_spill] sm:$0xff]  ;;  %v8020_v11 = vld [vmem:[#allocation57_spill] sm:$0xff] }
  0xad   :  { %v719_v40 = vmul.f32 %v8015_v16, %v5458_v33  ;;  %v749_v42 = vadd.f32 %v717_v38, %v393_v7  ;;  %v1074_v4 = vmul.f32 %v8016_v15, %v5476_v44  ;;  %v1104_v55 = vadd.f32 %v1072_v50, %v748_v21  ;;  %v8021_v38 = vld [vmem:[#allocation88_spill] sm:$0xff] }
  0xae   :  { %8012 = vst [vmem:[#allocation43_spill] sm:$0xff] %v5783_v1  ;;  %v5795_v34 = vadd.f32 %v5534_v18, %v1102_v29  ;;  %v1169_v57 = vadd.f32 %v1168_v51, %v5783_v1  ;;  %v404_v36 = vmul.f32 %v8018_v10, %v5385_v59  ;;  %v405_v41 = vmul.f32 %v8019_v49, %v5385_v59  ;;  %v8023_v21 = vld [vmem:[#allocation60_spill] sm:$0xff]  ;;  %v8024_v10 = vld [vmem:[#allocation61_spill] sm:$0xff]  ;;  %v8025_v49 = vld [vmem:[#allocation62_spill] sm:$0xff] }
  0xaf   :  { %v720_v14 = vmul.f32 %v8020_v11, %v5458_v33  ;;  %v750_v16 = vadd.f32 %v718_v12, %v394_v32  ;;  %v1075_v7 = vmul.f32 %v8021_v38, %v5476_v44  ;;  %v1105_v15 = vadd.f32 %v1073_v9, %v749_v42  ;;  %v8026_v12 = vld [vmem:[#allocation89_spill] sm:$0xff]  ;;  %v8028_v42 = vld [vmem:[#allocation63_spill] sm:$0xff] }
  0xb0   :  { %8017 = vst [vmem:[#allocation74_spill] sm:$0xff] %v5795_v34  ;;  %v5807_v50 = vadd.f32 %v5534_v18, %v1103_v3  ;;  %v1170_v29 = vadd.f32 %v1169_v57, %v5795_v34  ;;  %v721_v51 = vmul.f32 %v8023_v21, %v5458_v33  ;;  %v722_v1 = vmul.f32 %v8024_v10, %v5458_v33  ;;  %v8029_v21 = vld [vmem:[#allocation64_spill] sm:$0xff]  ;;  %v8030_v10 = vld [vmem:[#allocation65_spill] sm:$0xff] }
  0xb1   :  { %v723_v59 = vmul.f32 %v8025_v49, %v5458_v33  ;;  %v751_v11 = vadd.f32 %v719_v40, %v395_v61  ;;  %v1076_v32 = vmul.f32 %v8026_v12, %v5476_v44  ;;  %v1106_v38 = vadd.f32 %v1074_v4, %v750_v16  ;;  %v8031_v40 = vld [vmem:[#allocation90_spill] sm:$0xff] }
  0xb2   :  { %8022 = vst [vmem:[#allocation14_spill] sm:$0xff] %v5807_v50  ;;  %v5819_v9 = vadd.f32 %v5534_v18, %v1104_v55  ;;  %v1171_v3 = vadd.f32 %v1170_v29, %v5807_v50  ;;  %v724_v57 = vmul.f32 %v8028_v42, %v5458_v33  ;;  %v725_v34 = vmul.f32 %v8029_v21, %v5458_v33  ;;  %v8032_v16 = vld [vmem:[#allocation66_spill] sm:$0xff]  ;;  %v8033_v42 = vld [vmem:[#allocation67_spill] sm:$0xff]  ;;  %v8034_v21 = vld [vmem:[#allocation68_spill] sm:$0xff] }
  0xb3   :  { %v726_v17 = vmul.f32 %v8030_v10, %v5458_v33  ;;  %v752_v49 = vadd.f32 %v720_v14, %v396_v24  ;;  %v1077_v61 = vmul.f32 %v8031_v40, %v5476_v44  ;;  %v1107_v12 = vadd.f32 %v1075_v7, %v751_v11  ;;  %v8035_v14 = vld [vmem:[#allocation91_spill] sm:$0xff] }
  0xb4   :  { %8027 = vst [vmem:[#allocation44_spill] sm:$0xff] %v5819_v9  ;;  %v5831_v4 = vadd.f32 %v5534_v18, %v1105_v15  ;;  %v1172_v55 = vadd.f32 %v1171_v3, %v5819_v9  ;;  %v727_v29 = vmul.f32 %v8032_v16, %v5458_v33  ;;  %v728_v50 = vmul.f32 %v8033_v42, %v5458_v33 }
  0xb5   :  { %v729_v2 = vmul.f32 %v8034_v21, %v5458_v33  ;;  %v753_v10 = vadd.f32 %v721_v51, %v397_v25  ;;  %v1078_v24 = vmul.f32 %v8035_v14, %v5476_v44  ;;  %v1108_v40 = vadd.f32 %v1076_v32, %v752_v49  ;;  %v8037_v32 = vld [vmem:[#allocation93_spill] sm:$0xff]  ;;  %v8038_v49 = vld [vmem:[#allocation94_spill] sm:$0xff]  ;;  %v8118_v33 = vld [vmem:[#allocation160_spill] sm:$0xff] }
  0xb6   :  { %v5843_v7 = vadd.f32 %v5534_v18, %v1106_v38  ;;  %v1173_v15 = vadd.f32 %v1172_v55, %v5831_v4  ;;  %v754_v11 = vadd.f32 %v722_v1, %v398_v31  ;;  %v755_v3 = vadd.f32 %v723_v59, %v399_v13  ;;  %v8039_v59 = vld [vmem:[#allocation95_spill] sm:$0xff] }
  0xb7   :  { %v756_v9 = vadd.f32 %v724_v57, %v400_v43  ;;  %v757_v16 = vadd.f32 %v725_v34, %v401_v53  ;;  %v1079_v42 = vmul.f32 %v8036_v52, %v5476_v44  ;;  %v1109_v46 = vadd.f32 %v1077_v61, %v753_v10  ;;  %v8040_v53 = vld [vmem:[#allocation96_spill] sm:$0xff]  ;;  %v8041_v57 = vld [vmem:[#allocation97_spill] sm:$0xff] }
  0xb8   :  { %v5849_v21 = vadd.f32 %v5534_v18, %v1107_v12  ;;  %v1174_v25 = vadd.f32 %v1173_v15, %v5843_v7  ;;  %v758_v51 = vadd.f32 %v726_v17, %v402_v28  ;;  %v1080_v38 = vmul.f32 %v8037_v32, %v5476_v44  ;;  %v5866_v12 = vpop.permute.xlu0 %2311  ;;  %v8043_v10 = vld [vmem:[#allocation100_spill] sm:$0xff] }
  0xb9   :  { %v1081_v55 = vmul.f32 %v8038_v49, %v5476_v44  ;;  %v1082_v13 = vmul.f32 %v8039_v59, %v5476_v44  ;;  %v1083_v31 = vmul.f32 %v8040_v53, %v5476_v44  ;;  %v1110_v52 = vadd.f32 %v1078_v24, %v754_v11  ;;  %8042 = vst [vmem:[#allocation75_spill] sm:$0xff] %v5866_v12 }
  0xba   :  { %v5861_v43 = vadd.f32 %v5534_v18, %v1108_v40  ;;  %v1175_v1 = vadd.f32 %v1174_v25, %v5849_v21  ;;  %v759_v34 = vadd.f32 %v727_v29, %v403_v56  ;;  %v760_v17 = vadd.f32 %v728_v50, %v404_v36  ;;  %v8046_v25 = vld [vmem:[#allocation110_spill] sm:$0xff] }
  0xbb   :  { %v761_v28 = vadd.f32 %v729_v2, %v405_v41  ;;  %v1084_v61 = vmul.f32 %v8041_v57, %v5476_v44  ;;  %v1085_v14 = vmul.f32 %v8043_v10, %v5476_v44  ;;  %v1111_v15 = vadd.f32 %v1079_v42, %v755_v3  ;;  %v8044_v3 = vld [vmem:[#allocation141_spill] sm:$0xff]  ;;  %v8113_v44 = vld [vmem:[#allocation159_spill] sm:$0xff] }
  0xbc   :  { %v5871_v32 = vadd.f32 %v5534_v18, %v1109_v46  ;;  %v1176_v24 = vadd.f32 %v1175_v1, %v5861_v43  ;;  %v1112_v40 = vadd.f32 %v1080_v38, %v756_v9  ;;  %v1113_v11 = vadd.f32 %v1081_v55, %v757_v16  ;;  %v8045_v46 = vld [vmem:[#allocation109_spill] sm:$0xff]  ;;  %v8048_v1 = vld [vmem:[#allocation111_spill] sm:$0xff] }
  0xbd   :  { %v2246_v56 = vmul.f32 %v5353_v39, %v5411_v26  ;;  %v2247_v2 = vmul.f32 %v5356_v6, %v5411_v26  ;;  %v1114_v41 = vadd.f32 %v1082_v13, %v758_v51  ;;  %v1115_v36 = vadd.f32 %v1083_v31, %v759_v34  ;;  %v5899_v31 = vpop.permute.xlu1 %2668 }
  0xbe   :  { %v5879_v50 = vadd.f32 %v5534_v18, %v1110_v52  ;;  %v1177_v29 = vadd.f32 %v1176_v24, %v5871_v32  ;;  %v1922_v42 = vmul.f32 %v8045_v46, %v8044_v3  ;;  %v1923_v9 = vmul.f32 %v8046_v25, %v8044_v3  ;;  %8047 = vst [vmem:[#allocation15_spill] sm:$0xff] %v5899_v31 }
  0xbf   :  { %v2602_v16 = vmul.f32 %v5555_v37, %v5866_v12  ;;  %v2603_v39 = vmul.f32 %v5573_v22, %v5866_v12  ;;  %v1116_v6 = vadd.f32 %v1084_v61, %v760_v17  ;;  %v1117_v51 = vadd.f32 %v1085_v14, %v761_v28  ;;  %v8049_v14 = vld [vmem:[#allocation112_spill] sm:$0xff] }
  0xc0   :  { %v5891_v38 = vadd.f32 %v5534_v18, %v1111_v15  ;;  %v1178_v49 = vadd.f32 %v1177_v29, %v5879_v50  ;;  %v5895_v55 = vadd.f32 %v5534_v18, %v1112_v40  ;;  %v2248_v59 = vmul.f32 %v5359_v60, %v5411_v26 }
  0xc1   :  { %v2278_v13 = vadd.f32 %v2246_v56, %v1922_v42  ;;  %v2279_v53 = vadd.f32 %v2247_v2, %v1923_v9  ;;  %v5902_v37 = vadd.f32 %v5534_v18, %v1113_v11  ;;  %v5905_v22 = vadd.f32 %v5534_v18, %v1114_v41  ;;  %v8050_v41 = vld [vmem:[#allocation113_spill] sm:$0xff]  ;;  %v8051_v9 = vld [vmem:[#allocation114_spill] sm:$0xff] }
  0xc2   :  { %v1179_v52 = vadd.f32 %v1178_v49, %v5891_v38  ;;  %v1924_v34 = vmul.f32 %v8048_v1, %v8044_v3  ;;  %v2249_v17 = vmul.f32 %v5362_v5, %v5411_v26  ;;  %v2604_v60 = vmul.f32 %v5579_v27, %v5866_v12 }
  0xc3   :  { %v2634_v28 = vadd.f32 %v2602_v16, %v2278_v13  ;;  %v2635_v57 = vadd.f32 %v2603_v39, %v2279_v53  ;;  %v5915_v61 = vadd.f32 %v5534_v18, %v1115_v36  ;;  %v1925_v15 = vmul.f32 %v8049_v14, %v8044_v3  ;;  %v8052_v13 = vld [vmem:[#allocation115_spill] sm:$0xff] }
  0xc4   :  { %v1180_v10 = vadd.f32 %v1179_v52, %v5895_v55  ;;  %v2250_v24 = vmul.f32 %v5365_v63, %v5411_v26  ;;  %v2280_v40 = vadd.f32 %v2248_v59, %v1924_v34  ;;  %v2605_v5 = vmul.f32 %v5587_v23, %v5866_v12 }
  0xc5   :  { %v5925_v11 = vadd.f32 %v5899_v31, %v2634_v28  ;;  %v5928_v27 = vadd.f32 %v5899_v31, %v2635_v57  ;;  %v5931_v56 = vadd.f32 %v5534_v18, %v1116_v6  ;;  %v1926_v36 = vmul.f32 %v8050_v41, %v8044_v3  ;;  %v8053_v28 = vld [vmem:[#allocation116_spill] sm:$0xff] }
  0xc6   :  { %v1181_v2 = vadd.f32 %v1180_v10, %v5902_v37  ;;  %v2251_v63 = vmul.f32 %v5368_v0, %v5411_v26  ;;  %v5939_v29 = vadd.f32 %v5534_v18, %v1117_v51  ;;  %v2281_v23 = vadd.f32 %v2249_v17, %v1925_v15  ;;  %v8109_v18 = vld [vmem:[#allocation158_spill] sm:$0xff] }
  0xc7   :  { %v2606_v46 = vmul.f32 %v5597_v62, %v5866_v12  ;;  %v2636_v42 = vadd.f32 %v2604_v60, %v2280_v40  ;;  %v1927_v16 = vmul.f32 %v8051_v9, %v8044_v3  ;;  %v2252_v39 = vmul.f32 %v5371_v20, %v5411_v26 }
  0xc8   :  { %v1182_v25 = vadd.f32 %v1181_v2, %v5905_v22  ;;  %v2282_v6 = vadd.f32 %v2250_v24, %v1926_v36  ;;  %v2607_v0 = vmul.f32 %v5614_v58, %v5866_v12  ;;  %v2637_v49 = vadd.f32 %v2605_v5, %v2281_v23  ;;  %v8054_v5 = vld [vmem:[#allocation117_spill] sm:$0xff] }
  0xc9   :  { %v5951_v51 = vadd.f32 %v5899_v31, %v2636_v42  ;;  %v2703_v62 = vadd.f32 %v5928_v27, %v5925_v11  ;;  %v1928_v53 = vmul.f32 %v8052_v13, %v8044_v3  ;;  %v2253_v52 = vmul.f32 %v5374_v30, %v5411_v26  ;;  %v8060_v13 = vld [vmem:[#allocation119_spill] sm:$0xff] }
  0xca   :  { %v1183_v59 = vadd.f32 %v1182_v25, %v5915_v61  ;;  %v2283_v20 = vadd.f32 %v2251_v63, %v1927_v16  ;;  %v2608_v1 = vmul.f32 %v5630_v19, %v5866_v12  ;;  %v2638_v58 = vadd.f32 %v2606_v46, %v2282_v6  ;;  %v8055_v46 = vld [vmem:[#allocation118_spill] sm:$0xff] }
  0xcb   :  { %v5963_v34 = vadd.f32 %v5899_v31, %v2637_v49  ;;  %v2704_v17 = vadd.f32 %v2703_v62, %v5951_v51  ;;  %v1929_v57 = vmul.f32 %v8053_v28, %v8044_v3  ;;  %v2254_v10 = vmul.f32 %v5377_v54, %v5411_v26  ;;  %v8056_v25 = vld [vmem:[#allocation142_spill] sm:$0xff] }
  0xcc   :  { %v1184_v60 = vadd.f32 %v1183_v59, %v5931_v56  ;;  %v2284_v14 = vadd.f32 %v2252_v39, %v1928_v53  ;;  %v2609_v30 = vmul.f32 %v5646_v35, %v5866_v12  ;;  %v2639_v15 = vadd.f32 %v2607_v0, %v2283_v20 }
  0xcd   :  { %v5974_v19 = vadd.f32 %v5899_v31, %v2638_v58  ;;  %v2705_v24 = vadd.f32 %v2704_v17, %v5963_v34  ;;  %v1930_v2 = vmul.f32 %v8054_v5, %v8044_v3  ;;  %v2255_v41 = vmul.f32 %v5380_v45, %v5411_v26  ;;  %v8057_v45 = vld [vmem:[#allocation59_spill] sm:$0xff]  ;;  %v8062_v58 = vld [vmem:[#allocation98_spill] sm:$0xff] }
  0xce   :  { %v1185_v40 = vadd.f32 %v1184_v60, %v5939_v29  ;;  %v2285_v36 = vadd.f32 %v2253_v52, %v1929_v57  ;;  %v2610_v54 = vmul.f32 %v5662_v8, %v5866_v12  ;;  %v2640_v63 = vadd.f32 %v2608_v1, %v2284_v14  ;;  %v8059_v8 = vld [vmem:[#allocation10_spill] sm:$0xff]  ;;  %v8061_v52 = vld [vmem:[#allocation144_spill] sm:$0xff]  ;;  %v8064_v60 = vld [vmem:[#allocation71_spill] sm:$0xff] }
  0xcf   :  { %v5985_v35 = vadd.f32 %v5899_v31, %v2639_v15  ;;  %v2706_v23 = vadd.f32 %v2705_v24, %v5974_v19  ;;  %v1931_v42 = vmul.f32 %v8055_v46, %v8044_v3  ;;  %v2256_v9 = vmul.f32 %v8056_v25, %v5411_v26  ;;  %v8066_v24 = vld [vmem:[#allocation145_spill] sm:$0xff]  ;;  %v8069_v25 = vld [vmem:[#allocation146_spill] sm:$0xff] }
  0xd0   :  { %1186 = vadd.xlane.f32.xlu0 %v1185_v40  ;;  %v2286_v16 = vadd.f32 %v2254_v10, %v1930_v2  ;;  %v8058_v39 = vrot.slane %v5055_v48, %v8057_v45  ;;  %v2611_v0 = vmul.f32 %v8059_v8, %v5866_v12  ;;  %v2641_v49 = vadd.f32 %v2609_v30, %v2285_v36  ;;  %v8065_v30 = vld [vmem:[#allocation120_spill] sm:$0xff]  ;;  %v8068_v46 = vld [vmem:[#allocation121_spill] sm:$0xff] }
  0xd1   :  { %v5999_v62 = vadd.f32 %v5899_v31, %v2640_v63  ;;  %v2707_v59 = vadd.f32 %v2706_v23, %v5985_v35  ;;  %v1932_v53 = vmul.f32 %v8060_v13, %v8044_v3  ;;  %v2257_v20 = vmul.f32 %v8061_v52, %v5411_v26 }
  0xd2   :  { %v2521_v6 = vrot.slane %v8058_v39, %v4842_v47  ;;  %v2287_v1 = vadd.f32 %v2255_v41, %v1931_v42  ;;  %v8063_v48 = vrot.slane %v8062_v58, %v4842_v47  ;;  %v2612_v28 = vmul.f32 %v8064_v60, %v5866_v12  ;;  %v8070_v39 = vld [vmem:[#allocation99_spill] sm:$0xff] }
  0xd3   :  { %v2642_v57 = vadd.f32 %v2610_v54, %v2286_v16  ;;  %v6013_v10 = vadd.f32 %v5899_v31, %v2641_v49  ;;  %v2708_v14 = vadd.f32 %v2707_v59, %v5999_v62  ;;  %v1933_v15 = vmul.f32 %v8065_v30, %v8044_v3  ;;  %v8075_v30 = vld [vmem:[#allocation123_spill] sm:$0xff] }
  0xd4   :  { %v2525_v17 = vrot.slane %v8063_v48, %v4842_v47  ;;  %v2258_v40 = vmul.f32 %v8066_v24, %v5411_v26  ;;  %v2288_v5 = vadd.f32 %v2256_v9, %v1932_v53  ;;  %v8067_v2 = vrot.slane %v8062_v58, %v8057_v45  ;;  %v8072_v53 = vld [vmem:[#allocation122_spill] sm:$0xff]  ;;  %v8076_v24 = vld [vmem:[#allocation148_spill] sm:$0xff] }
  0xd5   :  { %v2613_v36 = vmul.f32 %v2521_v6, %v5866_v12  ;;  %v2643_v54 = vadd.f32 %v2611_v0, %v2287_v1  ;;  %v6026_v63 = vadd.f32 %v5899_v31, %v2642_v57  ;;  %v2709_v23 = vadd.f32 %v2708_v14, %v6013_v10  ;;  %v8073_v1 = vld [vmem:[#allocation147_spill] sm:$0xff] }
  0xd6   :  { %v2529_v41 = vrot.slane %v8067_v2, %v4842_v47  ;;  %v1934_v42 = vmul.f32 %v8068_v46, %v8044_v3  ;;  %v2259_v16 = vmul.f32 %v8069_v25, %v5411_v26  ;;  %v2289_v9 = vadd.f32 %v2257_v20, %v1933_v15  ;;  %v8077_v2 = vld [vmem:[#allocation101_spill] sm:$0xff]  ;;  %v8079_v25 = vld [vmem:[#allocation124_spill] sm:$0xff] }
  0xd7   :  { %v8071_v8 = vrot.slane %v8070_v39, %v4842_v47  ;;  %v2614_v6 = vmul.f32 %v2525_v17, %v5866_v12  ;;  %v2644_v0 = vadd.f32 %v2612_v28, %v2288_v5  ;;  %v6039_v59 = vadd.f32 %v5899_v31, %v2643_v54 }
  0xd8   :  { %v2710_v13 = vadd.f32 %v2709_v23, %v6026_v63  ;;  %v1935_v52 = vmul.f32 %v8072_v53, %v8044_v3  ;;  %v2260_v58 = vmul.f32 %v8073_v1, %v5411_v26  ;;  %v2290_v20 = vadd.f32 %v2258_v40, %v1934_v42  ;;  %v8082_v1 = vld [vmem:[#allocation125_spill] sm:$0xff] }
  0xd9   :  { %v2533_v49 = vrot.slane %v8071_v8, %v4842_v47  ;;  %v8074_v48 = vrot.slane %v8070_v39, %v8057_v45  ;;  %v2615_v17 = vmul.f32 %v2529_v41, %v5866_v12  ;;  %v2645_v28 = vadd.f32 %v2613_v36, %v2289_v9  ;;  %v8080_v39 = vld [vmem:[#allocation149_spill] sm:$0xff] }
  0xda   :  { %v6052_v57 = vadd.f32 %v5899_v31, %v2644_v0  ;;  %v2711_v14 = vadd.f32 %v2710_v13, %v6039_v59  ;;  %v1936_v15 = vmul.f32 %v8075_v30, %v8044_v3  ;;  %v2261_v5 = vmul.f32 %v8076_v24, %v5411_v26 }
  0xdb   :  { %v2537_v60 = vrot.slane %v8074_v48, %v4842_v47  ;;  %v2291_v40 = vadd.f32 %v2259_v16, %v1935_v52  ;;  %v8078_v54 = vrot.slane %v8077_v2, %v4842_v47  ;;  %v2616_v41 = vmul.f32 %v2533_v49, %v5866_v12  ;;  %v8083_v48 = vld [vmem:[#allocation150_spill] sm:$0xff] }
  0xdc   :  { %v2646_v36 = vadd.f32 %v2614_v6, %v2290_v20  ;;  %v6065_v46 = vadd.f32 %v5899_v31, %v2645_v28  ;;  %v2712_v42 = vadd.f32 %v2711_v14, %v6052_v57  ;;  %v1937_v9 = vmul.f32 %v8079_v25, %v8044_v3  ;;  %v8084_v14 = vld [vmem:[#allocation102_spill] sm:$0xff] }
  0xdd   :  { %v2541_v23 = vrot.slane %v8078_v54, %v4842_v47  ;;  %v2262_v8 = vmul.f32 %v8080_v39, %v5411_v26  ;;  %v2292_v16 = vadd.f32 %v2260_v58, %v1936_v15  ;;  %v8081_v0 = vrot.slane %v8077_v2, %v8057_v45  ;;  %v8086_v2 = vld [vmem:[#allocation126_spill] sm:$0xff] }
  0xde   :  { %v2617_v49 = vmul.f32 %v2537_v60, %v5866_v12  ;;  %v2647_v6 = vadd.f32 %v2615_v17, %v2291_v40  ;;  %v6078_v53 = vadd.f32 %v5899_v31, %v2646_v36  ;;  %v2713_v52 = vadd.f32 %v2712_v42, %v6065_v46  ;;  %v8087_v36 = vld [vmem:[#allocation151_spill] sm:$0xff] }
  0xdf   :  { %v2545_v13 = vrot.slane %v8081_v0, %v4842_v47  ;;  %v1938_v20 = vmul.f32 %v8082_v1, %v8044_v3  ;;  %v2263_v28 = vmul.f32 %v8083_v48, %v5411_v26  ;;  %v2293_v58 = vadd.f32 %v2261_v5, %v1937_v9  ;;  %v8089_v0 = vld [vmem:[#allocation127_spill] sm:$0xff] }
  0xe0   :  { %v8085_v30 = vrot.slane %v8084_v14, %v4842_v47  ;;  %v2618_v60 = vmul.f32 %v2541_v23, %v5866_v12  ;;  %v2648_v17 = vadd.f32 %v2616_v41, %v2292_v16  ;;  %v6091_v24 = vadd.f32 %v5899_v31, %v2647_v6 }
  0xe1   :  { %v2714_v40 = vadd.f32 %v2713_v52, %v6078_v53  ;;  %v1939_v54 = vmul.f32 %v8086_v2, %v8044_v3  ;;  %v2264_v42 = vmul.f32 %v8087_v36, %v5411_v26  ;;  %v2294_v5 = vadd.f32 %v2262_v8, %v1938_v20  ;;  %v8090_v52 = vld [vmem:[#allocation153_spill] sm:$0xff]  ;;  %v8091_v20 = vld [vmem:[#allocation103_spill] sm:$0xff]  ;;  %v8094_v2 = vld [vmem:[#allocation154_spill] sm:$0xff] }
  0xe2   :  { %v2549_v15 = vrot.slane %v8085_v30, %v4842_v47  ;;  %v8088_v25 = vrot.slane %v8084_v14, %v8057_v45  ;;  %v2619_v23 = vmul.f32 %v2545_v13, %v5866_v12  ;;  %v2649_v41 = vadd.f32 %v2617_v49, %v2293_v58 }
  0xe3   :  { %v6104_v39 = vadd.f32 %v5899_v31, %v2648_v17  ;;  %v2715_v16 = vadd.f32 %v2714_v40, %v6091_v24  ;;  %v1940_v6 = vmul.f32 %v8089_v0, %v8044_v3  ;;  %v2265_v1 = vmul.f32 %v8090_v52, %v5411_v26  ;;  %v8093_v17 = vld [vmem:[#allocation128_spill] sm:$0xff]  ;;  %v8097_v52 = vld [vmem:[#allocation155_spill] sm:$0xff] }
  0xe4   :  { %v2553_v9 = vrot.slane %v8088_v25, %v4842_v47  ;;  %v2295_v8 = vadd.f32 %v2263_v28, %v1939_v54  ;;  %v8092_v48 = vrot.slane %v8091_v20, %v4842_v47  ;;  %v2620_v13 = vmul.f32 %v2549_v15, %v5866_v12 }
  0xe5   :  { %v2650_v49 = vadd.f32 %v2618_v60, %v2294_v5  ;;  %v6117_v58 = vadd.f32 %v5899_v31, %v2649_v41  ;;  %v2716_v30 = vadd.f32 %v2715_v16, %v6104_v39  ;;  %v1941_v40 = vmul.f32 %v8093_v17, %v8044_v3  ;;  %v8096_v16 = vld [vmem:[#allocation129_spill] sm:$0xff] }
  0xe6   :  { %v2557_v14 = vrot.slane %v8092_v48, %v4842_v47  ;;  %v2266_v36 = vmul.f32 %v8094_v2, %v5411_v26  ;;  %v2296_v28 = vadd.f32 %v2264_v42, %v1940_v6  ;;  %v8095_v54 = vrot.slane %v8091_v20, %v8057_v45  ;;  %v8098_v6 = vld [vmem:[#allocation104_spill] sm:$0xff] }
  0xe7   :  { %v2621_v15 = vmul.f32 %v2553_v9, %v5866_v12  ;;  %v2651_v60 = vadd.f32 %v2619_v23, %v2295_v8  ;;  %v6130_v5 = vadd.f32 %v5899_v31, %v2650_v49  ;;  %v2717_v41 = vadd.f32 %v2716_v30, %v6117_v58  ;;  %v8100_v30 = vld [vmem:[#allocation130_spill] sm:$0xff] }
  0xe8   :  { %v2561_v25 = vrot.slane %v8095_v54, %v4842_v47  ;;  %v1942_v0 = vmul.f32 %v8096_v16, %v8044_v3  ;;  %v2267_v48 = vmul.f32 %v8097_v52, %v5411_v26  ;;  %v2297_v42 = vadd.f32 %v2265_v1, %v1941_v40  ;;  %v8101_v54 = vld [vmem:[#allocation156_spill] sm:$0xff] }
  0xe9   :  { %v8099_v20 = vrot.slane %v8098_v6, %v4842_v47  ;;  %v2622_v9 = vmul.f32 %v2557_v14, %v5866_v12  ;;  %v2652_v23 = vadd.f32 %v2620_v13, %v2296_v28  ;;  %v6143_v8 = vadd.f32 %v5899_v31, %v2651_v60 }
  0xea   :  { %v2718_v49 = vadd.f32 %v2717_v41, %v6130_v5  ;;  %v1943_v2 = vmul.f32 %v8100_v30, %v8044_v3  ;;  %v2268_v16 = vmul.f32 %v8101_v54, %v5411_v26  ;;  %v2298_v1 = vadd.f32 %v2266_v36, %v1942_v0  ;;  %v8103_v41 = vld [vmem:[#allocation131_spill] sm:$0xff]  ;;  %v8104_v30 = vld [vmem:[#allocation157_spill] sm:$0xff] }
  0xeb   :  { %v2565_v17 = vrot.slane %v8099_v20, %v4842_v47  ;;  %v8102_v40 = vrot.slane %v8098_v6, %v8057_v45  ;;  %v2623_v14 = vmul.f32 %v2561_v25, %v5866_v12  ;;  %v2653_v13 = vadd.f32 %v2621_v15, %v2297_v42  ;;  %v8105_v0 = vld [vmem:[#allocation105_spill] sm:$0xff] }
  0xec   :  { %v6156_v28 = vadd.f32 %v5899_v31, %v2652_v23  ;;  %v2719_v60 = vadd.f32 %v2718_v49, %v6143_v8  ;;  %v1944_v20 = vmul.f32 %v8103_v41, %v8044_v3  ;;  %v2269_v54 = vmul.f32 %v8104_v30, %v5411_v26  ;;  %v8108_v49 = vld [vmem:[#allocation132_spill] sm:$0xff] }
  0xed   :  { %v2569_v52 = vrot.slane %v8102_v40, %v4842_v47  ;;  %v2299_v36 = vadd.f32 %v2267_v48, %v1943_v2  ;;  %v8106_v6 = vrot.slane %v8105_v0, %v4842_v47  ;;  %v2624_v25 = vmul.f32 %v2565_v17, %v5866_v12 }
  0xee   :  { %v2654_v15 = vadd.f32 %v2622_v9, %v2298_v1  ;;  %v6169_v42 = vadd.f32 %v5899_v31, %v2653_v13  ;;  %v2720_v23 = vadd.f32 %v2719_v60, %v6156_v28  ;;  %v1945_v41 = vmul.f32 %v8108_v49, %v8044_v3  ;;  %v8112_v60 = vld [vmem:[#allocation133_spill] sm:$0xff] }
  0xef   :  { %v2573_v40 = vrot.slane %v8106_v6, %v4842_v47  ;;  %v2270_v30 = vmul.f32 %v8109_v18, %v5411_v26  ;;  %v2300_v48 = vadd.f32 %v2268_v16, %v1944_v20  ;;  %v8110_v2 = vrot.slane %v8105_v0, %v8057_v45  ;;  %v8114_v20 = vld [vmem:[#allocation106_spill] sm:$0xff] }
  0xf0   :  { %8107 = vst [vmem:[#allocation45_spill] sm:$0xff] %v6169_v42  ;;  %v2625_v17 = vmul.f32 %v2569_v52, %v5866_v12  ;;  %v2655_v9 = vadd.f32 %v2623_v14, %v2299_v36  ;;  %v6182_v1 = vadd.f32 %v5899_v31, %v2654_v15  ;;  %v2721_v13 = vadd.f32 %v2720_v23, %v6169_v42  ;;  %v8117_v23 = vld [vmem:[#allocation134_spill] sm:$0xff] }
  0xf1   :  { %v2577_v6 = vrot.slane %v8110_v2, %v4842_v47  ;;  %v1946_v49 = vmul.f32 %v8112_v60, %v8044_v3  ;;  %v2271_v18 = vmul.f32 %v8113_v44, %v5411_v26  ;;  %v2301_v16 = vadd.f32 %v2269_v54, %v1945_v41 }
  0xf2   :  { %8111 = vst [vmem:[#allocation76_spill] sm:$0xff] %v6182_v1  ;;  %v8115_v0 = vrot.slane %v8114_v20, %v4842_v47  ;;  %v2626_v52 = vmul.f32 %v2573_v40, %v5866_v12  ;;  %v2656_v14 = vadd.f32 %v2624_v25, %v2300_v48  ;;  %v6195_v36 = vadd.f32 %v5899_v31, %v2655_v9 }
  0xf3   :  { %v2722_v15 = vadd.f32 %v2721_v13, %v6182_v1  ;;  %v1947_v60 = vmul.f32 %v8117_v23, %v8044_v3  ;;  %v2272_v44 = vmul.f32 %v8118_v33, %v5411_v26  ;;  %v2302_v54 = vadd.f32 %v2270_v30, %v1946_v49  ;;  %v8121_v13 = vld [vmem:[#allocation135_spill] sm:$0xff]  ;;  %v8122_v1 = vld [vmem:[#allocation161_spill] sm:$0xff] }
  0xf4   :  { %v2581_v2 = vrot.slane %v8115_v0, %v4842_v47  ;;  %8116 = vst [vmem:[#allocation16_spill] sm:$0xff] %v6195_v36  ;;  %v8119_v41 = vrot.slane %v8114_v20, %v8057_v45  ;;  %v2627_v40 = vmul.f32 %v2577_v6, %v5866_v12  ;;  %v2657_v25 = vadd.f32 %v2625_v17, %v2301_v16  ;;  %v8123_v49 = vld [vmem:[#allocation107_spill] sm:$0xff] }
  0xf5   :  { %v6208_v48 = vadd.f32 %v5899_v31, %v2656_v14  ;;  %v2723_v9 = vadd.f32 %v2722_v15, %v6195_v36  ;;  %v1948_v23 = vmul.f32 %v8121_v13, %v8044_v3  ;;  %v2273_v33 = vmul.f32 %v8122_v1, %v5411_v26  ;;  %v8126_v15 = vld [vmem:[#allocation136_spill] sm:$0xff]  ;;  %v8127_v36 = vld [vmem:[#allocation162_spill] sm:$0xff] }
  0xf6   :  { %v2585_v0 = vrot.slane %v8119_v41, %v4842_v47  ;;  %v2303_v30 = vadd.f32 %v2271_v18, %v1947_v60  ;;  %v8124_v20 = vrot.slane %v8123_v49, %v4842_v47  ;;  %v2628_v6 = vmul.f32 %v2581_v2, %v5866_v12 }
  0xf7   :  { %8120 = vst [vmem:[#allocation46_spill] sm:$0xff] %v6208_v48  ;;  %v2658_v17 = vadd.f32 %v2626_v52, %v2302_v54  ;;  %v6221_v16 = vadd.f32 %v5899_v31, %v2657_v25  ;;  %v2724_v14 = vadd.f32 %v2723_v9, %v6208_v48  ;;  %v1949_v13 = vmul.f32 %v8126_v15, %v8044_v3  ;;  %v8130_v9 = vld [vmem:[#allocation137_spill] sm:$0xff]  ;;  %v8131_v48 = vld [vmem:[#allocation163_spill] sm:$0xff] }
  0xf8   :  { %v2589_v41 = vrot.slane %v8124_v20, %v4842_v47  ;;  %v2274_v1 = vmul.f32 %v8127_v36, %v5411_v26  ;;  %v2304_v18 = vadd.f32 %v2272_v44, %v1948_v23  ;;  %v8128_v60 = vrot.slane %v8123_v49, %v8057_v45  ;;  %v8132_v23 = vld [vmem:[#allocation108_spill] sm:$0xff] }
  0xf9   :  { %8125 = vst [vmem:[#allocation77_spill] sm:$0xff] %v6221_v16  ;;  %v2629_v2 = vmul.f32 %v2585_v0, %v5866_v12  ;;  %v2659_v52 = vadd.f32 %v2627_v40, %v2303_v30  ;;  %v6234_v54 = vadd.f32 %v5899_v31, %v2658_v17  ;;  %v2725_v25 = vadd.f32 %v2724_v14, %v6221_v16  ;;  %v8134_v14 = vld [vmem:[#allocation138_spill] sm:$0xff]  ;;  %v8135_v16 = vld [vmem:[#allocation164_spill] sm:$0xff] }
  0xfa   :  { %v2593_v20 = vrot.slane %v8128_v60, %v4842_v47  ;;  %v1950_v15 = vmul.f32 %v8130_v9, %v8044_v3  ;;  %v2275_v36 = vmul.f32 %v8131_v48, %v5411_v26  ;;  %v2305_v44 = vadd.f32 %v2273_v33, %v1949_v13 }
  0xfb   :  { %8129 = vst [vmem:[#allocation17_spill] sm:$0xff] %v6234_v54  ;;  %v8133_v49 = vrot.slane %v8132_v23, %v4842_v47  ;;  %v2630_v0 = vmul.f32 %v2589_v41, %v5866_v12  ;;  %v2660_v40 = vadd.f32 %v2628_v6, %v2304_v18  ;;  %v6247_v30 = vadd.f32 %v5899_v31, %v2659_v52 }
  0xfc   :  { %v2726_v17 = vadd.f32 %v2725_v25, %v6234_v54  ;;  %v1951_v9 = vmul.f32 %v8134_v14, %v8044_v3  ;;  %v2276_v48 = vmul.f32 %v8135_v16, %v5411_v26  ;;  %v2306_v33 = vadd.f32 %v2274_v1, %v1950_v15  ;;  %v8137_v25 = vld [vmem:[#allocation139_spill] sm:$0xff]  ;;  %v8138_v54 = vld [vmem:[#allocation165_spill] sm:$0xff] }
  0xfd   :  { %v2597_v60 = vrot.slane %v8133_v49, %v4842_v47  ;;  %v8136_v13 = vrot.slane %v8132_v23, %v8057_v45  ;;  %v2631_v41 = vmul.f32 %v2593_v20, %v5866_v12  ;;  %v2661_v6 = vadd.f32 %v2629_v2, %v2305_v44  ;;  %v8139_v2 = vld [vmem:[#allocation140_spill] sm:$0xff] }
  0xfe   :  { %v6260_v18 = vadd.f32 %v5899_v31, %v2660_v40  ;;  %v2727_v52 = vadd.f32 %v2726_v17, %v6247_v30  ;;  %v1952_v14 = vmul.f32 %v8137_v25, %v8044_v3  ;;  %v2277_v16 = vmul.f32 %v8138_v54, %v5411_v26 }
  0xff   :  { %v2601_v49 = vrot.slane %v8136_v13, %v4842_v47  ;;  %v2307_v1 = vadd.f32 %v2275_v36, %v1951_v9  ;;  %v2632_v15 = vmul.f32 %v2597_v60, %v5866_v12  ;;  %v2662_v42 = vadd.f32 %v2630_v0, %v2306_v33 }
 0x100   :  { %v6269_v23 = vadd.f32 %v5899_v31, %v2661_v6  ;;  %v2728_v20 = vadd.f32 %v2727_v52, %v6260_v18  ;;  %v1953_v44 = vmul.f32 %v8139_v2, %v8044_v3  ;;  %v2308_v40 = vadd.f32 %v2276_v48, %v1952_v14  ;;  %v6295_v52 = vld [vmem:[%s7619_s5] sm:$0xff] }
 0x101   :  { %v2633_v17 = vmul.f32 %v2601_v49, %v5866_v12  ;;  %v2663_v13 = vadd.f32 %v2631_v41, %v2307_v1  ;;  %v6276_v25 = vadd.f32 %v5899_v31, %v2662_v42  ;;  %v1188_v14 = vmul.f32 260.0, %v6295_v52 }
 0x102   :  { %v2729_v54 = vadd.f32 %v2728_v20, %v6269_v23  ;;  %v2309_v36 = vadd.f32 %v2277_v16, %v1953_v44  ;;  %v2664_v60 = vadd.f32 %v2632_v15, %v2308_v40  ;;  %v6304_v20 = vld [vmem:[%s7620_s7] sm:$0xff] }
 0x103   :  { %v6280_v0 = vadd.f32 %v5899_v31, %v2663_v13  ;;  %8140 = vst [vmem:[#allocation47_spill] sm:$0xff] %v6304_v20  ;;  %v2736_v2 = vmul.f32 260.0, %v6304_v20  ;;  %v8149_v20 = vld [vmem:[#allocation11_spill] sm:$0xff] }
 0x104   :  { %v2730_v9 = vadd.f32 %v2729_v54, %v6276_v25  ;;  %v2665_v33 = vadd.f32 %v2633_v17, %v2309_v36  ;;  %v6284_v6 = vadd.f32 %v5899_v31, %v2664_v60  ;;  %v8141_v54 = vld [vmem:[#allocation37_spill] sm:$0xff]  ;;  %v8142_v60 = vld [vmem:[#allocation8_spill] sm:$0xff] }
 0x106   :  { %v2731_v48 = vadd.f32 %v2730_v9, %v6280_v0  ;;  %v6288_v49 = vadd.f32 %v5899_v31, %v2665_v33  ;;  %v8143_v33 = vld [vmem:[#allocation38_spill] sm:$0xff]  ;;  %v8146_v31 = vld [vmem:[#allocation39_spill] sm:$0xff] }
 0x108   :  { %v2732_v42 = vadd.f32 %v2731_v48, %v6284_v6 }
 0x10a   :  { %v2733_v41 = vadd.f32 %v2732_v42, %v6288_v49 }
 0x10c   :  { %2734 = vadd.xlane.f32.xlu1 %v2733_v41 }
 0x159   :  { %v1187_v16 = vpop.xlane.xlu0 %1186 }
 0x15a   :  { %v1189_v1 = vadd.f32 %v1188_v14, %v1187_v16  ;;  %v8144_v14 = vld [vmem:[#allocation69_spill] sm:$0xff] }
 0x15c   :  { %v6298_v15 = vmul.f32 0.00022956841, %v1189_v1  ;;  %v8145_v1 = vld [vmem:[#allocation9_spill] sm:$0xff] }
 0x15e   :  { %1194 = vperm.xlu0 %4314, %v6298_v15  }
 0x195   :  { %v2735_v44 = vpop.xlane.xlu1 %2734 }
 0x196   :  { %v2737_v40 = vadd.f32 %v2736_v2, %v2735_v44 }
 0x198   :  { %v6307_v17 = vmul.f32 0.00022956841, %v2737_v40 }
 0x19a   :  { %2741 = vperm.xlu1 %4313, %v6307_v17  }
 0x1d9   :  { %v6310_v13 = vpop.permute.xlu0 %1194 }
 0x1da   :  { %v1197_v36 = vsub.f32 %v8141_v54, %v6310_v13  ;;  %v1198_v9 = vsub.f32 %v8142_v60, %v6310_v13  ;;  %v1199_v48 = vsub.f32 %v8143_v33, %v6310_v13  ;;  %v1200_v16 = vsub.f32 %v8144_v14, %v6310_v13  ;;  %v8147_v60 = vld [vmem:[#allocation70_spill] sm:$0xff] }
 0x1db   :  { %v1201_v2 = vsub.f32 %v8145_v1, %v6310_v13  ;;  %v1202_v12 = vsub.f32 %v8146_v31, %v6310_v13  ;;  %v1203_v3 = vsub.f32 %v8147_v60, %v6310_v13  ;;  %v1205_v1 = vsub.f32 %v8149_v20, %v6310_v13 }
 0x1dc   :  { %v1230_v42 = vmul.f32 %v1197_v36, %v1197_v36  ;;  %v1231_v41 = vmul.f32 %v1198_v9, %v1198_v9  ;;  %v1232_v44 = vmul.f32 %v1199_v48, %v1199_v48  ;;  %v1233_v54 = vmul.f32 %v1200_v16, %v1200_v16  ;;  %v8148_v36 = vld [vmem:[#allocation40_spill] sm:$0xff] }
 0x1dd   :  { %v1234_v45 = vmul.f32 %v1201_v2, %v1201_v2  ;;  %v1204_v9 = vsub.f32 %v8148_v36, %v6310_v13  ;;  %v1235_v47 = vmul.f32 %v1202_v12, %v1202_v12  ;;  %v1236_v48 = vmul.f32 %v1203_v3, %v1203_v3 }
 0x1de   :  { %v1262_v40 = vadd.f32 %v1231_v41, %v1230_v42  ;;  %v8150_v41 = vld [vmem:[#allocation41_spill] sm:$0xff]  ;;  %v1238_v2 = vmul.f32 %v1205_v1, %v1205_v1 }
 0x1df   :  { %v1206_v31 = vsub.f32 %v8150_v41, %v6310_v13  ;;  %v1237_v16 = vmul.f32 %v1204_v9, %v1204_v9 }
 0x1e0   :  { %v1263_v26 = vadd.f32 %v1262_v40, %v1232_v44  ;;  %v8151_v40 = vld [vmem:[#allocation72_spill] sm:$0xff] }
 0x1e1   :  { %v1207_v60 = vsub.f32 %v8151_v40, %v6310_v13  ;;  %v1239_v12 = vmul.f32 %v1206_v31, %v1206_v31 }
 0x1e2   :  { %v1264_v33 = vadd.f32 %v1263_v26, %v1233_v54  ;;  %v8152_v54 = vld [vmem:[#allocation12_spill] sm:$0xff] }
 0x1e3   :  { %v1208_v36 = vsub.f32 %v8152_v54, %v6310_v13  ;;  %v1240_v3 = vmul.f32 %v1207_v60, %v1207_v60 }
 0x1e4   :  { %v1265_v14 = vadd.f32 %v1264_v33, %v1234_v45  ;;  %v8153_v33 = vld [vmem:[#allocation42_spill] sm:$0xff] }
 0x1e5   :  { %v1209_v20 = vsub.f32 %v8153_v33, %v6310_v13  ;;  %v1241_v9 = vmul.f32 %v1208_v36, %v1208_v36 }
 0x1e6   :  { %v1266_v42 = vadd.f32 %v1265_v14, %v1235_v47  ;;  %v8154_v14 = vld [vmem:[#allocation73_spill] sm:$0xff] }
 0x1e7   :  { %v1210_v41 = vsub.f32 %v8154_v14, %v6310_v13  ;;  %v1242_v1 = vmul.f32 %v1209_v20, %v1209_v20 }
 0x1e8   :  { %v1267_v44 = vadd.f32 %v1266_v42, %v1236_v48  ;;  %v8155_v42 = vld [vmem:[#allocation13_spill] sm:$0xff] }
 0x1e9   :  { %v1211_v40 = vsub.f32 %v8155_v42, %v6310_v13  ;;  %v1243_v31 = vmul.f32 %v1210_v41, %v1210_v41 }
 0x1ea   :  { %v1268_v26 = vadd.f32 %v1267_v44, %v1237_v16  ;;  %v8156_v44 = vld [vmem:[#allocation43_spill] sm:$0xff] }
 0x1eb   :  { %v1212_v54 = vsub.f32 %v8156_v44, %v6310_v13  ;;  %v1244_v60 = vmul.f32 %v1211_v40, %v1211_v40 }
 0x1ec   :  { %v1269_v45 = vadd.f32 %v1268_v26, %v1238_v2  ;;  %v8157_v26 = vld [vmem:[#allocation74_spill] sm:$0xff] }
 0x1ed   :  { %v1213_v33 = vsub.f32 %v8157_v26, %v6310_v13  ;;  %v1245_v36 = vmul.f32 %v1212_v54, %v1212_v54  ;;  %v1219_v26 = vsub.f32 %v5861_v43, %v6310_v13  ;;  %v1223_v43 = vsub.f32 %v5895_v55, %v6310_v13 }
 0x1ee   :  { %v1270_v47 = vadd.f32 %v1269_v45, %v1239_v12  ;;  %v8158_v45 = vld [vmem:[#allocation14_spill] sm:$0xff] }
 0x1ef   :  { %v1214_v14 = vsub.f32 %v8158_v45, %v6310_v13  ;;  %v1246_v20 = vmul.f32 %v1213_v33, %v1213_v33 }
 0x1f0   :  { %v1271_v48 = vadd.f32 %v1270_v47, %v1240_v3  ;;  %v8159_v47 = vld [vmem:[#allocation44_spill] sm:$0xff] }
 0x1f1   :  { %v1215_v42 = vsub.f32 %v8159_v47, %v6310_v13  ;;  %v1247_v41 = vmul.f32 %v1214_v14, %v1214_v14  ;;  %v1252_v14 = vmul.f32 %v1219_v26, %v1219_v26 }
 0x1f2   :  { %v1272_v16 = vadd.f32 %v1271_v48, %v1241_v9  ;;  %v1216_v48 = vsub.f32 %v5831_v4, %v6310_v13  ;;  %v1220_v4 = vsub.f32 %v5871_v32, %v6310_v13  ;;  %v1224_v32 = vsub.f32 %v5902_v37, %v6310_v13 }
 0x1f3   :  { %v1248_v40 = vmul.f32 %v1215_v42, %v1215_v42  ;;  %v1227_v37 = vsub.f32 %v5931_v56, %v6310_v13 }
 0x1f4   :  { %v1273_v2 = vadd.f32 %v1272_v16, %v1242_v1  ;;  %v1217_v16 = vsub.f32 %v5843_v7, %v6310_v13  ;;  %v1249_v54 = vmul.f32 %v1216_v48, %v1216_v48  ;;  %v1221_v7 = vsub.f32 %v5879_v50, %v6310_v13 }
 0x1f5   :  { %v1225_v50 = vsub.f32 %v5905_v22, %v6310_v13 }
 0x1f6   :  { %v1274_v12 = vadd.f32 %v1273_v2, %v1243_v31  ;;  %v1218_v31 = vsub.f32 %v5849_v21, %v6310_v13  ;;  %v1250_v33 = vmul.f32 %v1217_v16, %v1217_v16  ;;  %v1222_v21 = vsub.f32 %v5891_v38, %v6310_v13 }
 0x1f7   :  { %v1254_v42 = vmul.f32 %v1221_v7, %v1221_v7 }
 0x1f8   :  { %v1275_v3 = vadd.f32 %v1274_v12, %v1244_v60  ;;  %v1251_v12 = vmul.f32 %v1218_v31, %v1218_v31  ;;  %v1255_v48 = vmul.f32 %v1222_v21, %v1222_v21 }
 0x1fa   :  { %v1276_v9 = vadd.f32 %v1275_v3, %v1245_v36  ;;  %v1253_v3 = vmul.f32 %v1220_v4, %v1220_v4  ;;  %v1260_v4 = vmul.f32 %v1227_v37, %v1227_v37 }
 0x1fc   :  { %v1277_v1 = vadd.f32 %v1276_v9, %v1246_v20 }
 0x1fe   :  { %v1278_v44 = vadd.f32 %v1277_v1, %v1247_v41  ;;  %v1256_v1 = vmul.f32 %v1223_v43, %v1223_v43 }
 0x200   :  { %v1279_v2 = vadd.f32 %v1278_v44, %v1248_v40  ;;  %v1226_v40 = vsub.f32 %v5915_v61, %v6310_v13  ;;  %v1257_v44 = vmul.f32 %v1224_v32, %v1224_v32 }
 0x202   :  { %v1280_v60 = vadd.f32 %v1279_v2, %v1249_v54  ;;  %v1258_v54 = vmul.f32 %v1225_v50, %v1225_v50 }
 0x204   :  { %v1281_v45 = vadd.f32 %v1280_v60, %v1250_v33  ;;  %v1259_v60 = vmul.f32 %v1226_v40, %v1226_v40 }
 0x206   :  { %v1282_v36 = vadd.f32 %v1281_v45, %v1251_v12 }
 0x208   :  { %v1283_v47 = vadd.f32 %v1282_v36, %v1252_v14 }
 0x20a   :  { %v1284_v20 = vadd.f32 %v1283_v47, %v1253_v3 }
 0x20c   :  { %v1285_v41 = vadd.f32 %v1284_v20, %v1254_v42 }
 0x20e   :  { %v1286_v16 = vadd.f32 %v1285_v41, %v1255_v48 }
 0x210   :  { %v1287_v31 = vadd.f32 %v1286_v16, %v1256_v1 }
 0x212   :  { %v1288_v2 = vadd.f32 %v1287_v31, %v1257_v44 }
 0x215   :  { %v6366_v9 = vpop.permute.xlu1 %2741 }
 0x216   :  { %8160 = vst [vmem:[#allocation78_spill] sm:$0xff] %v6366_v9  ;;  %v2744_v38 = vsub.f32 %v5925_v11, %v6366_v9  ;;  %v2745_v55 = vsub.f32 %v5928_v27, %v6366_v9  ;;  %v2746_v22 = vsub.f32 %v5951_v51, %v6366_v9  ;;  %v1228_v11 = vsub.f32 %v5939_v29, %v6310_v13 }
 0x217   :  { %v1289_v27 = vadd.f32 %v1288_v2, %v1258_v54  ;;  %v2747_v61 = vsub.f32 %v5963_v34, %v6366_v9  ;;  %v2748_v56 = vsub.f32 %v5974_v19, %v6366_v9  ;;  %v2749_v51 = vsub.f32 %v5985_v35, %v6366_v9 }
 0x218   :  { %v2777_v26 = vmul.f32 %v2744_v38, %v2744_v38  ;;  %v2778_v33 = vmul.f32 %v2745_v55, %v2745_v55  ;;  %v2779_v45 = vmul.f32 %v2746_v22, %v2746_v22  ;;  %v1261_v14 = vmul.f32 %v1228_v11, %v1228_v11 }
 0x219   :  { %v1290_v12 = vadd.f32 %v1289_v27, %v1259_v60  ;;  %v2780_v21 = vmul.f32 %v2747_v61, %v2747_v61  ;;  %v2750_v47 = vsub.f32 %v5999_v62, %v6366_v9  ;;  %v2781_v43 = vmul.f32 %v2748_v56, %v2748_v56 }
 0x21a   :  { %v2809_v7 = vadd.f32 %v2778_v33, %v2777_v26  ;;  %v2751_v42 = vsub.f32 %v6013_v10, %v6366_v9  ;;  %v2782_v19 = vmul.f32 %v2749_v51, %v2749_v51  ;;  %v2752_v32 = vsub.f32 %v6026_v63, %v6366_v9  ;;  %v8165_v51 = vld [vmem:[#allocation76_spill] sm:$0xff] }
 0x21b   :  { %v1291_v36 = vadd.f32 %v1290_v12, %v1260_v4  ;;  %v2783_v48 = vmul.f32 %v2750_v47, %v2750_v47  ;;  %v2753_v35 = vsub.f32 %v6039_v59, %v6366_v9  ;;  %v2754_v62 = vsub.f32 %v6052_v57, %v6366_v9  ;;  %v6409_v57 = vld [vmem:[%s7623_s8] sm:$0xff] }
 0x21c   :  { %v2810_v3 = vadd.f32 %v2809_v7, %v2779_v45  ;;  %v2784_v50 = vmul.f32 %v2751_v42, %v2751_v42  ;;  %v2785_v16 = vmul.f32 %v2752_v32, %v2752_v32  ;;  %v2755_v10 = vsub.f32 %v6065_v46, %v6366_v9  ;;  %8161 = vst [vmem:[#allocation18_spill] sm:$0xff] %v6409_v57  ;;  %v8163_v45 = vld [vmem:[#allocation45_spill] sm:$0xff]  ;;  %v8167_v42 = vld [vmem:[#allocation46_spill] sm:$0xff] }
 0x21d   :  { %v1292_v29 = vadd.f32 %v1291_v36, %v1261_v14  ;;  %v2786_v55 = vmul.f32 %v2753_v35, %v2753_v35  ;;  %v2756_v63 = vsub.f32 %v6078_v53, %v6366_v9  ;;  %v2787_v44 = vmul.f32 %v2754_v62, %v2754_v62 }
 0x21e   :  { %v2811_v34 = vadd.f32 %v2810_v3, %v2780_v21  ;;  %v2757_v59 = vsub.f32 %v6091_v24, %v6366_v9  ;;  %v2788_v37 = vmul.f32 %v2755_v10, %v2755_v10  ;;  %v2758_v46 = vsub.f32 %v6104_v39, %v6366_v9 }
 0x21f   :  { %1293 = vadd.xlane.f32.xlu1 %v1292_v29  ;;  %v2789_v2 = vmul.f32 %v2756_v63, %v2756_v63  ;;  %v2759_v53 = vsub.f32 %v6117_v58, %v6366_v9  ;;  %v2760_v24 = vsub.f32 %v6130_v5, %v6366_v9  ;;  %v2761_v27 = vsub.f32 %v6143_v8, %v6366_v9  ;;  %v6427_v5 = vld [vmem:[%s7624_s10] sm:$0xff] }
 0x220   :  { %v2812_v20 = vadd.f32 %v2811_v34, %v2781_v43  ;;  %v2790_v26 = vmul.f32 %v2757_v59, %v2757_v59  ;;  %v2791_v11 = vmul.f32 %v2758_v46, %v2758_v46  ;;  %v8162_v39 = vmov 1  }
 0x221   :  { %v2792_v61 = vmul.f32 %v2759_v53, %v2759_v53  ;;  %v2762_v58 = vsub.f32 %v6156_v28, %v6366_v9  ;;  %v2793_v12 = vmul.f32 %v2760_v24, %v2760_v24  ;;  %v2763_v7 = vsub.f32 %v8163_v45, %v6366_v9  ;;  %v8166_v28 = vld [vmem:[#allocation16_spill] sm:$0xff] }
 0x222   :  { %v2813_v41 = vadd.f32 %v2812_v20, %v2782_v19  ;;  %v2794_v8 = vmul.f32 %v2761_v27, %v2761_v27  ;;  %v8164_v36 = vmov 0   ;;  %v2764_v21 = vsub.f32 %v8165_v51, %v6366_v9 }
 0x223   :  { %v2795_v3 = vmul.f32 %v2762_v58, %v2762_v58  ;;  %v2765_v47 = vsub.f32 %v8166_v28, %v6366_v9  ;;  %v2796_v43 = vmul.f32 %v2763_v7, %v2763_v7  ;;  %v2766_v19 = vsub.f32 %v8167_v42, %v6366_v9  ;;  %v8174_v42 = vld [vmem:[#allocation47_spill] sm:$0xff] }
 0x224   :  { %v2814_v1 = vadd.f32 %v2813_v41, %v2783_v48  ;;  %v2797_v20 = vmul.f32 %v2764_v21, %v2764_v21  ;;  %v8168_v48 = vld [vmem:[#allocation77_spill] sm:$0xff]  ;;  %v8170_v10 = vmov 2   ;;  %v2773_v53 = vsub.f32 %v6280_v0, %v6366_v9 }
 0x225   :  { %v2767_v41 = vsub.f32 %v8168_v48, %v6366_v9  ;;  %v2798_v35 = vmul.f32 %v2765_v47, %v2765_v47  ;;  %v4346_v0 = vmov 4   ;;  %v4347_v21 = vmov 5   ;;  %v8177_v48 = vld [vmem:[#allocation58_spill] sm:$0xff] }
 0x226   :  { %v2815_v38 = vadd.f32 %v2814_v1, %v2784_v50  ;;  %v8169_v1 = vld [vmem:[#allocation17_spill] sm:$0xff] }
 0x227   :  { %v2768_v62 = vsub.f32 %v8169_v1, %v6366_v9 }
 0x228   :  { %v2816_v40 = vadd.f32 %v2815_v38, %v2785_v16  ;;  %v2799_v16 = vmul.f32 %v2766_v19, %v2766_v19  ;;  %v2776_v19 = vsub.f32 %v8174_v42, %v6307_v17 }
 0x22a   :  { %v2817_v31 = vadd.f32 %v2816_v40, %v2786_v55  ;;  %v2769_v55 = vsub.f32 %v6247_v30, %v6366_v9  ;;  %v2800_v40 = vmul.f32 %v2767_v41, %v2767_v41 }
 0x22c   :  { %v2818_v54 = vadd.f32 %v2817_v31, %v2787_v44  ;;  %v2770_v44 = vsub.f32 %v6260_v18, %v6366_v9  ;;  %v2801_v31 = vmul.f32 %v2768_v62, %v2768_v62  ;;  %v2774_v18 = vsub.f32 %v6284_v6, %v6366_v9 }
 0x22d   :  { %v1229_v6 = vsub.f32 %v6295_v52, %v6298_v15  ;;  %v3138_v52 = vld [vmem:[%s7625_s9] sm:$0xff]  ;;  %s4350_s9 = smov 1  }
 0x22e   :  { %v2819_v22 = vadd.f32 %v2818_v54, %v2788_v37  ;;  %v2771_v37 = vsub.f32 %v6269_v23, %v6366_v9  ;;  %v2802_v54 = vmul.f32 %v2769_v55, %v2769_v55  ;;  %v2803_v30 = vmul.f32 %v2770_v44, %v2770_v44  ;;  %v3139_v15 = vld [vmem:[%s7626_s11] sm:$0xff]  ;;  %s4351_s11 = smov 2  }
 0x22f   :  { %v2775_v23 = vsub.f32 %v6288_v49, %v6366_v9  ;;  %v1295_v49 = vmul.f32 260.0, %v1229_v6  ;;  %v6480_v28 = vadd.f32 %v3139_v15, %v3138_v52 }
 0x230   :  { %v2820_v33 = vadd.f32 %v2819_v22, %v2789_v2  ;;  %3144 = vperm.xlu1 %4313, %v6409_v57   ;;  %v2772_v2 = vsub.f32 %v6276_v25, %v6366_v9 }
 0x231   :  { %v2808_v25 = vmul.f32 %v2775_v23, %v2775_v23  ;;  %8171 = vst [vmem:[#allocation48_spill] sm:$0xff] %v6480_v28 }
 0x232   :  { %v2821_v60 = vadd.f32 %v2820_v33, %v2790_v26  ;;  %v2804_v26 = vmul.f32 %v2771_v37, %v2771_v37  ;;  %v2805_v24 = vmul.f32 %v2772_v2, %v2772_v2 }
 0x234   :  { %v2822_v4 = vadd.f32 %v2821_v60, %v2791_v11  ;;  %4315 = vset.pattern.permute.xlu1 %v8162_v39  ;;  %v2806_v60 = vmul.f32 %v2773_v53, %v2773_v53 }
 0x235   :  { %3188 = vperm.xlu1 %4315, %v6409_v57  }
 0x236   :  { %v2823_v56 = vadd.f32 %v2822_v4, %v2792_v61  ;;  %v2807_v61 = vmul.f32 %v2774_v18, %v2774_v18  ;;  %v6549_v18 = vld [vmem:[%s7627_s2 + $0x10] sm:$0x77] }
 0x238   :  { %v2824_v14 = vadd.f32 %v2823_v56, %v2793_v12  ;;  %v4345_v12 = vmov 3   ;;  %v1296_v56 = vmul.f32 %v1295_v49, %v1229_v6 }
 0x239   :  { %4316 = vset.pattern.permute.xlu1 %v8164_v36  ;;  %4319 = vset.pattern.permute.xlu0 %v4345_v12 }
 0x23a   :  { %v2825_v29 = vadd.f32 %v2824_v14, %v2794_v8  ;;  %3554 = vperm.xlu1 %4316, %v6427_v5  }
 0x23c   :  { %v2826_v34 = vadd.f32 %v2825_v29, %v2795_v3  ;;  %v4348_v3 = vmov 6   ;;  %v4349_v29 = vmov 7  }
 0x23e   :  { %v2827_v32 = vadd.f32 %v2826_v34, %v2796_v43  ;;  %4317 = vset.pattern.permute.xlu1 %v8162_v39  ;;  %v8173_v43 = vld [vmem:[#allocation5_spill] sm:$0xff] }
 0x23f   :  { %3598 = vperm.xlu1 %4317, %v6427_v5  }
 0x240   :  { %v2828_v50 = vadd.f32 %v2827_v32, %v2797_v20  ;;  %v8175_v20 = vld [vmem:[#allocation2_spill] sm:$0xff] }
 0x241   :  { %v6492_v32 = vsub.s32 3, %v8175_v20  ;;  %v6507_v44 = vsub.s32 7, %v8175_v20 }
 0x242   :  { %v2829_v38 = vadd.f32 %v2828_v50, %v2798_v35  ;;  %v2842_v35 = vmul.f32 260.0, %v2776_v19 }
 0x243   :  { %4318 = vset.pattern.permute.xlu1 %v8170_v10  ;;  %8176 = vst [vmem:[#allocation19_spill] sm:$0xff] %v6492_v32  ;;  %8180 = vst [vmem:[#allocation20_spill] sm:$0xff] %v6507_v44 }
 0x244   :  { %v2830_v63 = vadd.f32 %v2829_v38, %v2799_v16  ;;  %3240 = vperm.xlu1 %4318, %v6409_v57   ;;  %v2843_v1 = vmul.f32 %v2842_v35, %v2776_v19  ;;  %v8178_v16 = vld [vmem:[#allocation4_spill] sm:$0xff] }
 0x246   :  { %v2831_v59 = vadd.f32 %v2830_v63, %v2800_v40  ;;  %v8179_v40 = vld [vmem:[#allocation6_spill] sm:$0xff] }
 0x248   :  { %v2832_v46 = vadd.f32 %v2831_v59, %v2801_v31  ;;  %3650 = vperm.xlu1 %4318, %v6427_v5   ;;  %v8181_v31 = vld [vmem:[#allocation59_spill] sm:$0xff] }
 0x24a   :  { %v2833_v22 = vadd.f32 %v2832_v46, %v2802_v54 }
 0x24c   :  { %v2834_v33 = vadd.f32 %v2833_v22, %v2803_v30  ;;  %4320 = vset.pattern.permute.xlu1 %v4345_v12 }
 0x24d   :  { %3702 = vperm.xlu1 %4320, %v6427_v5  }
 0x24e   :  { %v2835_v11 = vadd.f32 %v2834_v33, %v2804_v26  ;;  %v6536_v26 = vld [vmem:[%s7627_s2] sm:$0x77]  ;;  %v6544_v33 = vld [vmem:[%s7627_s2 + $0x8] sm:$0x77] }
 0x24f   :  { %v1392_v49 = vrot.slane %v6536_v26, %v8179_v40 }
 0x250   :  { %v2836_v27 = vadd.f32 %v2835_v11, %v2805_v24  ;;  %v6554_v24 = vld [vmem:[%s7627_s2 + $0x18] sm:$0x77]  ;;  %v8185_v11 = vld [vmem:[#allocation3_spill] sm:$0xff] }
 0x251   :  { %4321 = vset.pattern.permute.xlu1 %v4346_v0  ;;  %v1308_v23 = vrot.slane %v6536_v26, %v8185_v11  ;;  %v1336_v12 = vrot.slane %v6554_v24, %v8178_v16  ;;  %v1416_v52 = vrot.slane %v6554_v24, %v8179_v40  ;;  %v6624_v35 = vrot.slane %v1392_v49, %v8173_v43 }
 0x252   :  { %v2837_v4 = vadd.f32 %v2836_v27, %v2806_v60  ;;  %3344 = vperm.xlu1 %4321, %v6409_v57   ;;  %v1312_v27 = vrot.slane %v6536_v26, %v8178_v16 }
 0x253   :  { %v6618_v20 = vrot.slane %v1336_v12, %v8185_v11 }
 0x254   :  { %v2838_v39 = vadd.f32 %v2837_v4, %v2807_v61  ;;  %v1316_v61 = vrot.slane %v6544_v33, %v8185_v11  ;;  %v1320_v4 = vrot.slane %v6544_v33, %v8178_v16 }
 0x256   :  { %v2839_v58 = vadd.f32 %v2838_v39, %v2808_v25  ;;  %4323 = vset.pattern.permute.xlu1 %v8164_v36  ;;  %v1324_v25 = vrot.slane %v6549_v18, %v8185_v11  ;;  %v1328_v39 = vrot.slane %v6549_v18, %v8178_v16  ;;  %v6603_v15 = vrot.slane %v1316_v61, %v8185_v11 }
 0x257   :  { %v1504_v61 = vrot.slane %v6554_v24, %v8181_v31 }
 0x258   :  { %2840 = vadd.xlane.f32.xlu0 %v2839_v58  ;;  %v1332_v58 = vrot.slane %v6554_v24, %v8185_v11  ;;  %v6612_v42 = vrot.slane %v1328_v39, %v8185_v11 }
 0x26e   :  { %3292 = vperm.xlu0 %4319, %v6409_v57  }
 0x272   :  { %4322 = vset.pattern.permute.xlu0 %v4346_v0  ;;  %v6576_v0 = vrot.slane %v1308_v23, %v8185_v11  ;;  %v1492_v23 = vrot.slane %v6549_v18, %v8177_v48 }
 0x273   :  { %3754 = vperm.xlu0 %4322, %v6427_v5  }
 0x277   :  { %4325 = vset.pattern.permute.xlu0 %v8164_v36 }
 0x2a8   :  { %v1294_v45 = vpop.xlane.xlu1 %1293 }
 0x2a9   :  { %v1297_v7 = vadd.f32 %v1296_v56, %v1294_v45 }
 0x2ab   :  { %v1298_v8 = vmul.f32 0.00022956841, %v1297_v7  ;;  %v1396_v7 = vrot.slane %v6544_v33, %v8173_v43 }
 0x2ac   :  { %v6528_v53 = vpop.permute.xlu1 %3144 }
 0x2ad   :  { %v1299_v14 = vadd.f32 1e-05, %v1298_v8  ;;  %8183 = vst [vmem:[#allocation80_spill] sm:$0xff] %v6528_v53  ;;  %v1400_v8 = vrot.slane %v6544_v33, %v8179_v40 }
 0x2af   :  { %4332 = vrsqrt.f32 %v1299_v14  ;;  %v1404_v14 = vrot.slane %v6549_v18, %v8173_v43 }
 0x2bc   :  { %v4333_v51 = vpop.eup %4332 }
 0x2bd   :  { %1579 = vperm.xlu1 %4323, %v4333_v51   ;;  %v6482_v47 = vmul.f32 %v4333_v51, %v1229_v6  ;;  %v1388_v6 = vrot.slane %v6536_v26, %v8173_v43  ;;  %v6593_v51 = vrot.slane %v1312_v27, %v8185_v11  ;;  %v1496_v27 = vrot.slane %v6549_v18, %v8181_v31 }
 0x2bf   :  { %8172 = vst [vmem:[#allocation79_spill] sm:$0xff] %v6482_v47  ;;  %v3990_v34 = vrot.slane %v6482_v47, %v8173_v43  ;;  %v4004_v41 = vrot.slane %v6482_v47, %v8177_v48  ;;  %v4018_v50 = vrot.slane %v6482_v47, %v6492_v32  ;;  %v4032_v38 = vrot.slane %v6482_v47, %v8178_v16 }
 0x2c0   :  { %v4046_v63 = vrot.slane %v6482_v47, %v8179_v40  ;;  %v4060_v59 = vrot.slane %v6482_v47, %v8181_v31  ;;  %v4074_v37 = vrot.slane %v6482_v47, %v6507_v44 }
 0x2c1   :  { %4324 = vset.pattern.permute.xlu1 %v4347_v21  ;;  %v1408_v21 = vrot.slane %v6549_v18, %v8179_v40 }
 0x2c2   :  { %3396 = vperm.xlu1 %4324, %v6409_v57  }
 0x2c6   :  { %3806 = vperm.xlu1 %4324, %v6427_v5  }
 0x2ca   :  { %4327 = vset.pattern.permute.xlu1 %v4348_v3 }
 0x2cb   :  { %3858 = vperm.xlu1 %4327, %v6427_v5  }
 0x2cf   :  { %4328 = vset.pattern.permute.xlu1 %v4349_v29 }
 0x2d0   :  { %3500 = vperm.xlu1 %4328, %v6409_v57  }
 0x2d4   :  { %4330 = vset.pattern.permute.xlu1 %v8164_v36 }
 0x2d5   :  { %3971 = vperm.xlu1 %4330, %v6480_v28  }
 0x2d9   :  { %3992 = vrot.lane.b32.xlu1 %v3990_v34, %s4350_s9  ;;  %v6609_v34 = vrot.slane %v1324_v25, %v8185_v11 }
 0x2dd   :  { %4006 = vrot.lane.b32.xlu1 %v4004_v41, %s4351_s11  ;;  %v6621_v41 = vrot.slane %v1388_v6, %v8173_v43 }
 0x2e1   :  { %v2841_v62 = vpop.xlane.xlu0 %2840  ;;  %4020 = vrot.lane.b32.xlu1 %v4018_v50, %s4352_s27 }
 0x2e2   :  { %v2844_v17 = vadd.f32 %v2843_v1, %v2841_v62  ;;  %v6629_v1 = vrot.slane %v1396_v7, %v8173_v43  ;;  %v6632_v62 = vrot.slane %v1400_v8, %v8173_v43  ;;  %v1532_v8 = vrot.slane %v1492_v23, %v8177_v48 }
 0x2e4   :  { %v2845_v10 = vmul.f32 0.00022956841, %v2844_v17  ;;  %v6635_v17 = vrot.slane %v1404_v14, %v8173_v43  ;;  %v1536_v14 = vrot.slane %v1496_v27, %v8177_v48 }
 0x2e5   :  { %4034 = vrot.lane.b32.xlu1 %v4032_v38, %s4353_s28  ;;  %v6640_v38 = vld [vmem:[%s7628_s3] sm:$0x77] }
 0x2e6   :  { %v2846_v55 = vadd.f32 1e-05, %v2845_v10  ;;  %v6643_v10 = vrot.slane %v1408_v21, %v8173_v43 }
 0x2e8   :  { %4334 = vrsqrt.f32 %v2846_v55 }
 0x2e9   :  { %4048 = vrot.lane.b32.xlu1 %v4046_v63, %s4354_s6  ;;  %v6649_v63 = vrot.slane %v1416_v52, %v8173_v43 }
 0x2ed   :  { %4062 = vrot.lane.b32.xlu1 %v4060_v59, %s4355_s29  ;;  %v1476_v59 = vrot.slane %v6536_v26, %v8177_v48 }
 0x2f1   :  { %4076 = vrot.lane.b32.xlu1 %v4074_v37, %s4356_s4  ;;  %v6656_v37 = vld [vmem:[%s7628_s3 + $0x8] sm:$0x77] }
 0x2f2   :  { %v2863_v25 = vrot.slane %v6656_v37, %v8185_v11  ;;  %v2867_v39 = vrot.slane %v6656_v37, %v8178_v16 }
 0x2f5   :  { %v4335_v54 = vpop.eup %4334 }
 0x2f6   :  { %3126 = vperm.xlu0 %4325, %v4335_v54   ;;  %v6516_v46 = vmul.f32 %v4335_v54, %v2776_v19  ;;  %v6615_v19 = vrot.slane %v1332_v58, %v8185_v11  ;;  %v6661_v54 = vld [vmem:[%s7628_s3 + $0x10] sm:$0x77]  ;;  %v1516_v58 = vrot.slane %v1476_v59, %v8177_v48 }
 0x2f7   :  { %8187 = vst [vmem:[#allocation50_spill] sm:$0xff] %v6661_v54  ;;  %v2871_v18 = vrot.slane %v6661_v54, %v8185_v11 }
 0x2f8   :  { %8182 = vst [vmem:[#allocation49_spill] sm:$0xff] %v6516_v46  ;;  %v4093_v2 = vrot.slane %v6516_v46, %v8173_v43  ;;  %v4107_v30 = vrot.slane %v6516_v46, %v8177_v48  ;;  %v4121_v22 = vrot.slane %v6516_v46, %v6492_v32  ;;  %v4149_v60 = vrot.slane %v6516_v46, %v8179_v40 }
 0x2f9   :  { %v4163_v56 = vrot.slane %v6516_v46, %v8181_v31  ;;  %v4177_v50 = vrot.slane %v6516_v46, %v6507_v44  ;;  %v8192_v44 = vld [vmem:[#allocation166_spill] sm:$0xff] }
 0x2fa   :  { %4326 = vset.pattern.permute.xlu0 %v4348_v3  ;;  %v1412_v3 = vrot.slane %v6554_v24, %v8173_v43 }
 0x2fb   :  { %3448 = vperm.xlu0 %4326, %v6409_v57  }
 0x2fc   :  { %v6646_v55 = vrot.slane %v1412_v3, %v8173_v43  ;;  %v1544_v3 = vrot.slane %v1504_v61, %v8177_v48  ;;  %v2935_v61 = vrot.slane %v6640_v38, %v8173_v43 }
 0x2ff   :  { %4329 = vset.pattern.permute.xlu0 %v4349_v29  ;;  %v6606_v29 = vrot.slane %v1320_v4, %v8185_v11  ;;  %v2859_v4 = vrot.slane %v6640_v38, %v8178_v16 }
 0x300   :  { %3910 = vperm.xlu0 %4329, %v6427_v5   ;;  %v4135_v5 = vrot.slane %v6516_v46, %v8178_v16 }
 0x301   :  { %v6715_v59 = vrot.slane %v2859_v4, %v8185_v11  ;;  %v2943_v4 = vrot.slane %v6656_v37, %v8173_v43 }
 0x304   :  { %4095 = vrot.lane.b32.xlu0 %v4093_v2, %s4350_s9 }
 0x305   :  { %4331 = vset.pattern.permute.xlu0 %v8164_v36  ;;  %v6539_v36 = vpop.permute.xlu1 %3188 }
 0x306   :  { %8184 = vst [vmem:[#allocation21_spill] sm:$0xff] %v6539_v36 }
 0x308   :  { %4109 = vrot.lane.b32.xlu0 %v4107_v30, %s4351_s11  ;;  %v1480_v30 = vrot.slane %v6536_v26, %v8181_v31  ;;  %v1500_v26 = vrot.slane %v6554_v24, %v8177_v48  ;;  %v2875_v24 = vrot.slane %v6661_v54, %v8178_v16 }
 0x309   :  { %v6584_v45 = vpop.permute.xlu1 %3554 }
 0x30a   :  { %8186 = vst [vmem:[#allocation22_spill] sm:$0xff] %v6584_v45  ;;  %v1520_v49 = vrot.slane %v1480_v30, %v8177_v48  ;;  %v1540_v21 = vrot.slane %v1500_v26, %v8177_v48  ;;  %v6718_v30 = vrot.slane %v2863_v25, %v8185_v11  ;;  %v6727_v23 = vrot.slane %v2875_v24, %v8185_v11 }
 0x30b   :  { %v2947_v25 = vrot.slane %v6656_v37, %v8179_v40 }
 0x30c   :  { %4123 = vrot.lane.b32.xlu0 %v4121_v22, %s4352_s27  ;;  %v1484_v22 = vrot.slane %v6544_v33, %v8177_v48 }
 0x30d   :  { %v6664_v2 = vpop.permute.xlu1 %3598 }
 0x30e   :  { %8188 = vst [vmem:[#allocation81_spill] sm:$0xff] %v6664_v2 }
 0x310   :  { %4137 = vrot.lane.b32.xlu0 %v4135_v5, %s4353_s28  ;;  %v1488_v5 = vrot.slane %v6544_v33, %v8181_v31  ;;  %v2855_v33 = vrot.slane %v6640_v38, %v8185_v11 }
 0x312   :  { %v1528_v7 = vrot.slane %v1488_v5, %v8177_v48  ;;  %v6710_v52 = vrot.slane %v2855_v33, %v8185_v11  ;;  %v6724_v5 = vrot.slane %v2871_v18, %v8185_v11  ;;  %v2939_v33 = vrot.slane %v6640_v38, %v8179_v40  ;;  %v8191_v18 = vld [vmem:[#allocation143_spill] sm:$0xff] }
 0x313   :  { %v1377_v24 = vmul.f32 %v6576_v0, %v8191_v18  ;;  %v1378_v47 = vmul.f32 %v6593_v51, %v8191_v18  ;;  %v1379_v46 = vmul.f32 %v6603_v15, %v8191_v18  ;;  %v1380_v2 = vmul.f32 %v6606_v29, %v8191_v18 }
 0x314   :  { %4151 = vrot.lane.b32.xlu0 %v4149_v60, %s4354_s6  ;;  %v6677_v60 = vld [vmem:[%s7628_s3 + $0x18] sm:$0x77]  ;;  %v1381_v0 = vmul.f32 %v6609_v34, %v8191_v18  ;;  %v1382_v45 = vmul.f32 %v6612_v42, %v8191_v18  ;;  %v1383_v9 = vmul.f32 %v6615_v19, %v8191_v18  ;;  %v1384_v57 = vmul.f32 %v6618_v20, %v8191_v18  ;;  %v8194_v18 = vld [vmem:[#allocation167_spill] sm:$0xff]  ;;  %s4357_s3 = smov 127   ;;  %s4362_s6 = smov 122  }
 0x315   :  { %8189 = vst [vmem:[#allocation23_spill] sm:$0xff] %v6677_v60  ;;  %v2879_v12 = vrot.slane %v6677_v60, %v8185_v11  ;;  %v2883_v6 = vrot.slane %v6677_v60, %v8178_v16  ;;  %v2963_v28 = vrot.slane %v6677_v60, %v8179_v40  ;;  %v1457_v51 = vmul.f32 %v6621_v41, %v8192_v44 }
 0x316   :  { %v1458_v15 = vmul.f32 %v6624_v35, %v8192_v44  ;;  %v1459_v29 = vmul.f32 %v6629_v1, %v8192_v44  ;;  %v1460_v34 = vmul.f32 %v6632_v62, %v8192_v44  ;;  %v1461_v42 = vmul.f32 %v6635_v17, %v8192_v44 }
 0x317   :  { %v6730_v27 = vrot.slane %v2879_v12, %v8185_v11  ;;  %v6733_v26 = vrot.slane %v2883_v6, %v8185_v11  ;;  %v2955_v12 = vrot.slane %v6661_v54, %v8179_v40  ;;  %v2959_v6 = vrot.slane %v6677_v60, %v8173_v43 }
 0x318   :  { %4165 = vrot.lane.b32.xlu0 %v4163_v56, %s4355_s29  ;;  %v1524_v56 = vrot.slane %v1484_v22, %v8177_v48  ;;  %v6721_v22 = vrot.slane %v2867_v39, %v8185_v11  ;;  %v2951_v39 = vrot.slane %v6661_v54, %v8173_v43  ;;  %v1462_v19 = vmul.f32 %v6643_v10, %v8192_v44  ;;  %s4363_s29 = smov 121  }
 0x319   :  { %v1463_v20 = vmul.f32 %v6646_v55, %v8192_v44  ;;  %v1464_v41 = vmul.f32 %v6649_v63, %v8192_v44  ;;  %v1545_v35 = vmul.f32 %v1516_v58, %v8194_v18  ;;  %v1548_v62 = vmul.f32 %v1528_v7, %v8194_v18 }
 0x31a   :  { %v1547_v1 = vmul.f32 %v1524_v56, %v8194_v18  ;;  %v1549_v54 = vmul.f32 %v1532_v8, %v8194_v18  ;;  %v1465_v17 = vadd.f32 %v1457_v51, %v1377_v24  ;;  %v1550_v40 = vmul.f32 %v1536_v14, %v8194_v18 }
 0x31b   :  { %v1551_v10 = vmul.f32 %v1540_v21, %v8194_v18  ;;  %v1552_v55 = vmul.f32 %v1544_v3, %v8194_v18  ;;  %v1466_v44 = vadd.f32 %v1458_v15, %v1378_v47  ;;  %v1467_v63 = vadd.f32 %v1459_v29, %v1379_v46 }
 0x31c   :  { %4179 = vrot.lane.b32.xlu0 %v4177_v50, %s4356_s4  ;;  %v6712_v50 = vpop.permute.xlu1 %3240  ;;  %v1468_v58 = vadd.f32 %v1460_v34, %v1380_v2  ;;  %v1471_v36 = vadd.f32 %v1463_v20, %v1383_v9  ;;  %v1472_v56 = vadd.f32 %v1464_v41, %v1384_v57  ;;  %v1553_v53 = vadd.f32 %v1545_v35, %v1465_v17  ;;  %v8196_v57 = vld [vmem:[#allocation7_spill] sm:$0xff] }
 0x31d   :  { %8190 = vst [vmem:[#allocation24_spill] sm:$0xff] %v6712_v50  ;;  %v1469_v50 = vadd.f32 %v1461_v42, %v1381_v0  ;;  %v1555_v32 = vadd.f32 %v1547_v1, %v1467_v63  ;;  %v2975_v21 = vrot.slane %v2935_v61, %v8173_v43  ;;  %v6797_v3 = vrot.slane %v2939_v33, %v8173_v43 }
 0x31e   :  { %v1556_v8 = vadd.f32 %v1548_v62, %v1468_v58  ;;  %v1559_v14 = vadd.f32 %v1551_v10, %v1471_v36  ;;  %v1560_v11 = vadd.f32 %v1552_v55, %v1472_v56  ;;  %v6800_v47 = vrot.slane %v2943_v4, %v8173_v43 }
 0x31f   :  { %v1557_v24 = vadd.f32 %v1549_v54, %v1469_v50  ;;  %v6803_v46 = vrot.slane %v2947_v25, %v8173_v43  ;;  %v6806_v9 = vrot.slane %v2951_v39, %v8173_v43  ;;  %v6813_v36 = vrot.slane %v2959_v6, %v8173_v43  ;;  %v8197_v39 = vld [vmem:[#allocation141_spill] sm:$0xff] }
 0x320   :  { %v6769_v60 = vpop.permute.xlu1 %3650  ;;  %v6816_v54 = vrot.slane %v2963_v28, %v8173_v43  ;;  %v1563_v50 = vadd.f32 %v1555_v32, %v8196_v57  ;;  %v1564_v61 = vadd.f32 %v1556_v8, %v8196_v57  ;;  %v1567_v4 = vadd.f32 %v1559_v14, %v8196_v57  ;;  %v8207_v14 = vld [vmem:[#allocation19_spill] sm:$0xff] }
 0x321   :  { %8193 = vst [vmem:[#allocation51_spill] sm:$0xff] %v6769_v60  ;;  %v1546_v60 = vmul.f32 %v1520_v49, %v8194_v18  ;;  %v1470_v49 = vadd.f32 %v1462_v19, %v1382_v45  ;;  %v1561_v45 = vadd.f32 %v1553_v53, %v8196_v57  ;;  %v1565_v33 = vadd.f32 %v1557_v24, %v8196_v57 }
 0x322   :  { %v1568_v25 = vadd.f32 %v1560_v11, %v8196_v57  ;;  %v6829_v28 = vmul.f32 %v6710_v52, %v8197_v39  ;;  %v6837_v32 = vmul.f32 %v6718_v30, %v8197_v39  ;;  %v6841_v6 = vmul.f32 %v6721_v22, %v8197_v39  ;;  %v8203_v30 = vld [vmem:[#allocation152_spill] sm:$0xff] }
 0x323   :  { %v1554_v7 = vadd.f32 %v1546_v60, %v1466_v44  ;;  %v1558_v51 = vadd.f32 %v1550_v40, %v1470_v49  ;;  %v6810_v40 = vrot.slane %v2955_v12, %v8173_v43  ;;  %v6833_v12 = vmul.f32 %v6715_v59, %v8197_v39  ;;  %v8206_v49 = vld [vmem:[#allocation3_spill] sm:$0xff] }
 0x324   :  { %v6793_v16 = vpop.permute.xlu1 %3702  ;;  %8198 = vst [vmem:[#allocation25_spill] sm:$0xff] %v6841_v6  ;;  %v6845_v0 = vmul.f32 %v6724_v5, %v8197_v39  ;;  %v6849_v11 = vmul.f32 %v6727_v23, %v8197_v39  ;;  %v6853_v52 = vmul.f32 %v6730_v27, %v8197_v39  ;;  %v6857_v59 = vmul.f32 %v6733_v26, %v8197_v39  ;;  %v8210_v39 = vld [vmem:[#allocation24_spill] sm:$0xff]  ;;  %v8214_v5 = vld [vmem:[#allocation50_spill] sm:$0xff] }
 0x325   :  { %8195 = vst [vmem:[#allocation82_spill] sm:$0xff] %v6793_v16  ;;  %v1562_v60 = vadd.f32 %v1554_v7, %v8196_v57  ;;  %v1566_v53 = vadd.f32 %v1558_v51, %v8196_v57  ;;  %v6860_v15 = vmul.f32 %v2975_v21, %v8203_v30  ;;  %v1569_v29 = vsub.f32 %v1561_v45, %v6310_v13  ;;  %v6910_v45 = vpop.permute.xlu0 %3292 }
 0x326   :  { %8199 = vst [vmem:[#allocation26_spill] sm:$0xff] %v6845_v0  ;;  %8200 = vst [vmem:[#allocation52_spill] sm:$0xff] %v6849_v11  ;;  %v1571_v34 = vsub.f32 %v1563_v50, %v6310_v13  ;;  %v1572_v42 = vsub.f32 %v1564_v61, %v6310_v13  ;;  %v1573_v19 = vsub.f32 %v1565_v33, %v6310_v13  ;;  %v8209_v33 = vld [vmem:[#allocation21_spill] sm:$0xff] }
 0x327   :  { %8201 = vst [vmem:[#allocation83_spill] sm:$0xff] %v6853_v52  ;;  %8202 = vst [vmem:[#allocation27_spill] sm:$0xff] %v6857_v59  ;;  %v1570_v26 = vsub.f32 %v1562_v60, %v6310_v13  ;;  %v1574_v20 = vsub.f32 %v1566_v53, %v6310_v13  ;;  %v1575_v41 = vsub.f32 %v1567_v4, %v6310_v13  ;;  %v8208_v60 = vld [vmem:[#allocation80_spill] sm:$0xff] }
 0x328   :  { %v6818_v2 = vpop.permute.xlu1 %3344  ;;  %v1576_v18 = vsub.f32 %v1568_v25, %v6310_v13 }
 0x338   :  { %v1580_v35 = vpop.permute.xlu1 %1579 }
 0x339   :  { %v6878_v1 = vmul.f32 %v1580_v35, %v1569_v29  ;;  %v6880_v62 = vmul.f32 %v1580_v35, %v1570_v26  ;;  %v6882_v17 = vmul.f32 %v1580_v35, %v1571_v34  ;;  %v6884_v10 = vmul.f32 %v1580_v35, %v1572_v42 }
 0x33a   :  { %v6886_v55 = vmul.f32 %v1580_v35, %v1573_v19  ;;  %v6888_v44 = vmul.f32 %v1580_v35, %v1574_v20  ;;  %v6890_v63 = vmul.f32 %v1580_v35, %v1575_v41  ;;  %v6892_v58 = vmul.f32 %v1580_v35, %v1576_v18  ;;  %v8211_v41 = vld [vmem:[#allocation4_spill] sm:$0xff] }
 0x33b   :  { %8204 = vst [vmem:[#allocation28_spill] sm:$0xff] %v6878_v1  ;;  %8205 = vst [vmem:[#allocation53_spill] sm:$0xff] %v6880_v62  ;;  %v3150_v13 = vrot.slane %v6878_v1, %v8206_v49  ;;  %v3154_v56 = vrot.slane %v6880_v62, %v8206_v49  ;;  %v3194_v7 = vrot.slane %v6878_v1, %v8173_v43 }
 0x33c   :  { %v3198_v8 = vrot.slane %v6880_v62, %v8173_v43  ;;  %v3246_v24 = vrot.slane %v6878_v1, %v8177_v48  ;;  %v3250_v51 = vrot.slane %v6880_v62, %v8177_v48  ;;  %v3298_v21 = vrot.slane %v6878_v1, %v8207_v14 }
 0x33d   :  { %v3302_v57 = vrot.slane %v6880_v62, %v8207_v14  ;;  %v3179_v50 = vmul.f32 %v3150_v13, %v8208_v60  ;;  %v3180_v61 = vmul.f32 %v3154_v56, %v8208_v60  ;;  %v3223_v53 = vmul.f32 %v3194_v7, %v8209_v33  ;;  %v6916_v25 = vpop.permute.xlu1 %3396  ;;  %v8212_v13 = vld [vmem:[#allocation6_spill] sm:$0xff] }
 0x33e   :  { %v3224_v4 = vmul.f32 %v3198_v8, %v8209_v33  ;;  %v3275_v29 = vmul.f32 %v3246_v24, %v8210_v39  ;;  %v3276_v26 = vmul.f32 %v3250_v51, %v8210_v39  ;;  %v3327_v34 = vmul.f32 %v3298_v21, %v6910_v45 }
 0x33f   :  { %v3328_v42 = vmul.f32 %v3302_v57, %v6910_v45  ;;  %v3231_v19 = vadd.f32 %v3223_v53, %v3179_v50  ;;  %v3350_v18 = vrot.slane %v6878_v1, %v8211_v41  ;;  %v3354_v35 = vrot.slane %v6880_v62, %v8211_v41 }
 0x340   :  { %v3232_v20 = vadd.f32 %v3224_v4, %v3180_v61  ;;  %v3402_v56 = vrot.slane %v6878_v1, %v8212_v13  ;;  %v3406_v7 = vrot.slane %v6880_v62, %v8212_v13  ;;  %v3410_v8 = vrot.slane %v6882_v17, %v8212_v13 }
 0x341   :  { %v3414_v24 = vrot.slane %v6884_v10, %v8212_v13  ;;  %v3283_v51 = vadd.f32 %v3275_v29, %v3231_v19  ;;  %v3379_v57 = vmul.f32 %v3350_v18, %v6818_v2  ;;  %v3380_v50 = vmul.f32 %v3354_v35, %v6818_v2  ;;  %v6936_v61 = vpop.permute.xlu1 %3806  ;;  %v8215_v18 = vld [vmem:[#allocation23_spill] sm:$0xff] }
 0x342   :  { %v3284_v21 = vadd.f32 %v3276_v26, %v3232_v20  ;;  %8213 = vst [vmem:[#allocation84_spill] sm:$0xff] %v6936_v61  ;;  %v3431_v53 = vmul.f32 %v3402_v56, %v6916_v25  ;;  %v3432_v4 = vmul.f32 %v3406_v7, %v6916_v25  ;;  %v6941_v27 = vmul.f32 %v3410_v8, %v6916_v25  ;;  %v8216_v56 = vld [vmem:[#allocation20_spill] sm:$0xff] }
 0x343   :  { %v6944_v23 = vmul.f32 %v3414_v24, %v6916_v25  ;;  %v3335_v19 = vadd.f32 %v3327_v34, %v3283_v51  ;;  %v3506_v7 = vrot.slane %v6878_v1, %v8216_v56  ;;  %v3510_v8 = vrot.slane %v6880_v62, %v8216_v56 }
 0x344   :  { %v3336_v20 = vadd.f32 %v3328_v42, %v3284_v21  ;;  %v3158_v24 = vrot.slane %v6882_v17, %v8206_v49  ;;  %v3162_v29 = vrot.slane %v6884_v10, %v8206_v49  ;;  %v3166_v34 = vrot.slane %v6886_v55, %v8206_v49 }
 0x345   :  { %v3387_v22 = vadd.f32 %v3379_v57, %v3335_v19  ;;  %v3170_v51 = vrot.slane %v6888_v44, %v8206_v49  ;;  %v3174_v21 = vrot.slane %v6890_v63, %v8206_v49  ;;  %v3178_v35 = vrot.slane %v6892_v58, %v8206_v49 }
 0x346   :  { %v3388_v61 = vadd.f32 %v3380_v50, %v3336_v20  ;;  %v6962_v42 = vpop.permute.xlu1 %3858  ;;  %v3181_v57 = vmul.f32 %v3158_v24, %v8208_v60  ;;  %v3182_v20 = vmul.f32 %v3162_v29, %v8208_v60  ;;  %v3183_v26 = vmul.f32 %v3166_v34, %v8208_v60 }
 0x347   :  { %8217 = vst [vmem:[#allocation29_spill] sm:$0xff] %v6962_v42  ;;  %v6971_v50 = vadd.f32 %v3431_v53, %v3387_v22  ;;  %v3184_v42 = vmul.f32 %v3170_v51, %v8208_v60  ;;  %v3185_v16 = vmul.f32 %v3174_v21, %v8208_v60  ;;  %v3186_v62 = vmul.f32 %v3178_v35, %v8208_v60 }
 0x348   :  { %v6973_v19 = vadd.f32 %v3432_v4, %v3388_v61  ;;  %v3202_v1 = vrot.slane %v6882_v17, %v8173_v43  ;;  %v3206_v24 = vrot.slane %v6884_v10, %v8173_v43  ;;  %v3210_v22 = vrot.slane %v6886_v55, %v8173_v43 }
 0x349   :  { %8218 = vst [vmem:[#allocation30_spill] sm:$0xff] %v6971_v50  ;;  %v3214_v61 = vrot.slane %v6888_v44, %v8173_v43  ;;  %v3218_v53 = vrot.slane %v6890_v63, %v8173_v43  ;;  %v3222_v4 = vrot.slane %v6892_v58, %v8173_v43  ;;  %v3254_v29 = vrot.slane %v6882_v17, %v8177_v48 }
 0x34a   :  { %8219 = vst [vmem:[#allocation54_spill] sm:$0xff] %v6973_v19  ;;  %v3225_v60 = vmul.f32 %v3202_v1, %v8209_v33  ;;  %v3258_v35 = vrot.slane %v6884_v10, %v8177_v48  ;;  %v3226_v51 = vmul.f32 %v3206_v24, %v8209_v33  ;;  %v3227_v21 = vmul.f32 %v3210_v22, %v8209_v33 }
 0x34b   :  { %v6997_v34 = vpop.permute.xlu1 %3500  ;;  %v3228_v19 = vmul.f32 %v3214_v61, %v8209_v33  ;;  %v3229_v50 = vmul.f32 %v3218_v53, %v8209_v33  ;;  %v3230_v49 = vmul.f32 %v3222_v4, %v8209_v33  ;;  %v3262_v22 = vrot.slane %v6886_v55, %v8177_v48 }
 0x34c   :  { %v7004_v43 = vmul.f32 %v3506_v7, %v6997_v34  ;;  %v7007_v1 = vmul.f32 %v3510_v8, %v6997_v34  ;;  %v3233_v59 = vadd.f32 %v3225_v60, %v3181_v57  ;;  %v3234_v52 = vadd.f32 %v3226_v51, %v3182_v20 }
 0x34d   :  { %v3235_v11 = vadd.f32 %v3227_v21, %v3183_v26  ;;  %v3236_v0 = vadd.f32 %v3228_v19, %v3184_v42  ;;  %v3237_v6 = vadd.f32 %v3229_v50, %v3185_v16  ;;  %v3238_v24 = vadd.f32 %v3230_v49, %v3186_v62 }
 0x34e   :  { %v3266_v61 = vrot.slane %v6888_v44, %v8177_v48  ;;  %v3270_v7 = vrot.slane %v6890_v63, %v8177_v48  ;;  %v3274_v8 = vrot.slane %v6892_v58, %v8177_v48  ;;  %v3277_v33 = vmul.f32 %v3254_v29, %v8210_v39 }
 0x34f   :  { %v3278_v57 = vmul.f32 %v3258_v35, %v8210_v39  ;;  %v3306_v16 = vrot.slane %v6882_v17, %v8207_v14  ;;  %v3279_v49 = vmul.f32 %v3262_v22, %v8210_v39  ;;  %v3310_v50 = vrot.slane %v6884_v10, %v8207_v14 }
 0x350   :  { %v7022_v62 = vpop.permute.xlu1 %3971  ;;  %v3280_v26 = vmul.f32 %v3266_v61, %v8210_v39  ;;  %v3281_v42 = vmul.f32 %v3270_v7, %v8210_v39  ;;  %v3282_v19 = vmul.f32 %v3274_v8, %v8210_v39  ;;  %v3285_v20 = vadd.f32 %v3277_v33, %v3233_v59 }
 0x351   :  { %8220 = vst [vmem:[#allocation85_spill] sm:$0xff] %v7022_v62  ;;  %v3286_v53 = vadd.f32 %v3278_v57, %v3234_v52  ;;  %v3314_v4 = vrot.slane %v6886_v55, %v8207_v14  ;;  %v3287_v60 = vadd.f32 %v3279_v49, %v3235_v11  ;;  %v3318_v51 = vrot.slane %v6888_v44, %v8207_v14  ;;  %v8221_v11 = vld [vmem:[#allocation18_spill] sm:$0xff] }
 0x352   :  { %v3288_v29 = vadd.f32 %v3280_v26, %v3236_v0  ;;  %v3289_v35 = vadd.f32 %v3281_v42, %v3237_v6  ;;  %v3290_v21 = vadd.f32 %v3282_v19, %v3238_v24  ;;  %v3322_v22 = vrot.slane %v6890_v63, %v8207_v14 }
 0x353   :  { %v3326_v61 = vrot.slane %v6892_v58, %v8207_v14  ;;  %v3329_v39 = vmul.f32 %v3306_v16, %v6910_v45  ;;  %v3330_v52 = vmul.f32 %v3310_v50, %v6910_v45  ;;  %v3331_v7 = vmul.f32 %v3314_v4, %v6910_v45 }
 0x354   :  { %v3993_v59 = vpop.permute.xlu1 %3992  ;;  %v3332_v0 = vmul.f32 %v3318_v51, %v6910_v45  ;;  %v3358_v6 = vrot.slane %v6882_v17, %v8211_v41  ;;  %v3333_v8 = vmul.f32 %v3322_v22, %v6910_v45  ;;  %v3362_v42 = vrot.slane %v6884_v10, %v8211_v41 }
 0x355   :  { %v3995_v24 = vmul.f32 %v3993_v59, %v8221_v11  ;;  %v3334_v33 = vmul.f32 %v3326_v61, %v6910_v45  ;;  %v3337_v57 = vadd.f32 %v3329_v39, %v3285_v20  ;;  %v3338_v49 = vadd.f32 %v3330_v52, %v3286_v53 }
 0x356   :  { %v3339_v26 = vadd.f32 %v3331_v7, %v3287_v60  ;;  %v3340_v16 = vadd.f32 %v3332_v0, %v3288_v29  ;;  %v3341_v50 = vadd.f32 %v3333_v8, %v3289_v35  ;;  %v3366_v4 = vrot.slane %v6886_v55, %v8211_v41 }
 0x357   :  { %3997 = vrot.lane.b32.xlu1 %v3995_v24, %s4357_s3  ;;  %v3342_v19 = vadd.f32 %v3334_v33, %v3290_v21  ;;  %v3370_v51 = vrot.slane %v6888_v44, %v8211_v41  ;;  %v3374_v45 = vrot.slane %v6890_v63, %v8211_v41  ;;  %v3378_v20 = vrot.slane %v6892_v58, %v8211_v41 }
 0x358   :  { %v4007_v22 = vpop.permute.xlu1 %4006  ;;  %v3381_v53 = vmul.f32 %v3358_v6, %v6818_v2  ;;  %v3382_v60 = vmul.f32 %v3362_v42, %v6818_v2  ;;  %v3383_v35 = vmul.f32 %v3366_v4, %v6818_v2  ;;  %v3418_v61 = vrot.slane %v6886_v55, %v8212_v13 }
 0x359   :  { %v4009_v29 = vmul.f32 %v4007_v22, %v8221_v11  ;;  %v3384_v21 = vmul.f32 %v3370_v51, %v6818_v2  ;;  %v3385_v39 = vmul.f32 %v3374_v45, %v6818_v2  ;;  %v3386_v59 = vmul.f32 %v3378_v20, %v6818_v2 }
 0x35a   :  { %v3389_v52 = vadd.f32 %v3381_v53, %v3337_v57  ;;  %v3390_v7 = vadd.f32 %v3382_v60, %v3338_v49  ;;  %v3391_v0 = vadd.f32 %v3383_v35, %v3339_v26  ;;  %v3422_v24 = vrot.slane %v6888_v44, %v8212_v13 }
 0x35b   :  { %4011 = vrot.lane.b32.xlu1 %v4009_v29, %s4358_s25  ;;  %v3392_v6 = vadd.f32 %v3384_v21, %v3340_v16  ;;  %v3426_v8 = vrot.slane %v6890_v63, %v8212_v13  ;;  %v3393_v42 = vadd.f32 %v3385_v39, %v3341_v50  ;;  %v3394_v4 = vadd.f32 %v3386_v59, %v3342_v19 }
 0x35c   :  { %v4021_v33 = vpop.permute.xlu1 %4020  ;;  %v3430_v51 = vrot.slane %v6892_v58, %v8212_v13  ;;  %v3435_v2 = vmul.f32 %v3418_v61, %v6916_v25  ;;  %v3436_v49 = vmul.f32 %v3422_v24, %v6916_v25  ;;  %v7079_v16 = vadd.f32 %v6941_v27, %v3389_v52 }
 0x35d   :  { %v4023_v57 = vmul.f32 %v4021_v33, %v8221_v11  ;;  %v3437_v26 = vmul.f32 %v3426_v8, %v6916_v25  ;;  %v3051_v22 = vrot.slane %v8215_v18, %v8181_v31  ;;  %v7085_v19 = vadd.f32 %v6944_v23, %v3390_v7 }
 0x35e   :  { %v3438_v50 = vmul.f32 %v3430_v51, %v6916_v25  ;;  %v7087_v45 = vadd.f32 %v3435_v2, %v3391_v0  ;;  %v8222_v20 = vrot.slane %v6640_v38, %v8177_v48  ;;  %v8223_v27 = vrot.slane %v6640_v38, %v8181_v31 }
 0x35f   :  { %4025 = vrot.lane.b32.xlu1 %v4023_v57, %s4359_s26  ;;  %v7098_v29 = vadd.f32 %v3436_v49, %v3392_v6  ;;  %v7100_v25 = vadd.f32 %v3437_v26, %v3393_v42  ;;  %v8224_v23 = vrot.slane %v6656_v37, %v8177_v48  ;;  %v8225_v21 = vrot.slane %v6656_v37, %v8181_v31 }
 0x360   :  { %v3063_v53 = vrot.slane %v8222_v20, %v8177_v48  ;;  %v3067_v60 = vrot.slane %v8223_v27, %v8177_v48  ;;  %v4035_v39 = vpop.permute.xlu1 %4034  ;;  %v7110_v38 = vadd.f32 %v3438_v50, %v3394_v4  ;;  %v3514_v59 = vrot.slane %v6882_v17, %v8216_v56 }
 0x361   :  { %v3071_v35 = vrot.slane %v8224_v23, %v8177_v48  ;;  %v3075_v61 = vrot.slane %v8225_v21, %v8177_v48  ;;  %v4037_v52 = vmul.f32 %v4035_v39, %v8221_v11  ;;  %v3518_v7 = vrot.slane %v6884_v10, %v8216_v56 }
 0x362   :  { %v3522_v0 = vrot.slane %v6886_v55, %v8216_v56  ;;  %v3526_v6 = vrot.slane %v6888_v44, %v8216_v56  ;;  %v8226_v37 = vrot.slane %v8214_v5, %v8177_v48  ;;  %v3530_v8 = vrot.slane %v6890_v63, %v8216_v56 }
 0x363   :  { %v3534_v11 = vrot.slane %v6892_v58, %v8216_v56  ;;  %v7130_v33 = vmul.f32 %v3514_v59, %v6997_v34  ;;  %v8227_v42 = vrot.slane %v8214_v5, %v8181_v31  ;;  %4039 = vrot.lane.b32.xlu1 %v4037_v52, %s4360_s0  ;;  %v7138_v51 = vmul.f32 %v3518_v7, %v6997_v34  ;;  %v8229_v59 = vld [vmem:[#allocation75_spill] sm:$0xff] }
 0x364   :  { %v3079_v24 = vrot.slane %v8226_v37, %v8177_v48  ;;  %v7141_v2 = vmul.f32 %v3522_v0, %v6997_v34  ;;  %v7144_v57 = vmul.f32 %v3526_v6, %v6997_v34  ;;  %v8228_v49 = vrot.slane %v8215_v18, %v8177_v48  ;;  %v8231_v6 = vld [vmem:[#allocation26_spill] sm:$0xff]  ;;  %v8232_v37 = vld [vmem:[#allocation52_spill] sm:$0xff] }
 0x365   :  { %v3083_v4 = vrot.slane %v8227_v42, %v8177_v48  ;;  %v3091_v5 = vrot.slane %v3051_v22, %v8177_v48  ;;  %v7152_v50 = vmul.f32 %v3530_v8, %v6997_v34  ;;  %v7155_v20 = vmul.f32 %v3534_v11, %v6997_v34  ;;  %v8233_v8 = vld [vmem:[#allocation83_spill] sm:$0xff] }
 0x366   :  { %v3087_v26 = vrot.slane %v8228_v49, %v8177_v48  ;;  %v3005_v27 = vmul.f32 %v6797_v3, %v8203_v30  ;;  %v3006_v23 = vmul.f32 %v6800_v47, %v8203_v30  ;;  %v3007_v21 = vmul.f32 %v6803_v46, %v8203_v30 }
 0x367   :  { %v3008_v18 = vmul.f32 %v6806_v9, %v8203_v30  ;;  %v3009_v22 = vmul.f32 %v6810_v40, %v8203_v30  ;;  %v3010_v39 = vmul.f32 %v6813_v36, %v8203_v30  ;;  %v3011_v34 = vmul.f32 %v6816_v54, %v8203_v30  ;;  %v4049_v54 = vpop.permute.xlu1 %4048 }
 0x368   :  { %v3092_v3 = vmul.f32 %v3063_v53, %v8229_v59  ;;  %v3093_v52 = vmul.f32 %v3067_v60, %v8229_v59  ;;  %v3094_v47 = vmul.f32 %v3071_v35, %v8229_v59  ;;  %v3095_v46 = vmul.f32 %v3075_v61, %v8229_v59  ;;  %v8230_v60 = vld [vmem:[#allocation25_spill] sm:$0xff] }
 0x369   :  { %v3096_v7 = vmul.f32 %v3079_v24, %v8229_v59  ;;  %v3012_v9 = vadd.f32 %v6860_v15, %v6829_v28  ;;  %v3097_v40 = vmul.f32 %v3083_v4, %v8229_v59  ;;  %v3098_v36 = vmul.f32 %v3087_v26, %v8229_v59  ;;  %v8234_v28 = vld [vmem:[#allocation27_spill] sm:$0xff]  ;;  %v7188_v4 = vpop.permute.xlu0 %3754 }
 0x36a   :  { %v3099_v0 = vmul.f32 %v3091_v5, %v8229_v59  ;;  %v3013_v30 = vadd.f32 %v3005_v27, %v6833_v12  ;;  %v3014_v53 = vadd.f32 %v3006_v23, %v6837_v32  ;;  %v3015_v35 = vadd.f32 %v3007_v21, %v8230_v60  ;;  %v8235_v23 = vld [vmem:[#allocation15_spill] sm:$0xff] }
 0x36b   :  { %v3016_v61 = vadd.f32 %v3008_v18, %v8231_v6  ;;  %v3017_v24 = vadd.f32 %v3009_v22, %v8232_v37  ;;  %v3018_v11 = vadd.f32 %v3010_v39, %v8233_v8  ;;  %v3019_v15 = vadd.f32 %v3011_v34, %v8234_v28  ;;  %v8237_v6 = vld [vmem:[#allocation28_spill] sm:$0xff] }
 0x36c   :  { %v3100_v42 = vadd.f32 %v3092_v3, %v3012_v9  ;;  %v3101_v49 = vadd.f32 %v3093_v52, %v3013_v30  ;;  %v3102_v26 = vadd.f32 %v3094_v47, %v3014_v53  ;;  %v3103_v5 = vadd.f32 %v3095_v46, %v3015_v35  ;;  %v8236_v46 = vld [vmem:[#allocation78_spill] sm:$0xff]  ;;  %v4063_v9 = vpop.permute.xlu1 %4062 }
 0x36d   :  { %v3104_v59 = vadd.f32 %v3096_v7, %v3016_v61  ;;  %v3105_v12 = vadd.f32 %v3097_v40, %v3017_v24  ;;  %v3106_v27 = vadd.f32 %v3098_v36, %v3018_v11  ;;  %v3107_v32 = vadd.f32 %v3099_v0, %v3019_v15  ;;  %v8238_v24 = vld [vmem:[#allocation53_spill] sm:$0xff]  ;;  %v8246_v15 = vld [vmem:[#allocation51_spill] sm:$0xff] }
 0x36e   :  { %v3108_v21 = vadd.f32 %v3100_v42, %v8235_v23  ;;  %v3109_v18 = vadd.f32 %v3101_v49, %v8235_v23  ;;  %v3110_v22 = vadd.f32 %v3102_v26, %v8235_v23  ;;  %v3111_v39 = vadd.f32 %v3103_v5, %v8235_v23 }
 0x36f   :  { %v3112_v34 = vadd.f32 %v3104_v59, %v8235_v23  ;;  %v3113_v3 = vadd.f32 %v3105_v12, %v8235_v23  ;;  %v3114_v52 = vadd.f32 %v3106_v27, %v8235_v23  ;;  %v3115_v47 = vadd.f32 %v3107_v32, %v8235_v23  ;;  %v8242_v23 = vld [vmem:[#allocation3_spill] sm:$0xff] }
 0x370   :  { %v3116_v7 = vsub.f32 %v3108_v21, %v8236_v46  ;;  %v3117_v40 = vsub.f32 %v3109_v18, %v8236_v46  ;;  %v3118_v36 = vsub.f32 %v3110_v22, %v8236_v46  ;;  %v3119_v0 = vsub.f32 %v3111_v39, %v8236_v46  ;;  %v8243_v22 = vld [vmem:[#allocation5_spill] sm:$0xff] }
 0x371   :  { %v3120_v30 = vsub.f32 %v3112_v34, %v8236_v46  ;;  %v3121_v53 = vsub.f32 %v3113_v3, %v8236_v46  ;;  %v3122_v60 = vsub.f32 %v3114_v52, %v8236_v46  ;;  %v3123_v35 = vsub.f32 %v3115_v47, %v8236_v46  ;;  %v3127_v37 = vpop.permute.xlu0 %3126 }
 0x372   :  { %v3454_v61 = vrot.slane %v8237_v6, %v8181_v31  ;;  %v3458_v8 = vrot.slane %v8238_v24, %v8181_v31  ;;  %v3462_v11 = vrot.slane %v6882_v17, %v8181_v31  ;;  %v7216_v42 = vmul.f32 %v3127_v37, %v3116_v7  ;;  %v7229_v17 = vld [vmem:[%s7623_s8] sm:$0xff] }
 0x373   :  { %v7218_v49 = vmul.f32 %v3127_v37, %v3117_v40  ;;  %v7224_v59 = vmul.f32 %v3127_v37, %v3118_v36  ;;  %8239 = vst [vmem:[#allocation31_spill] sm:$0xff] %v7229_v17  ;;  %v7232_v12 = vmul.f32 %v7229_v17, %v4049_v54  ;;  %v7235_v27 = vmul.f32 %v7229_v17, %v4063_v9  ;;  %v4077_v54 = vpop.permute.xlu1 %4076  ;;  %v8244_v7 = vld [vmem:[#allocation22_spill] sm:$0xff]  ;;  %v8245_v36 = vld [vmem:[#allocation81_spill] sm:$0xff] }
 0x374   :  { %v3482_v32 = vrot.slane %v6892_v58, %v8181_v31  ;;  %v3560_v21 = vrot.slane %v7216_v42, %v8242_v23  ;;  %v3604_v39 = vrot.slane %v7216_v42, %v8243_v22  ;;  %v3656_v3 = vrot.slane %v7216_v42, %v8177_v48 }
 0x375   :  { %8240 = vst [vmem:[#allocation32_spill] sm:$0xff] %v7232_v12  ;;  %8241 = vst [vmem:[#allocation55_spill] sm:$0xff] %v7235_v27  ;;  %v3564_v18 = vrot.slane %v7218_v49, %v8242_v23  ;;  %v3608_v34 = vrot.slane %v7218_v49, %v8243_v22  ;;  %v3660_v52 = vrot.slane %v7218_v49, %v8177_v48 }
 0x376   :  { %v3708_v58 = vrot.slane %v7216_v42, %v8207_v14  ;;  %v3712_v47 = vrot.slane %v7218_v49, %v8207_v14  ;;  %v3449_v46 = vpop.permute.xlu0 %3448  ;;  %v3589_v9 = vmul.f32 %v3560_v21, %v8244_v7  ;;  %v3633_v6 = vmul.f32 %v3604_v39, %v8245_v36  ;;  %v8248_v21 = vld [vmem:[#allocation82_spill] sm:$0xff] }
 0x377   :  { %v3590_v40 = vmul.f32 %v3564_v18, %v8244_v7  ;;  %v3634_v24 = vmul.f32 %v3608_v34, %v8245_v36  ;;  %v7259_v5 = vmul.f32 %v3127_v37, %v3119_v0  ;;  %v7261_v26 = vmul.f32 %v3127_v37, %v3120_v30 }
 0x378   :  { %v3685_v28 = vmul.f32 %v3656_v3, %v8246_v15  ;;  %v7265_v62 = vmul.f32 %v7229_v17, %v4077_v54  ;;  %v3641_v27 = vadd.f32 %v3633_v6, %v3589_v9  ;;  %v3686_v14 = vmul.f32 %v3660_v52, %v8246_v15 }
 0x379   :  { %v3642_v12 = vadd.f32 %v3634_v24, %v3590_v40  ;;  %v3737_v48 = vmul.f32 %v3708_v58, %v8248_v21  ;;  %v3738_v18 = vmul.f32 %v3712_v47, %v8248_v21  ;;  %v3760_v39 = vrot.slane %v7216_v42, %v8211_v41 }
 0x37a   :  { %8247 = vst [vmem:[#allocation86_spill] sm:$0xff] %v7265_v62  ;;  %v3764_v0 = vrot.slane %v7218_v49, %v8211_v41  ;;  %v3812_v30 = vrot.slane %v7216_v42, %v8212_v13  ;;  %v3693_v34 = vadd.f32 %v3685_v28, %v3641_v27  ;;  %v3816_v3 = vrot.slane %v7218_v49, %v8212_v13 }
 0x37b   :  { %v3694_v54 = vadd.f32 %v3686_v14, %v3642_v12  ;;  %v3820_v52 = vrot.slane %v7224_v59, %v8212_v13  ;;  %v7280_v58 = vmul.f32 %v3127_v37, %v3121_v53  ;;  %v7282_v47 = vmul.f32 %v3127_v37, %v3122_v60  ;;  %v7288_v6 = vpop.permute.xlu0 %3910  ;;  %v8249_v53 = vld [vmem:[#allocation84_spill] sm:$0xff] }
 0x37c   :  { %v7284_v9 = vmul.f32 %v3127_v37, %v3123_v35  ;;  %v3824_v40 = vrot.slane %v7259_v5, %v8212_v13  ;;  %v3483_v24 = vmul.f32 %v3454_v61, %v3449_v46  ;;  %v3484_v28 = vmul.f32 %v3458_v8, %v3449_v46 }
 0x37d   :  { %v3745_v14 = vadd.f32 %v3737_v48, %v3693_v34  ;;  %v3746_v12 = vadd.f32 %v3738_v18, %v3694_v54  ;;  %v3485_v27 = vmul.f32 %v3462_v11, %v3449_v46  ;;  %v3789_v17 = vmul.f32 %v3760_v39, %v7188_v4  ;;  %v7327_v54 = vld [vmem:[%s7624_s10] sm:$0xff]  ;;  %s4361_s10 = smov 123  }
 0x37e   :  { %v3790_v62 = vmul.f32 %v3764_v0, %v7188_v4  ;;  %v7293_v41 = vmul.f32 %v3812_v30, %v8249_v53  ;;  %v7296_v60 = vmul.f32 %v3816_v3, %v8249_v53  ;;  %v7299_v35 = vmul.f32 %v3820_v52, %v8249_v53  ;;  %v8255_v34 = vld [vmem:[#allocation30_spill] sm:$0xff] }
 0x37f   :  { %v7302_v37 = vmul.f32 %v3824_v40, %v8249_v53  ;;  %v3916_v48 = vrot.slane %v7216_v42, %v8216_v56  ;;  %v7306_v61 = vadd.f32 %v3789_v17, %v3745_v14  ;;  %v3920_v11 = vrot.slane %v7218_v49, %v8216_v56  ;;  %v4096_v39 = vpop.permute.xlu0 %4095  ;;  %v8256_v18 = vld [vmem:[#allocation54_spill] sm:$0xff] }
 0x380   :  { %v7308_v8 = vadd.f32 %v3790_v62, %v3746_v12  ;;  %v8251_v62 = vrot.slane %v6884_v10, %v8181_v31  ;;  %v4098_v3 = vmul.f32 %v7327_v54, %v4096_v39  ;;  %v8252_v52 = vrot.slane %v6886_v55, %v8181_v31 }
 0x381   :  { %v7315_v0 = vmul.f32 %v3916_v48, %v7288_v6  ;;  %v8253_v14 = vrot.slane %v6888_v44, %v8181_v31  ;;  %v8254_v48 = vrot.slane %v6890_v63, %v8181_v31  ;;  %v3491_v30 = vadd.f32 %v3483_v24, %v8255_v34 }
 0x382   :  { %v3486_v17 = vmul.f32 %v8251_v62, %v3449_v46  ;;  %v3487_v40 = vmul.f32 %v8252_v52, %v3449_v46  ;;  %v3490_v62 = vmul.f32 %v3482_v32, %v3449_v46  ;;  %v3493_v56 = vadd.f32 %v3485_v27, %v7079_v16  ;;  %4100 = vrot.lane.b32.xlu0 %v4098_v3, %s4357_s3 }
 0x383   :  { %8250 = vst [vmem:[#allocation33_spill] sm:$0xff] %v7315_v0  ;;  %v3488_v12 = vmul.f32 %v8253_v14, %v3449_v46  ;;  %v3489_v10 = vmul.f32 %v8254_v48, %v3449_v46  ;;  %v3492_v0 = vadd.f32 %v3484_v28, %v8256_v18  ;;  %v4110_v39 = vpop.permute.xlu0 %4109  ;;  %v7350_v46 = vadd.f32 %v7004_v43, %v3491_v30 }
 0x384   :  { %v3494_v55 = vadd.f32 %v3486_v17, %v7085_v19  ;;  %v3495_v52 = vadd.f32 %v3487_v40, %v7087_v45  ;;  %v4112_v63 = vmul.f32 %v7327_v54, %v4110_v39  ;;  %v3498_v32 = vadd.f32 %v3490_v62, %v7110_v38  ;;  %v8257_v39 = vld [vmem:[#allocation58_spill] sm:$0xff] }
 0x385   :  { %v3496_v44 = vadd.f32 %v3488_v12, %v7098_v29  ;;  %v3497_v14 = vadd.f32 %v3489_v10, %v7100_v25  ;;  %v7353_v16 = vadd.f32 %v7007_v1, %v3492_v0  ;;  %v7356_v24 = vadd.f32 %v7130_v33, %v3493_v56 }
 0x386   :  { %v7359_v19 = vadd.f32 %v7138_v51, %v3494_v55  ;;  %v7362_v45 = vadd.f32 %v7141_v2, %v3495_v52  ;;  %v7371_v43 = vadd.f32 %v7155_v20, %v3498_v32  ;;  %v3568_v1 = vrot.slane %v7224_v59, %v8242_v23  ;;  %4114 = vrot.lane.b32.xlu0 %v4112_v63, %s4358_s25 }
 0x387   :  { %v7365_v29 = vadd.f32 %v7144_v57, %v3496_v44  ;;  %v7368_v25 = vadd.f32 %v7152_v50, %v3497_v14  ;;  %v3572_v56 = vrot.slane %v7259_v5, %v8242_v23  ;;  %v4124_v38 = vpop.permute.xlu0 %4123  ;;  %v3576_v33 = vrot.slane %v7261_v26, %v8242_v23 }
 0x388   :  { %v3580_v51 = vrot.slane %v7280_v58, %v8242_v23  ;;  %v3584_v2 = vrot.slane %v7282_v47, %v8242_v23  ;;  %v3588_v57 = vrot.slane %v7284_v9, %v8242_v23  ;;  %v7387_v50 = vmul.f32 %v3920_v11, %v7288_v6 }
 0x389   :  { %v4126_v20 = vmul.f32 %v7327_v54, %v4124_v38  ;;  %v3591_v28 = vmul.f32 %v3568_v1, %v8244_v7  ;;  %v3612_v27 = vrot.slane %v7224_v59, %v8243_v22  ;;  %v3592_v18 = vmul.f32 %v3572_v56, %v8244_v7  ;;  %v8258_v38 = vld [vmem:[#allocation29_spill] sm:$0xff] }
 0x38a   :  { %v3593_v0 = vmul.f32 %v3576_v33, %v8244_v7  ;;  %v3594_v30 = vmul.f32 %v3580_v51, %v8244_v7  ;;  %v3595_v34 = vmul.f32 %v3584_v2, %v8244_v7  ;;  %v3616_v17 = vrot.slane %v7259_v5, %v8243_v22 }
 0x38b   :  { %v3620_v11 = vrot.slane %v7261_v26, %v8243_v22  ;;  %v3624_v3 = vrot.slane %v7280_v58, %v8243_v22  ;;  %v3628_v40 = vrot.slane %v7282_v47, %v8243_v22  ;;  %4128 = vrot.lane.b32.xlu0 %v4126_v20, %s4359_s26  ;;  %v4138_v12 = vpop.permute.xlu0 %4137  ;;  %v3596_v48 = vmul.f32 %v3588_v57, %v8244_v7 }
 0x38c   :  { %v3632_v10 = vrot.slane %v7284_v9, %v8243_v22  ;;  %v3635_v62 = vmul.f32 %v3612_v27, %v8245_v36  ;;  %v3664_v55 = vrot.slane %v7224_v59, %v8257_v39  ;;  %v4140_v52 = vmul.f32 %v7327_v54, %v4138_v12 }
 0x38d   :  { %v3636_v44 = vmul.f32 %v3616_v17, %v8245_v36  ;;  %v3637_v14 = vmul.f32 %v3620_v11, %v8245_v36  ;;  %v3638_v63 = vmul.f32 %v3624_v3, %v8245_v36  ;;  %v3639_v32 = vmul.f32 %v3628_v40, %v8245_v36 }
 0x38e   :  { %v3640_v7 = vmul.f32 %v3632_v10, %v8245_v36  ;;  %v3668_v22 = vrot.slane %v7259_v5, %v8257_v39  ;;  %v3672_v1 = vrot.slane %v7261_v26, %v8257_v39  ;;  %v7424_v56 = vadd.f32 %v7293_v41, %v7306_v61  ;;  %v8260_v10 = vld [vmem:[#allocation19_spill] sm:$0xff] }
 0x38f   :  { %v8259_v33 = vrot.slane %v7216_v42, %v8181_v31  ;;  %v3643_v2 = vadd.f32 %v3635_v62, %v3591_v28  ;;  %v3676_v36 = vrot.slane %v7280_v58, %v8257_v39  ;;  %4142 = vrot.lane.b32.xlu0 %v4140_v52, %s4360_s0  ;;  %v4152_v57 = vpop.permute.xlu0 %4151  ;;  %v3644_v20 = vadd.f32 %v3636_v44, %v3592_v18 }
 0x390   :  { %v3645_v27 = vadd.f32 %v3637_v14, %v3593_v0  ;;  %v3680_v17 = vrot.slane %v7282_v47, %v8257_v39  ;;  %v3684_v41 = vrot.slane %v7284_v9, %v8257_v39  ;;  %v4154_v61 = vmul.f32 %v7327_v54, %v4152_v57 }
 0x391   :  { %v7430_v51 = vmul.f32 %v8259_v33, %v8258_v38  ;;  %v3646_v42 = vadd.f32 %v3638_v63, %v3594_v30  ;;  %v3647_v11 = vadd.f32 %v3639_v32, %v3595_v34  ;;  %v3648_v3 = vadd.f32 %v3640_v7, %v3596_v48  ;;  %v8261_v34 = vld [vmem:[#allocation32_spill] sm:$0xff] }
 0x392   :  { %v3687_v28 = vmul.f32 %v3664_v55, %v8246_v15  ;;  %v3688_v40 = vmul.f32 %v3668_v22, %v8246_v15  ;;  %v3689_v12 = vmul.f32 %v3672_v1, %v8246_v15  ;;  %v3716_v18 = vrot.slane %v7224_v59, %v8260_v10 }
 0x393   :  { %v3690_v0 = vmul.f32 %v3676_v36, %v8246_v15  ;;  %v3691_v62 = vmul.f32 %v3680_v17, %v8246_v15  ;;  %v3692_v39 = vmul.f32 %v3684_v41, %v8246_v15  ;;  %v3720_v30 = vrot.slane %v7259_v5, %v8260_v10  ;;  %4053 = vrot.lane.b32.xlu0 %v8261_v34, %s4361_s10  ;;  %v4166_v7 = vpop.permute.xlu0 %4165  ;;  %v8263_v34 = vld [vmem:[#allocation55_spill] sm:$0xff] }
 0x394   :  { %v3695_v48 = vadd.f32 %v3687_v28, %v3643_v2  ;;  %v3696_v55 = vadd.f32 %v3688_v40, %v3644_v20  ;;  %v3697_v52 = vadd.f32 %v3689_v12, %v3645_v27  ;;  %v3724_v44 = vrot.slane %v7261_v26, %v8260_v10  ;;  %v8262_v20 = vld [vmem:[#allocation4_spill] sm:$0xff] }
 0x395   :  { %v3698_v14 = vadd.f32 %v3690_v0, %v3646_v42  ;;  %v3728_v63 = vrot.slane %v7280_v58, %v8260_v10  ;;  %v3732_v32 = vrot.slane %v7282_v47, %v8260_v10  ;;  %v3736_v15 = vrot.slane %v7284_v9, %v8260_v10 }
 0x396   :  { %v3699_v22 = vadd.f32 %v3691_v62, %v3647_v11  ;;  %v3700_v1 = vadd.f32 %v3692_v39, %v3648_v3  ;;  %v3739_v33 = vmul.f32 %v3716_v18, %v8248_v21  ;;  %v3740_v2 = vmul.f32 %v3720_v30, %v8248_v21 }
 0x397   :  { %v3741_v36 = vmul.f32 %v3724_v44, %v8248_v21  ;;  %v3742_v57 = vmul.f32 %v3728_v63, %v8248_v21  ;;  %v3768_v27 = vrot.slane %v7224_v59, %v8262_v20  ;;  %v3772_v17 = vrot.slane %v7259_v5, %v8262_v20  ;;  %4156 = vrot.lane.b32.xlu0 %v4154_v61, %s4361_s10  ;;  %v4180_v30 = vpop.permute.xlu0 %4179 }
 0x398   :  { %v3850_v41 = vadd.f32 %v7296_v60, %v7308_v8  ;;  %v3743_v42 = vmul.f32 %v3732_v32, %v8248_v21  ;;  %v3744_v11 = vmul.f32 %v3736_v15, %v8248_v21  ;;  %v3776_v3 = vrot.slane %v7261_v26, %v8262_v20 }
 0x399   :  { %v3747_v28 = vadd.f32 %v3739_v33, %v3695_v48  ;;  %v3748_v40 = vadd.f32 %v3740_v2, %v3696_v55  ;;  %v3749_v12 = vadd.f32 %v3741_v36, %v3697_v52  ;;  %v3750_v10 = vadd.f32 %v3742_v57, %v3698_v14 }
 0x39a   :  { %v3751_v18 = vadd.f32 %v3743_v42, %v3699_v22  ;;  %v3780_v0 = vrot.slane %v7280_v58, %v8262_v20  ;;  %v3784_v62 = vrot.slane %v7282_v47, %v8262_v20  ;;  %v3788_v60 = vrot.slane %v7284_v9, %v8262_v20 }
 0x39b   :  { %v3752_v8 = vadd.f32 %v3744_v11, %v3700_v1  ;;  %v3791_v21 = vmul.f32 %v3768_v27, %v7188_v4  ;;  %v3792_v61 = vmul.f32 %v3772_v17, %v7188_v4  ;;  %v3793_v39 = vmul.f32 %v3776_v3, %v7188_v4  ;;  %4067 = vrot.lane.b32.xlu0 %v8263_v34, %s4362_s6 }
 0x39c   :  { %v3794_v48 = vmul.f32 %v3780_v0, %v7188_v4  ;;  %v3795_v55 = vmul.f32 %v3784_v62, %v7188_v4  ;;  %v3828_v52 = vrot.slane %v7261_v26, %v8212_v13  ;;  %v3832_v44 = vrot.slane %v7280_v58, %v8212_v13 }
 0x39d   :  { %v3799_v14 = vadd.f32 %v3791_v21, %v3747_v28  ;;  %v3800_v63 = vadd.f32 %v3792_v61, %v3748_v40  ;;  %v3836_v32 = vrot.slane %v7282_v47, %v8212_v13  ;;  %v3840_v15 = vrot.slane %v7284_v9, %v8212_v13 }
 0x39e   :  { %v4168_v22 = vmul.f32 %v7327_v54, %v4166_v7  ;;  %v3796_v1 = vmul.f32 %v3788_v60, %v7188_v4  ;;  %v3801_v33 = vadd.f32 %v3793_v39, %v3749_v12  ;;  %v3802_v2 = vadd.f32 %v3794_v48, %v3750_v10  ;;  %v8267_v48 = vld [vmem:[#allocation20_spill] sm:$0xff] }
 0x39f   :  { %v8264_v36 = vrot.slane %v7218_v49, %v8181_v31  ;;  %v8265_v20 = vrot.slane %v7224_v59, %v8181_v31  ;;  %v4182_v17 = vmul.f32 %v7327_v54, %v4180_v30  ;;  %v3803_v42 = vadd.f32 %v3795_v55, %v3751_v18 }
 0x3a0   :  { %4170 = vrot.lane.b32.xlu0 %v4168_v22, %s4362_s6  ;;  %v3804_v13 = vadd.f32 %v3796_v1, %v3752_v8  ;;  %v3845_v7 = vmul.f32 %v3828_v52, %v8249_v53  ;;  %v3846_v4 = vmul.f32 %v3832_v44, %v8249_v53  ;;  %v3847_v11 = vmul.f32 %v3836_v32, %v8249_v53 }
 0x3a1   :  { %v3894_v57 = vmul.f32 %v8264_v36, %v8258_v38  ;;  %v3895_v27 = vmul.f32 %v8265_v20, %v8258_v38  ;;  %v3848_v3 = vmul.f32 %v3840_v15, %v8249_v53  ;;  %v3851_v49 = vadd.f32 %v7299_v35, %v3799_v14 }
 0x3a2   :  { %v3852_v28 = vadd.f32 %v7302_v37, %v3800_v63  ;;  %v3876_v40 = vrot.slane %v7259_v5, %v8181_v31  ;;  %v3853_v12 = vadd.f32 %v3845_v7, %v3801_v33  ;;  %v3854_v10 = vadd.f32 %v3846_v4, %v3802_v2  ;;  %v8266_v37 = vld [vmem:[#allocation86_spill] sm:$0xff]  ;;  %v8269_v7 = vld [vmem:[#allocation85_spill] sm:$0xff] }
 0x3a3   :  { %v3880_v18 = vrot.slane %v7261_v26, %v8181_v31  ;;  %v3884_v0 = vrot.slane %v7280_v58, %v8181_v31  ;;  %v3855_v62 = vadd.f32 %v3847_v11, %v3803_v42  ;;  %v3888_v60 = vrot.slane %v7282_v47, %v8181_v31 }
 0x3a4   :  { %v3892_v53 = vrot.slane %v7284_v9, %v8181_v31  ;;  %v3896_v35 = vmul.f32 %v3876_v40, %v8258_v38  ;;  %4081 = vrot.lane.b32.xlu0 %v8266_v37, %s4363_s29  ;;  %v3901_v61 = vadd.f32 %v7430_v51, %v7424_v56  ;;  %v3902_v39 = vadd.f32 %v3894_v57, %v3850_v41  ;;  %v8268_v41 = vld [vmem:[#allocation33_spill] sm:$0xff] }
 0x3a5   :  { %v3897_v8 = vmul.f32 %v3880_v18, %v8258_v38  ;;  %v3898_v21 = vmul.f32 %v3884_v0, %v8258_v38  ;;  %v3903_v30 = vadd.f32 %v3895_v27, %v3851_v49  ;;  %v3924_v55 = vrot.slane %v7224_v59, %v8267_v48 }
 0x3a6   :  { %v3904_v34 = vadd.f32 %v3896_v35, %v3852_v28  ;;  %v3928_v31 = vrot.slane %v7259_v5, %v8267_v48  ;;  %v3856_v52 = vadd.f32 %v3848_v3, %v3804_v13  ;;  %v3899_v44 = vmul.f32 %v3888_v60, %v8258_v38 }
 0x3a7   :  { %v3905_v14 = vadd.f32 %v3897_v8, %v3853_v12  ;;  %v3932_v63 = vrot.slane %v7261_v26, %v8267_v48  ;;  %v3900_v32 = vmul.f32 %v3892_v53, %v8258_v38  ;;  %v3906_v15 = vadd.f32 %v3898_v21, %v3854_v10 }
 0x3a8   :  { %v3947_v56 = vmul.f32 %v3924_v55, %v7288_v6  ;;  %v3948_v51 = vmul.f32 %v3928_v31, %v7288_v6  ;;  %4184 = vrot.lane.b32.xlu0 %v4182_v17, %s4363_s29  ;;  %v3936_v59 = vrot.slane %v7280_v58, %v8267_v48  ;;  %v3953_v22 = vadd.f32 %v8268_v41, %v3901_v61 }
 0x3a9   :  { %v3949_v5 = vmul.f32 %v3932_v63, %v7288_v6  ;;  %v3954_v1 = vadd.f32 %v7387_v50, %v3902_v39  ;;  %v3907_v33 = vadd.f32 %v3899_v44, %v3855_v62  ;;  %v3940_v26 = vrot.slane %v7282_v47, %v8267_v48 }
 0x3aa   :  { %v3955_v38 = vadd.f32 %v3947_v56, %v3903_v30  ;;  %v3956_v2 = vadd.f32 %v3948_v51, %v3904_v34  ;;  %v3950_v36 = vmul.f32 %v3936_v59, %v7288_v6  ;;  %v3961_v20 = vadd.f32 %v3953_v22, %v7350_v46 }
 0x3ab   :  { %v3957_v57 = vadd.f32 %v3949_v5, %v3905_v14  ;;  %v3962_v27 = vadd.f32 %v3954_v1, %v7353_v16  ;;  %v3908_v58 = vadd.f32 %v3900_v32, %v3856_v52  ;;  %v3944_v17 = vrot.slane %v7284_v9, %v8267_v48  ;;  %v8271_v48 = vld [vmem:[#allocation79_spill] sm:$0xff] }
 0x3ac   :  { %v3951_v42 = vmul.f32 %v3940_v26, %v7288_v6  ;;  %v3963_v50 = vadd.f32 %v3955_v38, %v7356_v24  ;;  %v3958_v13 = vadd.f32 %v3950_v36, %v3906_v15  ;;  %v3964_v47 = vadd.f32 %v3956_v2, %v7359_v19  ;;  %v8272_v14 = vld [vmem:[#allocation31_spill] sm:$0xff] }
 0x3ad   :  { %v7552_v4 = vadd.f32 %v8269_v7, %v3961_v20  ;;  %v7555_v11 = vadd.f32 %v8269_v7, %v3962_v27  ;;  %v3952_v46 = vmul.f32 %v3944_v17, %v7288_v6  ;;  %v3965_v3 = vadd.f32 %v3957_v57, %v7362_v45  ;;  %v8273_v17 = vld [vmem:[#allocation48_spill] sm:$0xff] }
 0x3ae   :  { %v3959_v16 = vadd.f32 %v3951_v42, %v3907_v33  ;;  %v7560_v9 = vadd.f32 %v8269_v7, %v3963_v50  ;;  %v3966_v19 = vadd.f32 %v3958_v13, %v7365_v29  ;;  %v3977_v28 = vadd.f32 %v8269_v7, %v3964_v47 }
 0x3af   :  { %v4190_v24 = vadd.f32 %v7555_v11, %v7552_v4  ;;  %v3960_v49 = vadd.f32 %v3952_v46, %v3908_v58  ;;  %v3978_v6 = vadd.f32 %v8269_v7, %v3965_v3  ;;  %v3985_v55 = vrot.slane %v8271_v48, %v8242_v23 }
 0x3b0   :  { %v3967_v12 = vadd.f32 %v3959_v16, %v7368_v25  ;;  %v3979_v18 = vadd.f32 %v8269_v7, %v3966_v19  ;;  %v4199_v50 = vmul.f32 67.0, %v8273_v17 }
 0x3b1   :  { %v4191_v40 = vadd.f32 %v4190_v24, %v7560_v9  ;;  %v3968_v45 = vadd.f32 %v3960_v49, %v7371_v43  ;;  %v8270_v43 = vld [vmem:[#allocation49_spill] sm:$0xff]  ;;  %v3986_v63 = vmul.f32 %v8272_v14, %v3985_v55 }
 0x3b2   :  { %v3980_v62 = vadd.f32 %v8269_v7, %v3967_v12  ;;  %v4088_v34 = vrot.slane %v8270_v43, %v8242_v23 }
 0x3b3   :  { %v4192_v10 = vadd.f32 %v4191_v40, %v3977_v28  ;;  %v3981_v53 = vadd.f32 %v8269_v7, %v3968_v45 }
 0x3b4   :  { %v4089_v44 = vmul.f32 %v7327_v54, %v4088_v34 }
 0x3b5   :  { %v4193_v0 = vadd.f32 %v4192_v10, %v3978_v6 }
 0x3b7   :  { %v4194_v60 = vadd.f32 %v4193_v0, %v3979_v18 }
 0x3b9   :  { %v4195_v29 = vadd.f32 %v4194_v60, %v3980_v62 }
 0x3bb   :  { %v4196_v35 = vadd.f32 %v4195_v29, %v3981_v53 }
 0x3bd   :  { %4197 = vadd.xlane.f32.xlu1 %v4196_v35 }
 0x3c9   :  { %v3998_v25 = vpop.permute.xlu1 %3997 }
 0x3ca   :  { %v4000_v56 = vadd.f32 %v3998_v25, %v3986_v63 }
 0x3cd   :  { %v4012_v39 = vpop.permute.xlu1 %4011 }
 0x3ce   :  { %v4014_v59 = vadd.f32 %v4012_v39, %v4000_v56 }
 0x3d1   :  { %v4026_v52 = vpop.permute.xlu1 %4025 }
 0x3d2   :  { %v4028_v1 = vadd.f32 %v4026_v52, %v4014_v59 }
 0x3d5   :  { %v4040_v5 = vpop.permute.xlu1 %4039 }
 0x3d6   :  { %v4042_v26 = vadd.f32 %v4040_v5, %v4028_v1 }
 0x3f4   :  { %v4101_v37 = vpop.permute.xlu0 %4100 }
 0x3f5   :  { %v4103_v15 = vadd.f32 %v4101_v37, %v4089_v44 }
 0x3f8   :  { %v4115_v8 = vpop.permute.xlu0 %4114 }
 0x3f9   :  { %v4117_v51 = vadd.f32 %v4115_v8, %v4103_v15 }
 0x3fd   :  { %v4129_v21 = vpop.permute.xlu0 %4128 }
 0x3fe   :  { %v4131_v22 = vadd.f32 %v4129_v21, %v4117_v51 }
 0x401   :  { %v4143_v61 = vpop.permute.xlu0 %4142 }
 0x402   :  { %v4145_v33 = vadd.f32 %v4143_v61, %v4131_v22 }
 0x405   :  { %v4054_v30 = vpop.permute.xlu0 %4053 }
 0x406   :  { %v4056_v2 = vadd.f32 %v4054_v30, %v4042_v26 }
 0x409   :  { %v4157_v31 = vpop.permute.xlu0 %4156 }
 0x40a   :  { %v4159_v23 = vadd.f32 %v4157_v31, %v4145_v33 }
 0x40d   :  { %v4068_v32 = vpop.permute.xlu0 %4067 }
 0x40e   :  { %v4070_v36 = vadd.f32 %v4068_v32, %v4056_v2 }
 0x412   :  { %v4171_v41 = vpop.permute.xlu0 %4170 }
 0x413   :  { %v4173_v57 = vadd.f32 %v4171_v41, %v4159_v23 }
 0x416   :  { %v4082_v38 = vpop.permute.xlu0 %4081 }
 0x417   :  { %v4084_v54 = vadd.f32 %v4082_v38, %v4070_v36 }
 0x41a   :  { %v4185_v20 = vpop.permute.xlu0 %4184 }
 0x41b   :  { %v4187_v27 = vadd.f32 %v4185_v20, %v4173_v57 }
 0x41d   :  { %v4188_v58 = vadd.f32 %v4187_v27, %v4084_v54 }
 0x41f   :  { %v4189_v42 = vadd.f32 %v4188_v58, %v8273_v17 }
 0x421   :  { %v4201_v7 = vmul.f32 65.0, %v4189_v42 }
 0x446   :  { %v4198_v13 = vpop.xlane.xlu1 %4197 }
 0x447   :  { %v4200_v47 = vadd.f32 %v4199_v50, %v4198_v13 }
 0x449   :  { %v4202_v46 = vadd.f32 %v4201_v7, %v4200_v47 }
 0x44b   :  { %v4204_v16 = vmul.f32 0.00086505193, %v4202_v46 }
 0x44d   :  { %v4219_v3 = vsub.f32 %v4189_v42, %v4204_v16  ;;  %4207 = vperm.xlu0 %4331, %v4204_v16  }
 0x44f   :  { %v4240_v55 = vmul.f32 65.0, %v4219_v3 }
 0x451   :  { %v4241_v44 = vmul.f32 %v4240_v55, %v4219_v3 }
 0x4c8   :  { %v4208_v24 = vpop.permute.xlu0 %4207 }
 0x4c9   :  { %v4210_v49 = vsub.f32 %v7552_v4, %v4208_v24  ;;  %v4211_v19 = vsub.f32 %v7555_v11, %v4208_v24  ;;  %v4212_v40 = vsub.f32 %v7560_v9, %v4208_v24  ;;  %v4213_v12 = vsub.f32 %v3977_v28, %v4208_v24 }
 0x4ca   :  { %v4214_v0 = vsub.f32 %v3978_v6, %v4208_v24  ;;  %v4215_v35 = vsub.f32 %v3979_v18, %v4208_v24  ;;  %v4216_v21 = vsub.f32 %v3980_v62, %v4208_v24  ;;  %v4217_v39 = vsub.f32 %v3981_v53, %v4208_v24 }
 0x4cb   :  { %v4220_v10 = vmul.f32 %v4210_v49, %v4210_v49  ;;  %v4221_v45 = vmul.f32 %v4211_v19, %v4211_v19  ;;  %v4222_v60 = vmul.f32 %v4212_v40, %v4212_v40  ;;  %v4223_v37 = vmul.f32 %v4213_v12, %v4213_v12 }
 0x4cc   :  { %v4224_v25 = vmul.f32 %v4214_v0, %v4214_v0  ;;  %v4225_v30 = vmul.f32 %v4215_v35, %v4215_v35  ;;  %v4226_v4 = vmul.f32 %v4216_v21, %v4216_v21  ;;  %v4227_v11 = vmul.f32 %v4217_v39, %v4217_v39 }
 0x4cd   :  { %v4228_v29 = vadd.f32 %v4221_v45, %v4220_v10  ;;  %v4218_v28 = vsub.f32 %v8273_v17, %v4204_v16 }
 0x4cf   :  { %v4229_v8 = vadd.f32 %v4228_v29, %v4222_v60  ;;  %v4237_v6 = vmul.f32 67.0, %v4218_v28 }
 0x4d1   :  { %v4230_v61 = vadd.f32 %v4229_v8, %v4223_v37  ;;  %v4238_v31 = vmul.f32 %v4237_v6, %v4218_v28 }
 0x4d3   :  { %v4231_v43 = vadd.f32 %v4230_v61, %v4224_v25 }
 0x4d5   :  { %v4232_v34 = vadd.f32 %v4231_v43, %v4225_v30 }
 0x4d7   :  { %v4233_v48 = vadd.f32 %v4232_v34, %v4226_v4 }
 0x4d9   :  { %v4234_v9 = vadd.f32 %v4233_v48, %v4227_v11 }
 0x4db   :  { %4235 = vadd.xlane.f32.xlu0 %v4234_v9 }
 0x564   :  { %v4236_v18 = vpop.xlane.xlu0 %4235 }
 0x565   :  { %v4239_v52 = vadd.f32 %v4238_v31, %v4236_v18 }
 0x567   :  { %v4242_v62 = vadd.f32 %v4241_v44, %v4239_v52 }
 0x569   :  { %v4243_v14 = vmul.f32 0.00086505193, %v4242_v62 }
 0x56b   :  { %v4244_v63 = vadd.f32 1e-05, %v4243_v14 }
 0x56d   :  { %4336 = vrsqrt.f32 %v4244_v63 }
 0x57a   :  { %v4337_v53 = vpop.eup %4336 }
 0x57b   :  { %v4267_v32 = vmul.f32 %v4337_v53, %v4218_v28  ;;  %4248 = vperm.xlu1 %4330, %v4337_v53   ;;  %v4270_v15 = vmul.f32 %v4337_v53, %v4219_v3 }
 0x57d   :  { %4269 = vst.msk [vmem:[%s7629_s13] sm:$0xff] %vm4268_vm0, %v4267_v32 }
 0x57f   :  { %4272 = vrot.lane.b32.xlu1 %v4270_v15, %s4350_s9 }
 0x5f6   :  { %v4249_v56 = vpop.permute.xlu1 %4248 }
 0x5f7   :  { %v4251_v51 = vmul.f32 %v4249_v56, %v4210_v49  ;;  %v4252_v59 = vmul.f32 %v4249_v56, %v4211_v19  ;;  %v4253_v5 = vmul.f32 %v4249_v56, %v4212_v40  ;;  %v4254_v41 = vmul.f32 %v4249_v56, %v4213_v12 }
 0x5f8   :  { %v4255_v22 = vmul.f32 %v4249_v56, %v4214_v0  ;;  %v4256_v1 = vmul.f32 %v4249_v56, %v4215_v35  ;;  %v4257_v33 = vmul.f32 %v4249_v56, %v4216_v21  ;;  %v4258_v26 = vmul.f32 %v4249_v56, %v4217_v39 }
 0x5f9   :  { %4259 = vst [vmem:[%s7630_s12] sm:$0xff] %v4251_v51  ;;  %4260 = vst [vmem:[%s7630_s12 + $0x8] sm:$0xff] %v4252_v59 }
 0x5fa   :  { %4261 = vst [vmem:[%s7630_s12 + $0x10] sm:$0xff] %v4253_v5  ;;  %4262 = vst [vmem:[%s7630_s12 + $0x18] sm:$0xff] %v4254_v41  ;;  %v4273_v38 = vpop.permute.xlu1 %4272 }
 0x5fb   :  { %4263 = vst [vmem:[%s7630_s12 + $0x20] sm:$0xff] %v4255_v22  ;;  %4264 = vst [vmem:[%s7630_s12 + $0x28] sm:$0xff] %v4256_v1 }
 0x5fc   :  { %4265 = vst [vmem:[%s7630_s12 + $0x30] sm:$0xff] %v4257_v33  ;;  %4266 = vst [vmem:[%s7630_s12 + $0x38] sm:$0xff] %v4258_v26 }
 0x5fd   :  { %4276 = vst.msk [vmem:[%s7629_s13] sm:$0xff] %vm4275_vm1, %v4273_v38 }

</bundles_post_ra>
